<compile_context>
chip_gen: v6e
topology: v6e:2x2x1
jax: 0.10.0
libtpu: 0.0.40
codegen_flags: <defaults>
</compile_context>

<pallas_src>
import jax
import jax.numpy as jnp
from jax.experimental import pallas as pl
from jax.experimental.pallas import tpu as pltpu

K = 3
PAD = K // 2


def _im2col(pad_ref, H, W, C):
    """(H*W, 9*C) im2col patch matrix from a padded (H+2, W+2, C) VMEM ref.

    Column order is tap-major, channel-minor, matching w.reshape(9*C, Cout)."""
    cols = []
    for ky in range(K):
        for kx in range(K):
            cols.append(pad_ref[ky:ky + H, kx:kx + W, :].reshape(H * W, C))
    return jnp.concatenate(cols, axis=1)


def trans_high_kernel(x_ref, g_ref, wf_ref, bf_ref, wd_ref, bd_ref, o_ref,
                      xgpad_ref, hpad_ref):
    """Fused Trans_high forward for one batch element (grid axis = batch)."""
    H, W, Cin = x_ref.shape[1], x_ref.shape[2], x_ref.shape[3]
    Cout = o_ref.shape[3]
    Cm = hpad_ref.shape[2]
    HW = H * W

    # Zero-halo scratch (replaces host-side jnp.pad + its HBM round trip).
    # Zeroing every step is cheap (few KiB) and stays correct under megacore
    # sharding of the batch grid axis.
    xgpad_ref[...] = jnp.zeros_like(xgpad_ref)
    hpad_ref[...] = jnp.zeros_like(hpad_ref)
    xgpad_ref[PAD:PAD + H, PAD:PAD + W, :Cin] = x_ref[0]
    xgpad_ref[PAD:PAD + H, PAD:PAD + W, Cin:] = g_ref[0]

    # ---- front: encoder / scale / shift convs in ONE im2col matmul ------------
    # patches: (HW, 9*2*Cin); block-structured weight (9*2*Cin, 3*Cm) yields
    # columns [enc | scale | shift] in a single MXU pass.
    xg_pat = _im2col(xgpad_ref, H, W, 2 * Cin)
    front = jnp.dot(xg_pat, wf_ref[...],
                    preferred_element_type=jnp.float32) + bf_ref[...]
    enc = front[:, :Cm]
    scale = front[:, Cm:2 * Cm]
    shift = front[:, 2 * Cm:]
    # nn.LeakyReLU(True) -> negative_slope=1.0, i.e. the identity: dropped.
    # TODO(synk): if the PyTorch author meant inplace=True (slope 0.01), insert
    #             enc = jnp.where(enc >= 0, enc, 0.01 * enc) here.

    # SFT modulation (x += x*scale + shift), kept entirely in VMEM.
    h = enc + enc * scale + shift                         # (HW, Cm)

    # ---- decoder conv fused into the same kernel -------------------------------
    hpad_ref[PAD:PAD + H, PAD:PAD + W, :] = h.reshape(H, W, Cm)
    h_pat = _im2col(hpad_ref, H, W, Cm)                   # (HW, 9*Cm)
    dec = jnp.dot(h_pat, wd_ref[...],
                  preferred_element_type=jnp.float32) + bd_ref[...]

    # Trans_high residual: out = x + sft(x, guide)
    out = dec + x_ref[0].reshape(HW, Cin)
    o_ref[0] = out.reshape(H, W, Cout).astype(o_ref.dtype)


def _repack_params(params):
    """One-time host-side repack of conv weights into im2col-matmul form."""
    Kh, Kw, Cin, Cm = params["w_enc"].shape
    Cout = params["w_dec"].shape[-1]
    z = jnp.zeros((Kh, Kw, Cin, Cm), jnp.float32)
    # x-channel rows: [w_enc | 0 | 0]; guide-channel rows: [0 | w_scale | w_shift]
    top = jnp.concatenate([params["w_enc"], z, z], axis=-1)
    bot = jnp.concatenate([z, params["w_scale"], params["w_shift"]], axis=-1)
    w_front = jnp.concatenate([top, bot], axis=2)                 # (3,3,2Cin,3Cm)
    w_front_f = w_front.reshape(Kh * Kw * 2 * Cin, 3 * Cm)
    b_front = jnp.concatenate(
        [params["b_enc"].reshape(1, Cm),
         params["b_scale"].reshape(1, Cm),
         params["b_shift"].reshape(1, Cm)], axis=-1)              # (1, 3*Cm)
    w_dec_f = params["w_dec"].reshape(Kh * Kw * Cm, Cout)         # (9*Cm, Cout)
    b_dec = params["b_dec"].reshape(1, Cout)
    return w_front_f, b_front, w_dec_f, b_dec


def trans_high_forward(x_nchw, guide_nchw, params):
    """Trans_high forward: x + SFT_layer(x, guide). NCHW f32 in/out."""
    x = jnp.transpose(x_nchw, (0, 2, 3, 1))        # -> NHWC
    g = jnp.transpose(guide_nchw, (0, 2, 3, 1))    # -> NHWC
    B, H, W, Cin = x.shape
    Cm = params["w_enc"].shape[-1]
    Cout = params["w_dec"].shape[-1]
    assert Cin == Cout, "Trans_high residual requires in_ch == out_ch"
    Hp, Wp = H + 2 * PAD, W + 2 * PAD

    w_front_f, b_front, w_dec_f, b_dec = _repack_params(params)

    def _full(shape):
        zeros = (0,) * len(shape)
        return pl.BlockSpec(shape, lambda b, _z=zeros: _z)

    out = pl.pallas_call(
        trans_high_kernel,
        out_shape=jax.ShapeDtypeStruct((B, H, W, Cout), jnp.float32),
        grid=(B,),
        in_specs=[
            pl.BlockSpec((1, H, W, Cin), lambda b: (b, 0, 0, 0)),
            pl.BlockSpec((1, H, W, Cin), lambda b: (b, 0, 0, 0)),
            _full(w_front_f.shape), _full(b_front.shape),
            _full(w_dec_f.shape), _full(b_dec.shape),
        ],
        out_specs=pl.BlockSpec((1, H, W, Cout), lambda b: (b, 0, 0, 0)),
        scratch_shapes=[
            pltpu.VMEM((Hp, Wp, 2 * Cin), jnp.float32),   # padded x||guide
            pltpu.VMEM((Hp, Wp, Cm), jnp.float32),        # padded SFT intermediate
        ],
        compiler_params=pltpu.CompilerParams(
            dimension_semantics=("parallel",)),
    )(x, g, w_front_f, b_front, w_dec_f, b_dec)
    # TODO(synk): for large H,W on v7x (64 MiB VMEM) add an H-tile grid axis with a
    #             halo and set vmem_limit_bytes; whole-image blocks are fine here.
    return jnp.transpose(out, (0, 3, 1, 2))        # back to NCHW


# ----------------------------- reference (plain JAX) -----------------------------
def _conv_ref(x_nhwc, w_hwio, b):
    y = jax.lax.conv_general_dilated(
        x_nhwc, w_hwio, window_strides=(1, 1), padding="SAME",
        dimension_numbers=("NHWC", "HWIO", "NHWC"))
    return y + b.reshape(1, 1, 1, -1)


def trans_high_ref(x_nchw, guide_nchw, params):
    x = jnp.transpose(x_nchw, (0, 2, 3, 1))
    g = jnp.transpose(guide_nchw, (0, 2, 3, 1))
    enc = _conv_ref(x, params["w_enc"], params["b_enc"])     # LeakyReLU(1.0) == id
    scale = _conv_ref(g, params["w_scale"], params["b_scale"])
    shift = _conv_ref(g, params["w_shift"], params["b_shift"])
    h = enc + enc * scale + shift
    y = _conv_ref(h, params["w_dec"], params["b_dec"])
    return x_nchw + jnp.transpose(y, (0, 3, 1, 2))


# ----------------------------------- main -----------------------------------
if __name__ == "__main__":
    B, in_ch, inter_ch, out_ch, Hs, Ws = 2, 3, 32, 3, 16, 16

    key = jax.random.PRNGKey(0)
    keys = jax.random.split(key, 10)

    def winit(k, shape):
        return 0.1 * jax.random.normal(k, shape, jnp.float32)

    params = {
        "w_enc":   winit(keys[0], (K, K, in_ch, inter_ch)),
        "b_enc":   winit(keys[1], (1, inter_ch)),
        "w_scale": winit(keys[2], (K, K, in_ch, inter_ch)),
        "b_scale": winit(keys[3], (1, inter_ch)),
        "w_shift": winit(keys[4], (K, K, in_ch, inter_ch)),
        "b_shift": winit(keys[5], (1, inter_ch)),
        "w_dec":   winit(keys[6], (K, K, inter_ch, out_ch)),
        "b_dec":   winit(keys[7], (1, out_ch)),
    }

    x = jax.random.normal(keys[8], (B, in_ch, Hs, Ws), jnp.float32)
    guide = jax.random.normal(keys[9], (B, in_ch, Hs, Ws), jnp.float32)

    out = jax.block_until_ready(trans_high_forward(x, guide, params))
    ref = jax.block_until_ready(trans_high_ref(x, guide, params))

    assert out.shape == (B, out_ch, Hs, Ws)
    assert jnp.allclose(out, ref, atol=1e-4, rtol=1e-4)
    print("KERNEL_OK")
</pallas_src>

<mosaic_0001>
module attributes {stable_mosaic.version = 11 : i64} {
  func.func @trans_high_kernel(%arg0: i32, %arg1: memref<1x16x16x3xf32, #tpu.memory_space<vmem>>, %arg2: memref<1x16x16x3xf32, #tpu.memory_space<vmem>>, %arg3: memref<54x96xf32, #tpu.memory_space<vmem>>, %arg4: memref<1x96xf32, #tpu.memory_space<vmem>>, %arg5: memref<288x3xf32, #tpu.memory_space<vmem>>, %arg6: memref<1x3xf32, #tpu.memory_space<vmem>>, %arg7: memref<1x16x16x3xf32, #tpu.memory_space<vmem>>, %arg8: memref<18x18x6xf32, #tpu.memory_space<vmem>>, %arg9: memref<18x18x32xf32, #tpu.memory_space<vmem>>) attributes {dimension_semantics = [#tpu.dimension_semantics<parallel>], iteration_bounds = array<i64: 2>, scalar_prefetch = 0 : i64, scratch_operands = 2 : i64, tpu.core_type = #tpu.core_type<tc>, window_params = [{transform_indices = @transform_0, window_bounds = array<i64: 1, 16, 16, 3>}, {transform_indices = @transform_1, window_bounds = array<i64: 1, 16, 16, 3>}, {pipeline_mode = #tpu.pipeline_mode<synchronous>, transform_indices = @transform_2, window_bounds = array<i64: 54, 96>}, {pipeline_mode = #tpu.pipeline_mode<synchronous>, transform_indices = @transform_3, window_bounds = array<i64: 1, 96>}, {pipeline_mode = #tpu.pipeline_mode<synchronous>, transform_indices = @transform_4, window_bounds = array<i64: 288, 3>}, {pipeline_mode = #tpu.pipeline_mode<synchronous>, transform_indices = @transform_5, window_bounds = array<i64: 1, 3>}, {transform_indices = @transform_6, window_bounds = array<i64: 1, 16, 16, 3>}]} {
    %cst = arith.constant 0.000000e+00 : f32
    %0 = vector.broadcast %cst : f32 to vector<18x18x6xf32>
    %c0 = arith.constant 0 : index
    %c0_0 = arith.constant 0 : index
    %c0_1 = arith.constant 0 : index
    %1 = vector.load %arg8[%c0, %c0_0, %c0_1] : memref<18x18x6xf32, #tpu.memory_space<vmem>>, vector<18x18x6xf32>
    tpu.vector_store %arg8[%c0, %c0_0, %c0_1], %0 {strides = array<i32>} : memref<18x18x6xf32, #tpu.memory_space<vmem>>, vector<18x18x6xf32>,
    %cst_2 = arith.constant 0.000000e+00 : f32
    %2 = vector.broadcast %cst_2 : f32 to vector<18x18x32xf32>
    %c0_3 = arith.constant 0 : index
    %c0_4 = arith.constant 0 : index
    %c0_5 = arith.constant 0 : index
    %3 = vector.load %arg9[%c0_3, %c0_4, %c0_5] : memref<18x18x32xf32, #tpu.memory_space<vmem>>, vector<18x18x32xf32>
    tpu.vector_store %arg9[%c0_3, %c0_4, %c0_5], %2 {strides = array<i32>} : memref<18x18x32xf32, #tpu.memory_space<vmem>>, vector<18x18x32xf32>,
    %c0_6 = arith.constant 0 : index
    %c0_7 = arith.constant 0 : index
    %c0_8 = arith.constant 0 : index
    %c0_9 = arith.constant 0 : index
    %4 = vector.load %arg1[%c0_6, %c0_7, %c0_8, %c0_9] : memref<1x16x16x3xf32, #tpu.memory_space<vmem>>, vector<1x16x16x3xf32>
    %5 = vector.shape_cast %4 : vector<1x16x16x3xf32> to vector<16x16x3xf32>
    %c1 = arith.constant 1 : index
    %c1_10 = arith.constant 1 : index
    %c0_11 = arith.constant 0 : index
    %6 = vector.load %arg8[%c1, %c1_10, %c0_11] : memref<18x18x6xf32, #tpu.memory_space<vmem>>, vector<16x16x3xf32>
    tpu.vector_store %arg8[%c1, %c1_10, %c0_11], %5 {strides = array<i32>} : memref<18x18x6xf32, #tpu.memory_space<vmem>>, vector<16x16x3xf32>,
    %c0_12 = arith.constant 0 : index
    %c0_13 = arith.constant 0 : index
    %c0_14 = arith.constant 0 : index
    %c0_15 = arith.constant 0 : index
    %7 = vector.load %arg2[%c0_12, %c0_13, %c0_14, %c0_15] : memref<1x16x16x3xf32, #tpu.memory_space<vmem>>, vector<1x16x16x3xf32>
    %8 = vector.shape_cast %7 : vector<1x16x16x3xf32> to vector<16x16x3xf32>
    %c1_16 = arith.constant 1 : index
    %c1_17 = arith.constant 1 : index
    %c3 = arith.constant 3 : index
    %9 = vector.load %arg8[%c1_16, %c1_17, %c3] : memref<18x18x6xf32, #tpu.memory_space<vmem>>, vector<16x16x3xf32>
    tpu.vector_store %arg8[%c1_16, %c1_17, %c3], %8 {strides = array<i32>} : memref<18x18x6xf32, #tpu.memory_space<vmem>>, vector<16x16x3xf32>,
    %c0_18 = arith.constant 0 : index
    %c0_19 = arith.constant 0 : index
    %c0_20 = arith.constant 0 : index
    %10 = vector.load %arg8[%c0_18, %c0_19, %c0_20] : memref<18x18x6xf32, #tpu.memory_space<vmem>>, vector<16x16x6xf32>
    %11 = vector.shape_cast %10 : vector<16x16x6xf32> to vector<256x6xf32>
    %c0_21 = arith.constant 0 : index
    %c1_22 = arith.constant 1 : index
    %c0_23 = arith.constant 0 : index
    %12 = vector.load %arg8[%c0_21, %c1_22, %c0_23] : memref<18x18x6xf32, #tpu.memory_space<vmem>>, vector<16x16x6xf32>
    %13 = vector.shape_cast %12 : vector<16x16x6xf32> to vector<256x6xf32>
    %c0_24 = arith.constant 0 : index
    %c2 = arith.constant 2 : index
    %c0_25 = arith.constant 0 : index
    %14 = vector.load %arg8[%c0_24, %c2, %c0_25] : memref<18x18x6xf32, #tpu.memory_space<vmem>>, vector<16x16x6xf32>
    %15 = vector.shape_cast %14 : vector<16x16x6xf32> to vector<256x6xf32>
    %c1_26 = arith.constant 1 : index
    %c0_27 = arith.constant 0 : index
    %c0_28 = arith.constant 0 : index
    %16 = vector.load %arg8[%c1_26, %c0_27, %c0_28] : memref<18x18x6xf32, #tpu.memory_space<vmem>>, vector<16x16x6xf32>
    %17 = vector.shape_cast %16 : vector<16x16x6xf32> to vector<256x6xf32>
    %c1_29 = arith.constant 1 : index
    %c1_30 = arith.constant 1 : index
    %c0_31 = arith.constant 0 : index
    %18 = vector.load %arg8[%c1_29, %c1_30, %c0_31] : memref<18x18x6xf32, #tpu.memory_space<vmem>>, vector<16x16x6xf32>
    %19 = vector.shape_cast %18 : vector<16x16x6xf32> to vector<256x6xf32>
    %c1_32 = arith.constant 1 : index
    %c2_33 = arith.constant 2 : index
    %c0_34 = arith.constant 0 : index
    %20 = vector.load %arg8[%c1_32, %c2_33, %c0_34] : memref<18x18x6xf32, #tpu.memory_space<vmem>>, vector<16x16x6xf32>
    %21 = vector.shape_cast %20 : vector<16x16x6xf32> to vector<256x6xf32>
    %c2_35 = arith.constant 2 : index
    %c0_36 = arith.constant 0 : index
    %c0_37 = arith.constant 0 : index
    %22 = vector.load %arg8[%c2_35, %c0_36, %c0_37] : memref<18x18x6xf32, #tpu.memory_space<vmem>>, vector<16x16x6xf32>
    %23 = vector.shape_cast %22 : vector<16x16x6xf32> to vector<256x6xf32>
    %c2_38 = arith.constant 2 : index
    %c1_39 = arith.constant 1 : index
    %c0_40 = arith.constant 0 : index
    %24 = vector.load %arg8[%c2_38, %c1_39, %c0_40] : memref<18x18x6xf32, #tpu.memory_space<vmem>>, vector<16x16x6xf32>
    %25 = vector.shape_cast %24 : vector<16x16x6xf32> to vector<256x6xf32>
    %c2_41 = arith.constant 2 : index
    %c2_42 = arith.constant 2 : index
    %c0_43 = arith.constant 0 : index
    %26 = vector.load %arg8[%c2_41, %c2_42, %c0_43] : memref<18x18x6xf32, #tpu.memory_space<vmem>>, vector<16x16x6xf32>
    %27 = vector.shape_cast %26 : vector<16x16x6xf32> to vector<256x6xf32>
    %28 = tpu.concatenate %11, %13, %15, %17, %19, %21, %23, %25, %27 in 1 : vector<256x6xf32>, vector<256x6xf32>, vector<256x6xf32>, vector<256x6xf32>, vector<256x6xf32>, vector<256x6xf32>, vector<256x6xf32>, vector<256x6xf32>, vector<256x6xf32> -> vector<256x54xf32>
    %c0_44 = arith.constant 0 : index
    %c0_45 = arith.constant 0 : index
    %29 = vector.load %arg3[%c0_44, %c0_45] : memref<54x96xf32, #tpu.memory_space<vmem>>, vector<54x96xf32>
    %cst_46 = arith.constant dense<0.000000e+00> : vector<256x96xf32>
    %30 = tpu.matmul %28, %29, %cst_46 {dimension_numbers = #tpu.dot_dimension_numbers<[1], [0], [0], [1], [0, 0, 1, 1], [], []>} : vector<256x54xf32>, vector<54x96xf32>, vector<256x96xf32> -> vector<256x96xf32>
    %c0_47 = arith.constant 0 : index
    %c0_48 = arith.constant 0 : index
    %31 = vector.load %arg4[%c0_47, %c0_48] : memref<1x96xf32, #tpu.memory_space<vmem>>, vector<1x96xf32>
    %32 = vector.broadcast %31 : vector<1x96xf32> to vector<256x96xf32>
    %33 = arith.addf %30, %32 : vector<256x96xf32>
    %34 = vector.extract_strided_slice %33 {offsets = [0, 0], sizes = [256, 32], strides = [1, 1]} : vector<256x96xf32> to vector<256x32xf32>
    %35 = vector.extract_strided_slice %33 {offsets = [0, 32], sizes = [256, 32], strides = [1, 1]} : vector<256x96xf32> to vector<256x32xf32>
    %36 = vector.extract_strided_slice %33 {offsets = [0, 64], sizes = [256, 32], strides = [1, 1]} : vector<256x96xf32> to vector<256x32xf32>
    %37 = arith.mulf %34, %35 : vector<256x32xf32>
    %38 = arith.addf %34, %37 : vector<256x32xf32>
    %39 = arith.addf %38, %36 : vector<256x32xf32>
    %40 = vector.shape_cast %39 : vector<256x32xf32> to vector<16x16x32xf32>
    %c1_49 = arith.constant 1 : index
    %c1_50 = arith.constant 1 : index
    %c0_51 = arith.constant 0 : index
    %41 = vector.load %arg9[%c1_49, %c1_50, %c0_51] : memref<18x18x32xf32, #tpu.memory_space<vmem>>, vector<16x16x32xf32>
    tpu.vector_store %arg9[%c1_49, %c1_50, %c0_51], %40 {strides = array<i32>} : memref<18x18x32xf32, #tpu.memory_space<vmem>>, vector<16x16x32xf32>,
    %c0_52 = arith.constant 0 : index
    %c0_53 = arith.constant 0 : index
    %c0_54 = arith.constant 0 : index
    %42 = vector.load %arg9[%c0_52, %c0_53, %c0_54] : memref<18x18x32xf32, #tpu.memory_space<vmem>>, vector<16x16x32xf32>
    %43 = vector.shape_cast %42 : vector<16x16x32xf32> to vector<256x32xf32>
    %c0_55 = arith.constant 0 : index
    %c1_56 = arith.constant 1 : index
    %c0_57 = arith.constant 0 : index
    %44 = vector.load %arg9[%c0_55, %c1_56, %c0_57] : memref<18x18x32xf32, #tpu.memory_space<vmem>>, vector<16x16x32xf32>
    %45 = vector.shape_cast %44 : vector<16x16x32xf32> to vector<256x32xf32>
    %c0_58 = arith.constant 0 : index
    %c2_59 = arith.constant 2 : index
    %c0_60 = arith.constant 0 : index
    %46 = vector.load %arg9[%c0_58, %c2_59, %c0_60] : memref<18x18x32xf32, #tpu.memory_space<vmem>>, vector<16x16x32xf32>
    %47 = vector.shape_cast %46 : vector<16x16x32xf32> to vector<256x32xf32>
    %c1_61 = arith.constant 1 : index
    %c0_62 = arith.constant 0 : index
    %c0_63 = arith.constant 0 : index
    %48 = vector.load %arg9[%c1_61, %c0_62, %c0_63] : memref<18x18x32xf32, #tpu.memory_space<vmem>>, vector<16x16x32xf32>
    %49 = vector.shape_cast %48 : vector<16x16x32xf32> to vector<256x32xf32>
    %c1_64 = arith.constant 1 : index
    %c1_65 = arith.constant 1 : index
    %c0_66 = arith.constant 0 : index
    %50 = vector.load %arg9[%c1_64, %c1_65, %c0_66] : memref<18x18x32xf32, #tpu.memory_space<vmem>>, vector<16x16x32xf32>
    %51 = vector.shape_cast %50 : vector<16x16x32xf32> to vector<256x32xf32>
    %c1_67 = arith.constant 1 : index
    %c2_68 = arith.constant 2 : index
    %c0_69 = arith.constant 0 : index
    %52 = vector.load %arg9[%c1_67, %c2_68, %c0_69] : memref<18x18x32xf32, #tpu.memory_space<vmem>>, vector<16x16x32xf32>
    %53 = vector.shape_cast %52 : vector<16x16x32xf32> to vector<256x32xf32>
    %c2_70 = arith.constant 2 : index
    %c0_71 = arith.constant 0 : index
    %c0_72 = arith.constant 0 : index
    %54 = vector.load %arg9[%c2_70, %c0_71, %c0_72] : memref<18x18x32xf32, #tpu.memory_space<vmem>>, vector<16x16x32xf32>
    %55 = vector.shape_cast %54 : vector<16x16x32xf32> to vector<256x32xf32>
    %c2_73 = arith.constant 2 : index
    %c1_74 = arith.constant 1 : index
    %c0_75 = arith.constant 0 : index
    %56 = vector.load %arg9[%c2_73, %c1_74, %c0_75] : memref<18x18x32xf32, #tpu.memory_space<vmem>>, vector<16x16x32xf32>
    %57 = vector.shape_cast %56 : vector<16x16x32xf32> to vector<256x32xf32>
    %c2_76 = arith.constant 2 : index
    %c2_77 = arith.constant 2 : index
    %c0_78 = arith.constant 0 : index
    %58 = vector.load %arg9[%c2_76, %c2_77, %c0_78] : memref<18x18x32xf32, #tpu.memory_space<vmem>>, vector<16x16x32xf32>
    %59 = vector.shape_cast %58 : vector<16x16x32xf32> to vector<256x32xf32>
    %60 = tpu.concatenate %43, %45, %47, %49, %51, %53, %55, %57, %59 in 1 : vector<256x32xf32>, vector<256x32xf32>, vector<256x32xf32>, vector<256x32xf32>, vector<256x32xf32>, vector<256x32xf32>, vector<256x32xf32>, vector<256x32xf32>, vector<256x32xf32> -> vector<256x288xf32>
    %c0_79 = arith.constant 0 : index
    %c0_80 = arith.constant 0 : index
    %61 = vector.load %arg5[%c0_79, %c0_80] : memref<288x3xf32, #tpu.memory_space<vmem>>, vector<288x3xf32>
    %cst_81 = arith.constant dense<0.000000e+00> : vector<256x3xf32>
    %62 = tpu.matmul %60, %61, %cst_81 {dimension_numbers = #tpu.dot_dimension_numbers<[1], [0], [0], [1], [0, 0, 1, 1], [], []>} : vector<256x288xf32>, vector<288x3xf32>, vector<256x3xf32> -> vector<256x3xf32>
    %c0_82 = arith.constant 0 : index
    %c0_83 = arith.constant 0 : index
    %63 = vector.load %arg6[%c0_82, %c0_83] : memref<1x3xf32, #tpu.memory_space<vmem>>, vector<1x3xf32>
    %64 = vector.broadcast %63 : vector<1x3xf32> to vector<256x3xf32>
    %65 = arith.addf %62, %64 : vector<256x3xf32>
    %c0_84 = arith.constant 0 : index
    %c0_85 = arith.constant 0 : index
    %c0_86 = arith.constant 0 : index
    %c0_87 = arith.constant 0 : index
    %66 = vector.load %arg1[%c0_84, %c0_85, %c0_86, %c0_87] : memref<1x16x16x3xf32, #tpu.memory_space<vmem>>, vector<1x16x16x3xf32>
    %67 = vector.shape_cast %66 : vector<1x16x16x3xf32> to vector<16x16x3xf32>
    %68 = vector.shape_cast %67 : vector<16x16x3xf32> to vector<256x3xf32>
    %69 = arith.addf %65, %68 : vector<256x3xf32>
    %70 = vector.shape_cast %69 : vector<256x3xf32> to vector<16x16x3xf32>
    %c0_88 = arith.constant 0 : index
    %c0_89 = arith.constant 0 : index
    %c0_90 = arith.constant 0 : index
    %c0_91 = arith.constant 0 : index
    %71 = vector.load %arg7[%c0_88, %c0_89, %c0_90, %c0_91] : memref<1x16x16x3xf32, #tpu.memory_space<vmem>>, vector<1x16x16x3xf32>
    %72 = vector.shape_cast %71 : vector<1x16x16x3xf32> to vector<16x16x3xf32>
    %73 = vector.shape_cast %70 : vector<16x16x3xf32> to vector<1x16x16x3xf32>
    tpu.vector_store %arg7[%c0_88, %c0_89, %c0_90, %c0_91], %73 {strides = array<i32>} : memref<1x16x16x3xf32, #tpu.memory_space<vmem>>, vector<1x16x16x3xf32>,
    return
  }
  func.func @transform_0(%arg0: i32) -> (i32, i32, i32, i32) {
    %c0_i32 = arith.constant 0 : i32
    %c0_i32_0 = arith.constant 0 : i32
    %c0_i32_1 = arith.constant 0 : i32
    %c0_i32_2 = arith.constant 0 : i32
    return %arg0, %c0_i32, %c0_i32_0, %c0_i32_1 : i32, i32, i32, i32
  }
  func.func @transform_1(%arg0: i32) -> (i32, i32, i32, i32) {
    %c0_i32 = arith.constant 0 : i32
    %c0_i32_0 = arith.constant 0 : i32
    %c0_i32_1 = arith.constant 0 : i32
    %c0_i32_2 = arith.constant 0 : i32
    return %arg0, %c0_i32, %c0_i32_0, %c0_i32_1 : i32, i32, i32, i32
  }
  func.func @transform_2(%arg0: i32) -> (i32, i32) {
    %c0_i32 = arith.constant 0 : i32
    %c0_i32_0 = arith.constant 0 : i32
    %c0_i32_1 = arith.constant 0 : i32
    return %c0_i32, %c0_i32_0 : i32, i32
  }
  func.func @transform_3(%arg0: i32) -> (i32, i32) {
    %c0_i32 = arith.constant 0 : i32
    %c0_i32_0 = arith.constant 0 : i32
    %c0_i32_1 = arith.constant 0 : i32
    return %c0_i32, %c0_i32_0 : i32, i32
  }
  func.func @transform_4(%arg0: i32) -> (i32, i32) {
    %c0_i32 = arith.constant 0 : i32
    %c0_i32_0 = arith.constant 0 : i32
    %c0_i32_1 = arith.constant 0 : i32
    return %c0_i32, %c0_i32_0 : i32, i32
  }
  func.func @transform_5(%arg0: i32) -> (i32, i32) {
    %c0_i32 = arith.constant 0 : i32
    %c0_i32_0 = arith.constant 0 : i32
    %c0_i32_1 = arith.constant 0 : i32
    return %c0_i32, %c0_i32_0 : i32, i32
  }
  func.func @transform_6(%arg0: i32) -> (i32, i32, i32, i32) {
    %c0_i32 = arith.constant 0 : i32
    %c0_i32_0 = arith.constant 0 : i32
    %c0_i32_1 = arith.constant 0 : i32
    %c0_i32_2 = arith.constant 0 : i32
    return %arg0, %c0_i32, %c0_i32_0, %c0_i32_1 : i32, i32, i32, i32
  }
}

</mosaic_0001>

<bundles_post_ra>
// kernel: tpu_custom_call.1
= control target key start
LH: loop header
LB: loop body
LE: loop exit
PB: predicated region body
PF: predicated region fallthrough
CT: control target
= control target key end

     0   :  { %s5822_s21 = smov 0   ;;  %s8990_s0 = inlined_call_operand.vmem [shape: f32[2,16,16,3], index: 0, kind: input, shape index: {}]   ;;  %s8991_s1 = inlined_call_operand.vmem [shape: f32[2,16,16,3], index: 1, kind: input, shape index: {}]   ;;  %s8992_s2 = inlined_call_operand.vmem [shape: f32[54,96], index: 2, kind: input, shape index: {}]   ;;  %s8993_s3 = inlined_call_operand.vmem [shape: f32[1,96], index: 3, kind: input, shape index: {}]   ;;  %s8994_s4 = inlined_call_operand.vmem [shape: f32[288,3], index: 4, kind: input, shape index: {}]   ;;  %s8995_s5 = inlined_call_operand.vmem [shape: f32[1,3], index: 5, kind: input, shape index: {}]   ;;  %s8996_s6 = inlined_call_operand.vmem [shape: f32[2,16,16,3], index: 6, kind: output, shape index: {}]  }
   0x1 LB: > { %s4915_s22 = sadd.s32 4294967295, %s5772_s21   ;;  %p4919_p0 = scmp.ge.s32.totalorder %s5772_s21, 1  ;;  %s5772_s21 = sphi %s5822_s21, %s16_s21  }
   0x2   : > { %p222_p1 = scmp.lt.s32.totalorder %s5772_s21, 3 }
   0x4   : > { %p223_p2 = pnand %p4919_p0, %p222_p1 }
   0x6   : > { %226 = sbr.rel (%p223_p2) target bundleno = 1603 (0x643), region = 44 }
   0xb   : > { %p5832_p3 = scmp.lt.s32.totalorder %s4915_s22, 1  ;;  %vm272_vm0 = vcmask 48128   ;;  %v8997_v0 = vmov 0.0   ;;  %vm275_vm1 = vcmask 41984   ;;  %s5775_s28 = smov 3   ;;  %vm417_vm2 = vcmask 23552  }
   0xc   : > { %280 = vst.msk [vmem:[#allocation2 + $0x30] sm:$0xff] %vm272_vm0, %v8997_v0  ;;  %281 = vst.msk [vmem:[#allocation2 + $0x38] sm:$0xff] %vm272_vm0, %v8997_v0  ;;  %5191 = vmatprep.subr.mxu1 %v8997_v0  ;;  %s5776_s8 = smov 6   ;;  %s5777_s9 = smov 12   ;;  %vm610_vm3 = vcmask 48152   ;;  %vm1988_vm4 = vcmask 97280  }
   0xd   : > { %273 = vst.msk [vmem:[#allocation2] sm:$0xff] %vm272_vm0, %v8997_v0  ;;  %274 = vst.msk [vmem:[#allocation2 + $0x8] sm:$0xff] %vm272_vm0, %v8997_v0  ;;  %s9269_s22 = smov (!%p5832_p3, %s4915_s22), 1  ;;  %s5778_s10 = smov 18   ;;  %vm2021_vm5 = vcmask 146432   ;;  %vm2330_vm6 = vcmask 1045504  }
   0xe   : > { %277 = vst.msk [vmem:[#allocation2 + $0x18] sm:$0xff] %vm272_vm0, %v8997_v0  ;;  %278 = vst.msk [vmem:[#allocation2 + $0x20] sm:$0xff] %vm272_vm0, %v8997_v0  ;;  %s5949_s24 = sshll.u32 %s9269_s22, 8  ;;  %s5779_s11 = smov 24   ;;  %vm2054_vm7 = vcmask 195584   ;;  %vm2087_vm8 = vcmask 244736  }
   0xf   : > { %283 = vst.msk [vmem:[#allocation2 + $0x48] sm:$0xff] %vm272_vm0, %v8997_v0  ;;  %284 = vst.msk [vmem:[#allocation2 + $0x50] sm:$0xff] %vm272_vm0, %v8997_v0  ;;  %s5955_s27 = scalar_lea.vmem %s8991_s1, %s5949_s24  ;;  %s5971_s7 = scalar_lea.vmem %s8990_s0, %s5949_s24  ;;  %vm2120_vm9 = vcmask 293888   ;;  %vm2153_vm10 = vcmask 343040   ;;  %vm2186_vm11 = vcmask 392192   ;;  %vm2233_vm12 = vcmask 441344  }
  0x10   : > { %286 = vst.msk [vmem:[#allocation2 + $0x60] sm:$0xff] %vm272_vm0, %v8997_v0  ;;  %287 = vst.msk [vmem:[#allocation2 + $0x68] sm:$0xff] %vm272_vm0, %v8997_v0  ;;  %v452_v1 = vld [vmem:[%s5955_s27 + $0x10] sm:$0xff]  ;;  %v450_v2 = vld [vmem:[%s5955_s27] sm:$0xff]  ;;  %s5780_s12 = smov 30   ;;  %s5781_s29 = smov 36  }
  0x11   : > { %289 = vst.msk [vmem:[#allocation2 + $0x78] sm:$0xff] %vm272_vm0, %v8997_v0  ;;  %290 = vst.msk [vmem:[#allocation2 + $0x80] sm:$0xff] %vm272_vm0, %v8997_v0  ;;  %518 = vrot.lane.b32.xlu1 %v452_v1, %s5775_s28  ;;  %514 = vrot.lane.b32.xlu0 %v450_v2, %s5775_s28  ;;  %v453_v3 = vld [vmem:[%s5955_s27 + $0x18] sm:$0xff]  ;;  %v451_v4 = vld [vmem:[%s5955_s27 + $0x8] sm:$0xff]  ;;  %s5782_s30 = smov 42   ;;  %vm328_vm13 = vcmask 261120   ;;  %s8841_s15 = scalar_lea.vmem %s8996_s6, %s5949_s24 }
  0x12   : > { %292 = vst.msk [vmem:[#allocation2 + $0x90] sm:$0xff] %vm272_vm0, %v8997_v0  ;;  %293 = vst.msk [vmem:[#allocation2 + $0x98] sm:$0xff] %vm272_vm0, %v8997_v0  ;;  %v454_v5 = vld [vmem:[%s5955_s27 + $0x20] sm:$0xff]  ;;  %v455_v6 = vld [vmem:[%s5955_s27 + $0x28] sm:$0xff]  ;;  %vm331_vm14 = vcmask 254976   ;;  %s5786_s13 = smov 32  }
  0x13   : > { %295 = vst.msk [vmem:[#allocation2 + $0xa8] sm:$0xff] %vm272_vm0, %v8997_v0  ;;  %296 = vst.msk [vmem:[#allocation2 + $0xb0] sm:$0xff] %vm272_vm0, %v8997_v0  ;;  %v456_v7 = vld [vmem:[%s5955_s27 + $0x30] sm:$0xff]  ;;  %v457_v8 = vld [vmem:[%s5955_s27 + $0x38] sm:$0xff]  ;;  %vm4001_vm15 = vcmask 523264  }
  0x14   : > { %298 = vst.msk [vmem:[#allocation2 + $0xc0] sm:$0xff] %vm272_vm0, %v8997_v0  ;;  %299 = vst.msk [vmem:[#allocation2 + $0xc8] sm:$0xff] %vm272_vm0, %v8997_v0  ;;  %v386_v9 = vld [vmem:[%s5971_s7 + $0x10] sm:$0xff]  ;;  %v458_v10 = vld [vmem:[%s5955_s27 + $0x40] sm:$0xff] }
  0x15   : > { %301 = vst.msk [vmem:[#allocation2 + $0xd8] sm:$0xff] %vm272_vm0, %v8997_v0  ;;  %302 = vst.msk [vmem:[#allocation2 + $0xe0] sm:$0xff] %vm272_vm0, %v8997_v0  ;;  %520 = vrot.lane.b32.xlu1 %v453_v3, %s5775_s28  ;;  %516 = vrot.lane.b32.xlu0 %v451_v4, %s5775_s28  ;;  %v384_v11 = vld [vmem:[%s5971_s7] sm:$0xff]  ;;  %v387_v12 = vld [vmem:[%s5971_s7 + $0x18] sm:$0xff] }
  0x16   : > { %304 = vst.msk [vmem:[#allocation2 + $0xf0] sm:$0xff] %vm272_vm0, %v8997_v0  ;;  %305 = vst.msk [vmem:[#allocation2 + $0xf8] sm:$0xff] %vm272_vm0, %v8997_v0  ;;  %v385_v13 = vld [vmem:[%s5971_s7 + $0x8] sm:$0xff]  ;;  %v388_v15 = vld [vmem:[%s5971_s7 + $0x20] sm:$0xff] }
  0x17   : > { %307 = vst.msk [vmem:[#allocation2 + $0x108] sm:$0xff] %vm272_vm0, %v8997_v0  ;;  %308 = vst.msk [vmem:[#allocation2 + $0x110] sm:$0xff] %vm272_vm0, %v8997_v0  ;;  %v459_v14 = vld [vmem:[%s5955_s27 + $0x48] sm:$0xff]  ;;  %v390_v17 = vld [vmem:[%s5971_s7 + $0x30] sm:$0xff] }
  0x18   : > { %310 = vst.msk [vmem:[#allocation2 + $0x120] sm:$0xff] %vm272_vm0, %v8997_v0  ;;  %311 = vst.msk [vmem:[#allocation2 + $0x128] sm:$0xff] %vm272_vm0, %v8997_v0  ;;  %v389_v16 = vld [vmem:[%s5971_s7 + $0x28] sm:$0xff]  ;;  %v391_v18 = vld [vmem:[%s5971_s7 + $0x38] sm:$0xff] }
  0x19   : > { %313 = vst.msk [vmem:[#allocation2 + $0x138] sm:$0xff] %vm272_vm0, %v8997_v0  ;;  %314 = vst.msk [vmem:[#allocation2 + $0x140] sm:$0xff] %vm272_vm0, %v8997_v0  ;;  %522 = vrot.lane.b32.xlu0 %v454_v5, %s5775_s28  ;;  %524 = vrot.lane.b32.xlu1 %v455_v6, %s5775_s28  ;;  %v392_v19 = vld [vmem:[%s5971_s7 + $0x40] sm:$0xff]  ;;  %v393_v20 = vld [vmem:[%s5971_s7 + $0x48] sm:$0xff] }
  0x1a   : > { %316 = vst.msk [vmem:[#allocation2 + $0x150] sm:$0xff] %vm272_vm0, %v8997_v0  ;;  %317 = vst.msk [vmem:[#allocation2 + $0x158] sm:$0xff] %vm272_vm0, %v8997_v0  ;;  %v394_v21 = vld [vmem:[%s5971_s7 + $0x50] sm:$0xff]  ;;  %v395_v22 = vld [vmem:[%s5971_s7 + $0x58] sm:$0xff] }
  0x1b   : > { %319 = vst.msk [vmem:[#allocation2 + $0x168] sm:$0xff] %vm272_vm0, %v8997_v0  ;;  %320 = vst.msk [vmem:[#allocation2 + $0x170] sm:$0xff] %vm272_vm0, %v8997_v0  ;;  %v396_v23 = vld [vmem:[%s5971_s7 + $0x60] sm:$0xff]  ;;  %v397_v24 = vld [vmem:[%s5971_s7 + $0x68] sm:$0xff] }
  0x1c   : > { %322 = vst.msk [vmem:[#allocation2 + $0x180] sm:$0xff] %vm272_vm0, %v8997_v0  ;;  %323 = vst.msk [vmem:[#allocation2 + $0x188] sm:$0xff] %vm272_vm0, %v8997_v0  ;;  %v398_v25 = vld [vmem:[%s5971_s7 + $0x70] sm:$0xff]  ;;  %v399_v26 = vld [vmem:[%s5971_s7 + $0x78] sm:$0xff] }
  0x1d   : > { %325 = vst.msk [vmem:[#allocation2 + $0x198] sm:$0xff] %vm272_vm0, %v8997_v0  ;;  %326 = vst.msk [vmem:[#allocation2 + $0x1a0] sm:$0xff] %vm272_vm0, %v8997_v0  ;;  %526 = vrot.lane.b32.xlu0 %v456_v7, %s5775_s28  ;;  %528 = vrot.lane.b32.xlu1 %v457_v8, %s5775_s28  ;;  %v460_v27 = vld [vmem:[%s5955_s27 + $0x50] sm:$0xff]  ;;  %v461_v28 = vld [vmem:[%s5955_s27 + $0x58] sm:$0xff] }
  0x1e   : > { %276 = vst.msk [vmem:[#allocation2 + $0x10] sm:$0x3] %vm275_vm1, %v8997_v0  ;;  %279 = vst.msk [vmem:[#allocation2 + $0x28] sm:$0x3] %vm275_vm1, %v8997_v0  ;;  %v400_v29 = vld [vmem:[%s5971_s7 + $0x80] sm:$0xff]  ;;  %v401_v30 = vld [vmem:[%s5971_s7 + $0x88] sm:$0xff] }
  0x1f   : > { %282 = vst.msk [vmem:[#allocation2 + $0x40] sm:$0x3] %vm275_vm1, %v8997_v0  ;;  %285 = vst.msk [vmem:[#allocation2 + $0x58] sm:$0x3] %vm275_vm1, %v8997_v0  ;;  %v462_v31 = vld [vmem:[%s5955_s27 + $0x60] sm:$0xff]  ;;  %v463_v32 = vld [vmem:[%s5955_s27 + $0x68] sm:$0xff] }
  0x20   : > { %288 = vst.msk [vmem:[#allocation2 + $0x70] sm:$0x3] %vm275_vm1, %v8997_v0  ;;  %291 = vst.msk [vmem:[#allocation2 + $0x88] sm:$0x3] %vm275_vm1, %v8997_v0  ;;  %v402_v33 = vld [vmem:[%s5971_s7 + $0x90] sm:$0xff]  ;;  %v403_v34 = vld [vmem:[%s5971_s7 + $0x98] sm:$0xff] }
  0x21   : > { %294 = vst.msk [vmem:[#allocation2 + $0xa0] sm:$0x3] %vm275_vm1, %v8997_v0  ;;  %297 = vst.msk [vmem:[#allocation2 + $0xb8] sm:$0x3] %vm275_vm1, %v8997_v0  ;;  %530 = vrot.lane.b32.xlu0 %v458_v10, %s5775_s28  ;;  %532 = vrot.lane.b32.xlu1 %v459_v14, %s5775_s28  ;;  %v464_v35 = vld [vmem:[%s5955_s27 + $0x70] sm:$0xff]  ;;  %v465_v36 = vld [vmem:[%s5955_s27 + $0x78] sm:$0xff] }
  0x22   : > { %300 = vst.msk [vmem:[#allocation2 + $0xd0] sm:$0x3] %vm275_vm1, %v8997_v0  ;;  %303 = vst.msk [vmem:[#allocation2 + $0xe8] sm:$0x3] %vm275_vm1, %v8997_v0  ;;  %v404_v37 = vld [vmem:[%s5971_s7 + $0xa0] sm:$0xff]  ;;  %v405_v38 = vld [vmem:[%s5971_s7 + $0xa8] sm:$0xff] }
  0x23   : > { %306 = vst.msk [vmem:[#allocation2 + $0x100] sm:$0x3] %vm275_vm1, %v8997_v0  ;;  %309 = vst.msk [vmem:[#allocation2 + $0x118] sm:$0x3] %vm275_vm1, %v8997_v0  ;;  %v466_v39 = vld [vmem:[%s5955_s27 + $0x80] sm:$0xff]  ;;  %v467_v40 = vld [vmem:[%s5955_s27 + $0x88] sm:$0xff] }
  0x24   : > { %312 = vst.msk [vmem:[#allocation2 + $0x130] sm:$0x3] %vm275_vm1, %v8997_v0  ;;  %315 = vst.msk [vmem:[#allocation2 + $0x148] sm:$0x3] %vm275_vm1, %v8997_v0  ;;  %v406_v41 = vld [vmem:[%s5971_s7 + $0xb0] sm:$0xff]  ;;  %v407_v42 = vld [vmem:[%s5971_s7 + $0xb8] sm:$0xff] }
  0x25   : > { %318 = vst.msk [vmem:[#allocation2 + $0x160] sm:$0x3] %vm275_vm1, %v8997_v0  ;;  %321 = vst.msk [vmem:[#allocation2 + $0x178] sm:$0x3] %vm275_vm1, %v8997_v0  ;;  %534 = vrot.lane.b32.xlu0 %v460_v27, %s5775_s28  ;;  %536 = vrot.lane.b32.xlu1 %v461_v28, %s5775_s28  ;;  %v468_v43 = vld [vmem:[%s5955_s27 + $0x90] sm:$0xff]  ;;  %v469_v44 = vld [vmem:[%s5955_s27 + $0x98] sm:$0xff] }
  0x26   : > { %324 = vst.msk [vmem:[#allocation2 + $0x190] sm:$0x3] %vm275_vm1, %v8997_v0  ;;  %327 = vst.msk [vmem:[#allocation2 + $0x1a8] sm:$0x3] %vm275_vm1, %v8997_v0  ;;  %v408_v45 = vld [vmem:[%s5971_s7 + $0xc0] sm:$0xff]  ;;  %v409_v46 = vld [vmem:[%s5971_s7 + $0xc8] sm:$0xff] }
  0x27   : > { %420 = vst.msk [vmem:[#allocation2 + $0x31] sm:$0xff] %vm417_vm2, %v386_v9  ;;  %418 = vst.msk [vmem:[#allocation2 + $0x19] sm:$0xff] %vm417_vm2, %v384_v11  ;;  %v470_v47 = vld [vmem:[%s5955_s27 + $0xa0] sm:$0xff]  ;;  %v471_v48 = vld [vmem:[%s5955_s27 + $0xa8] sm:$0xff] }
  0x28   : > { %421 = vst.msk [vmem:[#allocation2 + $0x39] sm:$0xff] %vm417_vm2, %v387_v12  ;;  %419 = vst.msk [vmem:[#allocation2 + $0x21] sm:$0xff] %vm417_vm2, %v385_v13  ;;  %v410_v49 = vld [vmem:[%s5971_s7 + $0xd0] sm:$0xff]  ;;  %v411_v50 = vld [vmem:[%s5971_s7 + $0xd8] sm:$0xff] }
  0x29   : > { %422 = vst.msk [vmem:[#allocation2 + $0x49] sm:$0xff] %vm417_vm2, %v388_v15  ;;  %423 = vst.msk [vmem:[#allocation2 + $0x51] sm:$0xff] %vm417_vm2, %v389_v16  ;;  %538 = vrot.lane.b32.xlu0 %v462_v31, %s5775_s28  ;;  %540 = vrot.lane.b32.xlu1 %v463_v32, %s5775_s28  ;;  %v472_v51 = vld [vmem:[%s5955_s27 + $0xb0] sm:$0xff]  ;;  %v473_v52 = vld [vmem:[%s5955_s27 + $0xb8] sm:$0xff] }
  0x2a   : > { %424 = vst.msk [vmem:[#allocation2 + $0x61] sm:$0xff] %vm417_vm2, %v390_v17  ;;  %425 = vst.msk [vmem:[#allocation2 + $0x69] sm:$0xff] %vm417_vm2, %v391_v18  ;;  %v412_v53 = vld [vmem:[%s5971_s7 + $0xe0] sm:$0xff]  ;;  %v413_v54 = vld [vmem:[%s5971_s7 + $0xe8] sm:$0xff] }
  0x2b   : > { %426 = vst.msk [vmem:[#allocation2 + $0x79] sm:$0xff] %vm417_vm2, %v392_v19  ;;  %427 = vst.msk [vmem:[#allocation2 + $0x81] sm:$0xff] %vm417_vm2, %v393_v20  ;;  %v474_v55 = vld [vmem:[%s5955_s27 + $0xc0] sm:$0xff]  ;;  %v475_v56 = vld [vmem:[%s5955_s27 + $0xc8] sm:$0xff] }
  0x2c   : > { %428 = vst.msk [vmem:[#allocation2 + $0x91] sm:$0xff] %vm417_vm2, %v394_v21  ;;  %429 = vst.msk [vmem:[#allocation2 + $0x99] sm:$0xff] %vm417_vm2, %v395_v22  ;;  %v476_v57 = vld [vmem:[%s5955_s27 + $0xd0] sm:$0xff]  ;;  %v477_v58 = vld [vmem:[%s5955_s27 + $0xd8] sm:$0xff] }
  0x2d   : > { %430 = vst.msk [vmem:[#allocation2 + $0xa9] sm:$0xff] %vm417_vm2, %v396_v23  ;;  %431 = vst.msk [vmem:[#allocation2 + $0xb1] sm:$0xff] %vm417_vm2, %v397_v24  ;;  %542 = vrot.lane.b32.xlu0 %v464_v35, %s5775_s28  ;;  %544 = vrot.lane.b32.xlu1 %v465_v36, %s5775_s28  ;;  %v478_v59 = vld [vmem:[%s5955_s27 + $0xe0] sm:$0xff]  ;;  %v479_v60 = vld [vmem:[%s5955_s27 + $0xe8] sm:$0xff] }
  0x2e   : > { %432 = vst.msk [vmem:[#allocation2 + $0xc1] sm:$0xff] %vm417_vm2, %v398_v25  ;;  %433 = vst.msk [vmem:[#allocation2 + $0xc9] sm:$0xff] %vm417_vm2, %v399_v26  ;;  %v480_v61 = vld [vmem:[%s5955_s27 + $0xf0] sm:$0xff]  ;;  %v481_v62 = vld [vmem:[%s5955_s27 + $0xf8] sm:$0xff] }
  0x2f   : > { %434 = vst.msk [vmem:[#allocation2 + $0xd9] sm:$0xff] %vm417_vm2, %v400_v29  ;;  %435 = vst.msk [vmem:[#allocation2 + $0xe1] sm:$0xff] %vm417_vm2, %v401_v30  ;;  %v675_v63 = vld [vmem:[#allocation2 + $0x1] sm:$0xff]  ;;  %v676_v1 = vld [vmem:[#allocation2 + $0x9] sm:$0xff] }
  0x30   : > { %436 = vst.msk [vmem:[#allocation2 + $0xf1] sm:$0xff] %vm417_vm2, %v402_v33  ;;  %437 = vst.msk [vmem:[#allocation2 + $0xf9] sm:$0xff] %vm417_vm2, %v403_v34  ;;  %v707_v2 = vld [vmem:[#allocation2 + $0x2] sm:$0xff]  ;;  %v708_v3 = vld [vmem:[#allocation2 + $0xa] sm:$0xff] }
  0x31   : > { %438 = vst.msk [vmem:[#allocation2 + $0x109] sm:$0xff] %vm417_vm2, %v404_v37  ;;  %439 = vst.msk [vmem:[#allocation2 + $0x111] sm:$0xff] %vm417_vm2, %v405_v38  ;;  %546 = vrot.lane.b32.xlu0 %v466_v39, %s5775_s28  ;;  %548 = vrot.lane.b32.xlu1 %v467_v40, %s5775_s28  ;;  %v414_v4 = vld [vmem:[%s5971_s7 + $0xf0] sm:$0xff]  ;;  %v415_v5 = vld [vmem:[%s5971_s7 + $0xf8] sm:$0xff] }
  0x32   : > { %440 = vst.msk [vmem:[#allocation2 + $0x121] sm:$0xff] %vm417_vm2, %v406_v41  ;;  %441 = vst.msk [vmem:[#allocation2 + $0x129] sm:$0xff] %vm417_vm2, %v407_v42 }
  0x33   : > { %442 = vst.msk [vmem:[#allocation2 + $0x139] sm:$0xff] %vm417_vm2, %v408_v45  ;;  %443 = vst.msk [vmem:[#allocation2 + $0x141] sm:$0xff] %vm417_vm2, %v409_v46 }
  0x34   : > { %444 = vst.msk [vmem:[#allocation2 + $0x151] sm:$0xff] %vm417_vm2, %v410_v49  ;;  %445 = vst.msk [vmem:[#allocation2 + $0x159] sm:$0xff] %vm417_vm2, %v411_v50 }
  0x35   : > { %550 = vrot.lane.b32.xlu0 %v468_v43, %s5775_s28  ;;  %552 = vrot.lane.b32.xlu1 %v469_v44, %s5775_s28  ;;  %446 = vst.msk [vmem:[#allocation2 + $0x169] sm:$0xff] %vm417_vm2, %v412_v53  ;;  %447 = vst.msk [vmem:[#allocation2 + $0x171] sm:$0xff] %vm417_vm2, %v413_v54 }
  0x36   : > { %448 = vst.msk [vmem:[#allocation2 + $0x181] sm:$0xff] %vm417_vm2, %v414_v4  ;;  %449 = vst.msk [vmem:[#allocation2 + $0x189] sm:$0xff] %vm417_vm2, %v415_v5 }
  0x39   : > { %554 = vrot.lane.b32.xlu0 %v470_v47, %s5775_s28  ;;  %556 = vrot.lane.b32.xlu1 %v471_v48, %s5775_s28 }
  0x3d   : > { %558 = vrot.lane.b32.xlu0 %v472_v51, %s5775_s28  ;;  %560 = vrot.lane.b32.xlu1 %v473_v52, %s5775_s28 }
  0x41   : > { %562 = vrot.lane.b32.xlu0 %v474_v55, %s5775_s28  ;;  %564 = vrot.lane.b32.xlu1 %v475_v56, %s5775_s28 }
  0x45   : > { %566 = vrot.lane.b32.xlu0 %v476_v57, %s5775_s28  ;;  %568 = vrot.lane.b32.xlu1 %v477_v58, %s5775_s28 }
  0x49   : > { %570 = vrot.lane.b32.xlu0 %v478_v59, %s5775_s28  ;;  %572 = vrot.lane.b32.xlu1 %v479_v60, %s5775_s28 }
  0x4d   : > { %574 = vrot.lane.b32.xlu0 %v480_v61, %s5775_s28  ;;  %576 = vrot.lane.b32.xlu1 %v481_v62, %s5775_s28 }
  0x51   : > { %964 = vrot.lane.b32.xlu0 %v675_v63, %s5776_s8  ;;  %966 = vrot.lane.b32.xlu1 %v676_v1, %s5776_s8 }
  0x55   : > { %1092 = vrot.lane.b32.xlu0 %v707_v2, %s5777_s9  ;;  %1094 = vrot.lane.b32.xlu1 %v708_v3, %s5777_s9 }
  0x83   : > { %v519_v6 = vpop.permute.xlu1 %518  ;;  %v515_v7 = vpop.permute.xlu0 %514 }
  0x84   : > { %613 = vst.msk [vmem:[#allocation2 + $0x31] sm:$0xff] %vm610_vm3, %v519_v6  ;;  %611 = vst.msk [vmem:[#allocation2 + $0x19] sm:$0xff] %vm610_vm3, %v515_v7 }
  0x87   : > { %v521_v8 = vpop.permute.xlu1 %520  ;;  %v517_v9 = vpop.permute.xlu0 %516 }
  0x88   : > { %614 = vst.msk [vmem:[#allocation2 + $0x39] sm:$0xff] %vm610_vm3, %v521_v8  ;;  %612 = vst.msk [vmem:[#allocation2 + $0x21] sm:$0xff] %vm610_vm3, %v517_v9 }
  0x8b   : > { %v523_v10 = vpop.permute.xlu0 %522  ;;  %v6099_v11 = vld [vmem:[#allocation2 + $0x19] sm:$0xff]  ;;  %v525_v12 = vpop.permute.xlu1 %524  ;;  %v6105_v13 = vld [vmem:[#allocation2 + $0x31] sm:$0xff] }
  0x8c   : > { %615 = vst.msk [vmem:[#allocation2 + $0x49] sm:$0xff] %vm610_vm3, %v523_v10  ;;  %968 = vrot.lane.b32.xlu0 %v6099_v11, %s5776_s8  ;;  %616 = vst.msk [vmem:[#allocation2 + $0x51] sm:$0xff] %vm610_vm3, %v525_v12 }
  0x8f   : > { %v527_v14 = vpop.permute.xlu0 %526  ;;  %v6107_v15 = vld [vmem:[#allocation2 + $0x21] sm:$0xff]  ;;  %v529_v16 = vpop.permute.xlu1 %528  ;;  %v6115_v17 = vld [vmem:[#allocation2 + $0x39] sm:$0xff] }
  0x90   : > { %617 = vst.msk [vmem:[#allocation2 + $0x61] sm:$0xff] %vm610_vm3, %v527_v14  ;;  %970 = vrot.lane.b32.xlu1 %v6107_v15, %s5776_s8  ;;  %972 = vrot.lane.b32.xlu0 %v6105_v13, %s5776_s8  ;;  %618 = vst.msk [vmem:[#allocation2 + $0x69] sm:$0xff] %vm610_vm3, %v529_v16  ;;  %v6245_v5 = vld [vmem:[#allocation2 + $0x1a] sm:$0xff]  ;;  %v6251_v6 = vld [vmem:[#allocation2 + $0x22] sm:$0xff] }
  0x91   : > { %v6253_v7 = vld [vmem:[#allocation2 + $0x32] sm:$0xff]  ;;  %v6259_v8 = vld [vmem:[#allocation2 + $0x3a] sm:$0xff] }
  0x93   : > { %v531_v18 = vpop.permute.xlu0 %530  ;;  %v6117_v19 = vld [vmem:[#allocation2 + $0x49] sm:$0xff]  ;;  %v533_v20 = vpop.permute.xlu1 %532  ;;  %v6125_v21 = vld [vmem:[#allocation2 + $0x51] sm:$0xff] }
  0x94   : > { %619 = vst.msk [vmem:[#allocation2 + $0x79] sm:$0xff] %vm610_vm3, %v531_v18  ;;  %974 = vrot.lane.b32.xlu1 %v6115_v17, %s5776_s8  ;;  %976 = vrot.lane.b32.xlu0 %v6117_v19, %s5776_s8  ;;  %620 = vst.msk [vmem:[#allocation2 + $0x81] sm:$0xff] %vm610_vm3, %v533_v20  ;;  %v6261_v9 = vld [vmem:[#allocation2 + $0x4a] sm:$0xff]  ;;  %v6267_v10 = vld [vmem:[#allocation2 + $0x52] sm:$0xff] }
  0x97   : > { %v535_v22 = vpop.permute.xlu0 %534  ;;  %v6127_v23 = vld [vmem:[#allocation2 + $0x61] sm:$0xff]  ;;  %v537_v24 = vpop.permute.xlu1 %536  ;;  %v6135_v25 = vld [vmem:[#allocation2 + $0x69] sm:$0xff] }
  0x98   : > { %621 = vst.msk [vmem:[#allocation2 + $0x91] sm:$0xff] %vm610_vm3, %v535_v22  ;;  %978 = vrot.lane.b32.xlu1 %v6125_v21, %s5776_s8  ;;  %980 = vrot.lane.b32.xlu0 %v6127_v23, %s5776_s8  ;;  %622 = vst.msk [vmem:[#allocation2 + $0x99] sm:$0xff] %vm610_vm3, %v537_v24  ;;  %v6269_v12 = vld [vmem:[#allocation2 + $0x62] sm:$0xff]  ;;  %v6275_v14 = vld [vmem:[#allocation2 + $0x6a] sm:$0xff] }
  0x9b   : > { %v539_v26 = vpop.permute.xlu0 %538  ;;  %v6137_v27 = vld [vmem:[#allocation2 + $0x79] sm:$0xff]  ;;  %v541_v28 = vpop.permute.xlu1 %540  ;;  %v6145_v29 = vld [vmem:[#allocation2 + $0x81] sm:$0xff] }
  0x9c   : > { %623 = vst.msk [vmem:[#allocation2 + $0xa9] sm:$0xff] %vm610_vm3, %v539_v26  ;;  %982 = vrot.lane.b32.xlu1 %v6135_v25, %s5776_s8  ;;  %984 = vrot.lane.b32.xlu0 %v6137_v27, %s5776_s8  ;;  %624 = vst.msk [vmem:[#allocation2 + $0xb1] sm:$0xff] %vm610_vm3, %v541_v28  ;;  %v6277_v16 = vld [vmem:[#allocation2 + $0x7a] sm:$0xff]  ;;  %v6283_v18 = vld [vmem:[#allocation2 + $0x82] sm:$0xff] }
  0x9f   : > { %v543_v30 = vpop.permute.xlu0 %542  ;;  %v6147_v31 = vld [vmem:[#allocation2 + $0x91] sm:$0xff]  ;;  %v545_v32 = vpop.permute.xlu1 %544  ;;  %v6155_v33 = vld [vmem:[#allocation2 + $0x99] sm:$0xff] }
  0xa0   : > { %625 = vst.msk [vmem:[#allocation2 + $0xc1] sm:$0xff] %vm610_vm3, %v543_v30  ;;  %986 = vrot.lane.b32.xlu1 %v6145_v29, %s5776_s8  ;;  %988 = vrot.lane.b32.xlu0 %v6147_v31, %s5776_s8  ;;  %626 = vst.msk [vmem:[#allocation2 + $0xc9] sm:$0xff] %vm610_vm3, %v545_v32  ;;  %v6285_v20 = vld [vmem:[#allocation2 + $0x92] sm:$0xff]  ;;  %v6291_v22 = vld [vmem:[#allocation2 + $0x9a] sm:$0xff] }
  0xa3   : > { %v547_v34 = vpop.permute.xlu0 %546  ;;  %v6157_v35 = vld [vmem:[#allocation2 + $0xa9] sm:$0xff]  ;;  %v549_v36 = vpop.permute.xlu1 %548  ;;  %v6165_v37 = vld [vmem:[#allocation2 + $0xb1] sm:$0xff] }
  0xa4   : > { %627 = vst.msk [vmem:[#allocation2 + $0xd9] sm:$0xff] %vm610_vm3, %v547_v34  ;;  %990 = vrot.lane.b32.xlu1 %v6155_v33, %s5776_s8  ;;  %992 = vrot.lane.b32.xlu0 %v6157_v35, %s5776_s8  ;;  %628 = vst.msk [vmem:[#allocation2 + $0xe1] sm:$0xff] %vm610_vm3, %v549_v36  ;;  %v6293_v24 = vld [vmem:[#allocation2 + $0xaa] sm:$0xff]  ;;  %v6299_v26 = vld [vmem:[#allocation2 + $0xb2] sm:$0xff] }
  0xa7   : > { %v551_v38 = vpop.permute.xlu0 %550  ;;  %v6167_v39 = vld [vmem:[#allocation2 + $0xc1] sm:$0xff]  ;;  %v553_v40 = vpop.permute.xlu1 %552  ;;  %v6175_v41 = vld [vmem:[#allocation2 + $0xc9] sm:$0xff] }
  0xa8   : > { %629 = vst.msk [vmem:[#allocation2 + $0xf1] sm:$0xff] %vm610_vm3, %v551_v38  ;;  %994 = vrot.lane.b32.xlu1 %v6165_v37, %s5776_s8  ;;  %996 = vrot.lane.b32.xlu0 %v6167_v39, %s5776_s8  ;;  %630 = vst.msk [vmem:[#allocation2 + $0xf9] sm:$0xff] %vm610_vm3, %v553_v40  ;;  %v6301_v28 = vld [vmem:[#allocation2 + $0xc2] sm:$0xff]  ;;  %v6307_v30 = vld [vmem:[#allocation2 + $0xca] sm:$0xff] }
  0xab   : > { %v555_v42 = vpop.permute.xlu0 %554  ;;  %v6177_v43 = vld [vmem:[#allocation2 + $0xd9] sm:$0xff]  ;;  %v557_v44 = vpop.permute.xlu1 %556  ;;  %v6185_v45 = vld [vmem:[#allocation2 + $0xe1] sm:$0xff] }
  0xac   : > { %631 = vst.msk [vmem:[#allocation2 + $0x109] sm:$0xff] %vm610_vm3, %v555_v42  ;;  %998 = vrot.lane.b32.xlu1 %v6175_v41, %s5776_s8  ;;  %1000 = vrot.lane.b32.xlu0 %v6177_v43, %s5776_s8  ;;  %632 = vst.msk [vmem:[#allocation2 + $0x111] sm:$0xff] %vm610_vm3, %v557_v44  ;;  %v6309_v32 = vld [vmem:[#allocation2 + $0xda] sm:$0xff]  ;;  %v6315_v34 = vld [vmem:[#allocation2 + $0xe2] sm:$0xff] }
  0xad   : > { %9050 = vst [vmem:[#allocation4_spill] sm:$0xff] %v6309_v32  ;;  %9051 = vst [vmem:[#allocation5_spill] sm:$0xff] %v6315_v34 }
  0xaf   : > { %v559_v46 = vpop.permute.xlu0 %558  ;;  %v6187_v47 = vld [vmem:[#allocation2 + $0xf1] sm:$0xff]  ;;  %v561_v48 = vpop.permute.xlu1 %560  ;;  %v6195_v49 = vld [vmem:[#allocation2 + $0xf9] sm:$0xff] }
  0xb0   : > { %633 = vst.msk [vmem:[#allocation2 + $0x121] sm:$0xff] %vm610_vm3, %v559_v46  ;;  %1002 = vrot.lane.b32.xlu1 %v6185_v45, %s5776_s8  ;;  %1004 = vrot.lane.b32.xlu0 %v6187_v47, %s5776_s8  ;;  %634 = vst.msk [vmem:[#allocation2 + $0x129] sm:$0xff] %vm610_vm3, %v561_v48  ;;  %v6317_v36 = vld [vmem:[#allocation2 + $0xf2] sm:$0xff]  ;;  %v6323_v38 = vld [vmem:[#allocation2 + $0xfa] sm:$0xff] }
  0xb1   : > { %9052 = vst [vmem:[#allocation6_spill] sm:$0xff] %v6317_v36  ;;  %9053 = vst [vmem:[#allocation7_spill] sm:$0xff] %v6323_v38 }
  0xb3   : > { %v563_v50 = vpop.permute.xlu0 %562  ;;  %v6197_v51 = vld [vmem:[#allocation2 + $0x109] sm:$0xff]  ;;  %v565_v52 = vpop.permute.xlu1 %564  ;;  %v6205_v53 = vld [vmem:[#allocation2 + $0x111] sm:$0xff] }
  0xb4   : > { %635 = vst.msk [vmem:[#allocation2 + $0x139] sm:$0xff] %vm610_vm3, %v563_v50  ;;  %1006 = vrot.lane.b32.xlu1 %v6195_v49, %s5776_s8  ;;  %1008 = vrot.lane.b32.xlu0 %v6197_v51, %s5776_s8  ;;  %636 = vst.msk [vmem:[#allocation2 + $0x141] sm:$0xff] %vm610_vm3, %v565_v52  ;;  %v6325_v40 = vld [vmem:[#allocation2 + $0x10a] sm:$0xff]  ;;  %v6333_v44 = vld [vmem:[#allocation2 + $0x112] sm:$0xff] }
  0xb5   : > { %9054 = vst [vmem:[#allocation8_spill] sm:$0xff] %v6325_v40  ;;  %9056 = vst [vmem:[#allocation10_spill] sm:$0xff] %v6333_v44 }
  0xb7   : > { %v567_v54 = vpop.permute.xlu0 %566  ;;  %v6207_v55 = vld [vmem:[#allocation2 + $0x121] sm:$0xff]  ;;  %v569_v56 = vpop.permute.xlu1 %568  ;;  %v6215_v57 = vld [vmem:[#allocation2 + $0x129] sm:$0xff] }
  0xb8   : > { %637 = vst.msk [vmem:[#allocation2 + $0x151] sm:$0xff] %vm610_vm3, %v567_v54  ;;  %1010 = vrot.lane.b32.xlu1 %v6205_v53, %s5776_s8  ;;  %1012 = vrot.lane.b32.xlu0 %v6207_v55, %s5776_s8  ;;  %638 = vst.msk [vmem:[#allocation2 + $0x159] sm:$0xff] %vm610_vm3, %v569_v56  ;;  %v6335_v46 = vld [vmem:[#allocation2 + $0x122] sm:$0xff]  ;;  %v6341_v48 = vld [vmem:[#allocation2 + $0x12a] sm:$0xff] }
  0xb9   : > { %9057 = vst [vmem:[#allocation11_spill] sm:$0xff] %v6335_v46  ;;  %9058 = vst [vmem:[#allocation12_spill] sm:$0xff] %v6341_v48 }
  0xbb   : > { %v571_v58 = vpop.permute.xlu0 %570  ;;  %v6217_v59 = vld [vmem:[#allocation2 + $0x139] sm:$0xff]  ;;  %v573_v60 = vpop.permute.xlu1 %572  ;;  %v6225_v61 = vld [vmem:[#allocation2 + $0x141] sm:$0xff] }
  0xbc   : > { %639 = vst.msk [vmem:[#allocation2 + $0x169] sm:$0xff] %vm610_vm3, %v571_v58  ;;  %1014 = vrot.lane.b32.xlu1 %v6215_v57, %s5776_s8  ;;  %1016 = vrot.lane.b32.xlu0 %v6217_v59, %s5776_s8  ;;  %640 = vst.msk [vmem:[#allocation2 + $0x171] sm:$0xff] %vm610_vm3, %v573_v60  ;;  %v6343_v50 = vld [vmem:[#allocation2 + $0x13a] sm:$0xff]  ;;  %v6353_v56 = vld [vmem:[#allocation2 + $0x142] sm:$0xff] }
  0xbd   : > { %9059 = vst [vmem:[#allocation13_spill] sm:$0xff] %v6343_v50  ;;  %9062 = vst [vmem:[#allocation16_spill] sm:$0xff] %v6353_v56 }
  0xbf   : > { %v6227_v62 = vld [vmem:[#allocation2 + $0x151] sm:$0xff]  ;;  %v575_v63 = vpop.permute.xlu0 %574  ;;  %v577_v1 = vpop.permute.xlu1 %576  ;;  %v6235_v2 = vld [vmem:[#allocation2 + $0x159] sm:$0xff] }
  0xc0   : > { %1018 = vrot.lane.b32.xlu1 %v6225_v61, %s5776_s8  ;;  %1020 = vrot.lane.b32.xlu0 %v6227_v62, %s5776_s8  ;;  %641 = vst.msk [vmem:[#allocation2 + $0x181] sm:$0xff] %vm610_vm3, %v575_v63  ;;  %642 = vst.msk [vmem:[#allocation2 + $0x189] sm:$0xff] %vm610_vm3, %v577_v1  ;;  %v6355_v58 = vld [vmem:[#allocation2 + $0x152] sm:$0xff]  ;;  %v6365_v1 = vld [vmem:[#allocation2 + $0x15a] sm:$0xff] }
  0xc1   : > { %9063 = vst [vmem:[#allocation17_spill] sm:$0xff] %v6355_v58  ;;  %9066 = vst [vmem:[#allocation20_spill] sm:$0xff] %v6365_v1 }
  0xc3   : > { %v6237_v3 = vld [vmem:[#allocation2 + $0x169] sm:$0xff]  ;;  %v6243_v4 = vld [vmem:[#allocation2 + $0x171] sm:$0xff]  ;;  %v6331_v42 = vpop.permute.xlu0 %964  ;;  %v6345_v52 = vpop.permute.xlu1 %966 }
  0xc4   : > { %1022 = vrot.lane.b32.xlu1 %v6235_v2, %s5776_s8  ;;  %1024 = vrot.lane.b32.xlu0 %v6237_v3, %s5776_s8  ;;  %9055 = vst [vmem:[#allocation9_spill] sm:$0xff] %v6331_v42  ;;  %9060 = vst [vmem:[#allocation14_spill] sm:$0xff] %v6345_v52  ;;  %v6367_v0 = vld [vmem:[#allocation2 + $0x16a] sm:$0xff]  ;;  %v645_v42 = vld [vmem:[#allocation2 + $0x18] sm:$0xff] }
  0xc5   : > { %9067 = vst [vmem:[#allocation21_spill] sm:$0xff] %v6367_v0 }
  0xc7   : > { %v6351_v54 = vpop.permute.xlu0 %1092  ;;  %v6361_v60 = vpop.permute.xlu1 %1094 }
  0xc8   : > { %1026 = vrot.lane.b32.xlu1 %v6243_v4, %s5776_s8  ;;  %1096 = vrot.lane.b32.xlu0 %v6245_v5, %s5777_s9  ;;  %9061 = vst [vmem:[#allocation15_spill] sm:$0xff] %v6351_v54  ;;  %9064 = vst [vmem:[#allocation18_spill] sm:$0xff] %v6361_v60  ;;  %s5783_s8 = smov 48  }
  0xcc   : > { %1098 = vrot.lane.b32.xlu1 %v6251_v6, %s5777_s9  ;;  %1100 = vrot.lane.b32.xlu0 %v6253_v7, %s5777_s9 }
  0xd0   : > { %1102 = vrot.lane.b32.xlu1 %v6259_v8, %s5777_s9  ;;  %1104 = vrot.lane.b32.xlu0 %v6261_v9, %s5777_s9 }
  0xd4   : > { %1106 = vrot.lane.b32.xlu1 %v6267_v10, %s5777_s9  ;;  %1108 = vrot.lane.b32.xlu0 %v6269_v12, %s5777_s9 }
  0xd8   : > { %1110 = vrot.lane.b32.xlu1 %v6275_v14, %s5777_s9  ;;  %1112 = vrot.lane.b32.xlu0 %v6277_v16, %s5777_s9 }
  0xdc   : > { %1114 = vrot.lane.b32.xlu1 %v6283_v18, %s5777_s9  ;;  %1116 = vrot.lane.b32.xlu0 %v6285_v20, %s5777_s9 }
  0xe0   : > { %1118 = vrot.lane.b32.xlu1 %v6291_v22, %s5777_s9  ;;  %1120 = vrot.lane.b32.xlu0 %v6293_v24, %s5777_s9 }
  0xe4   : > { %1122 = vrot.lane.b32.xlu1 %v6299_v26, %s5777_s9  ;;  %1124 = vrot.lane.b32.xlu0 %v6301_v28, %s5777_s9 }
  0xe8   : > { %1126 = vrot.lane.b32.xlu1 %v6307_v30, %s5777_s9  ;;  %1128 = vrot.lane.b32.xlu0 %v6309_v32, %s5777_s9  ;;  %v6517_v32 = vld [vmem:[#allocation2 + $0x138] sm:$0xff] }
  0xe9   : > { %9107 = vst [vmem:[#allocation61_spill] sm:$0xff] %v6517_v32 }
  0xec   : > { %1130 = vrot.lane.b32.xlu1 %v6315_v34, %s5777_s9  ;;  %1132 = vrot.lane.b32.xlu0 %v6317_v36, %s5777_s9  ;;  %v6505_v36 = vld [vmem:[#allocation2 + $0x120] sm:$0xff] }
  0xed   : > { %9103 = vst [vmem:[#allocation57_spill] sm:$0xff] %v6505_v36 }
  0xf0   : > { %1134 = vrot.lane.b32.xlu1 %v6323_v38, %s5777_s9  ;;  %1136 = vrot.lane.b32.xlu0 %v6325_v40, %s5777_s9  ;;  %v6503_v38 = vld [vmem:[#allocation2 + $0x110] sm:$0xff] }
  0xf1   : > { %9102 = vst [vmem:[#allocation56_spill] sm:$0xff] %v6503_v38 }
  0xf4   : > { %1138 = vrot.lane.b32.xlu1 %v6333_v44, %s5777_s9  ;;  %1140 = vrot.lane.b32.xlu0 %v6335_v46, %s5777_s9  ;;  %v6493_v46 = vld [vmem:[#allocation2 + $0x108] sm:$0xff] }
  0xf8   : > { %1142 = vrot.lane.b32.xlu1 %v6341_v48, %s5777_s9  ;;  %1144 = vrot.lane.b32.xlu0 %v6343_v50, %s5777_s9  ;;  %v6491_v48 = vld [vmem:[#allocation2 + $0xf8] sm:$0xff] }
  0xfc   : > { %1146 = vrot.lane.b32.xlu1 %v6353_v56, %s5777_s9  ;;  %1148 = vrot.lane.b32.xlu0 %v6355_v58, %s5777_s9  ;;  %v6377_v58 = vld [vmem:[#allocation2 + $0x172] sm:$0xff] }
  0xfd   : > { %9070 = vst [vmem:[#allocation24_spill] sm:$0xff] %v6377_v58  ;;  %v6386_v56 = vld [vmem:[#allocation2 + $0x30] sm:$0xff] }
  0xfe   : > { %v6363_v63 = vpop.permute.xlu0 %968  ;;  %9073 = vst [vmem:[#allocation27_spill] sm:$0xff] %v6386_v56 }
  0xff   : > { %9065 = vst [vmem:[#allocation19_spill] sm:$0xff] %v6363_v63 }
 0x100   : > { %1150 = vrot.lane.b32.xlu1 %v6365_v1, %s5777_s9  ;;  %1152 = vrot.lane.b32.xlu0 %v6367_v0, %s5777_s9  ;;  %v646_v1 = vld [vmem:[#allocation2 + $0x20] sm:$0xff]  ;;  %v6397_v0 = vld [vmem:[#allocation2 + $0x48] sm:$0xff] }
 0x101   : > { %9077 = vst [vmem:[#allocation31_spill] sm:$0xff] %v6397_v0 }
 0x102   : > { %v6373_v54 = vpop.permute.xlu1 %970  ;;  %v6375_v52 = vpop.permute.xlu0 %972 }
 0x103   : > { %9068 = vst [vmem:[#allocation22_spill] sm:$0xff] %v6373_v54  ;;  %9069 = vst [vmem:[#allocation23_spill] sm:$0xff] %v6375_v52 }
 0x104   : > { %1154 = vrot.lane.b32.xlu1 %v6377_v58, %s5777_s9  ;;  %1220 = vrot.lane.b32.xlu0 %v645_v42, %s5778_s10  ;;  %v6395_v58 = vld [vmem:[#allocation2 + $0x38] sm:$0xff] }
 0x105   : > { %9076 = vst [vmem:[#allocation30_spill] sm:$0xff] %v6395_v58 }
 0x106   : > { %v6382_v63 = vpop.permute.xlu1 %974  ;;  %v6384_v60 = vpop.permute.xlu0 %976 }
 0x107   : > { %9071 = vst [vmem:[#allocation25_spill] sm:$0xff] %v6382_v63  ;;  %9072 = vst [vmem:[#allocation26_spill] sm:$0xff] %v6384_v60  ;;  %v6407_v60 = vld [vmem:[#allocation2 + $0x50] sm:$0xff]  ;;  %v6409_v63 = vld [vmem:[#allocation2 + $0x60] sm:$0xff] }
 0x108   : > { %1222 = vrot.lane.b32.xlu1 %v646_v1, %s5778_s10  ;;  %1224 = vrot.lane.b32.xlu0 %v6386_v56, %s5778_s10  ;;  %9080 = vst [vmem:[#allocation34_spill] sm:$0xff] %v6407_v60  ;;  %9081 = vst [vmem:[#allocation35_spill] sm:$0xff] %v6409_v63  ;;  %v6479_v56 = vld [vmem:[#allocation2 + $0xe0] sm:$0xff] }
 0x10a   : > { %v6391_v52 = vpop.permute.xlu1 %978  ;;  %v6393_v54 = vpop.permute.xlu0 %980 }
 0x10b   : > { %9074 = vst [vmem:[#allocation28_spill] sm:$0xff] %v6391_v52  ;;  %9075 = vst [vmem:[#allocation29_spill] sm:$0xff] %v6393_v54 }
 0x10c   : > { %1226 = vrot.lane.b32.xlu1 %v6395_v58, %s5778_s10  ;;  %1228 = vrot.lane.b32.xlu0 %v6397_v0, %s5778_s10  ;;  %v6419_v58 = vld [vmem:[#allocation2 + $0x68] sm:$0xff]  ;;  %v6421_v0 = vld [vmem:[#allocation2 + $0x78] sm:$0xff] }
 0x10d   : > { %9084 = vst [vmem:[#allocation38_spill] sm:$0xff] %v6419_v58  ;;  %9085 = vst [vmem:[#allocation39_spill] sm:$0xff] %v6421_v0 }
 0x10e   : > { %v6403_v42 = vpop.permute.xlu1 %982  ;;  %v6405_v1 = vpop.permute.xlu0 %984 }
 0x10f   : > { %9078 = vst [vmem:[#allocation32_spill] sm:$0xff] %v6403_v42  ;;  %9079 = vst [vmem:[#allocation33_spill] sm:$0xff] %v6405_v1 }
 0x110   : > { %1230 = vrot.lane.b32.xlu1 %v6407_v60, %s5778_s10  ;;  %1232 = vrot.lane.b32.xlu0 %v6409_v63, %s5778_s10  ;;  %v6431_v60 = vld [vmem:[#allocation2 + $0x80] sm:$0xff]  ;;  %v6433_v63 = vld [vmem:[#allocation2 + $0x90] sm:$0xff] }
 0x111   : > { %9088 = vst [vmem:[#allocation42_spill] sm:$0xff] %v6431_v60  ;;  %9089 = vst [vmem:[#allocation43_spill] sm:$0xff] %v6433_v63 }
 0x112   : > { %v6415_v54 = vpop.permute.xlu1 %986  ;;  %v6417_v52 = vpop.permute.xlu0 %988 }
 0x113   : > { %9082 = vst [vmem:[#allocation36_spill] sm:$0xff] %v6415_v54  ;;  %9083 = vst [vmem:[#allocation37_spill] sm:$0xff] %v6417_v52  ;;  %v6443_v52 = vld [vmem:[#allocation2 + $0x98] sm:$0xff] }
 0x114   : > { %1234 = vrot.lane.b32.xlu1 %v6419_v58, %s5778_s10  ;;  %1236 = vrot.lane.b32.xlu0 %v6421_v0, %s5778_s10  ;;  %9092 = vst [vmem:[#allocation46_spill] sm:$0xff] %v6443_v52  ;;  %v6445_v0 = vld [vmem:[#allocation2 + $0xa8] sm:$0xff] }
 0x115   : > { %9093 = vst [vmem:[#allocation47_spill] sm:$0xff] %v6445_v0 }
 0x116   : > { %v6427_v1 = vpop.permute.xlu1 %990  ;;  %v6429_v42 = vpop.permute.xlu0 %992 }
 0x117   : > { %9086 = vst [vmem:[#allocation40_spill] sm:$0xff] %v6427_v1  ;;  %9087 = vst [vmem:[#allocation41_spill] sm:$0xff] %v6429_v42  ;;  %v6455_v1 = vld [vmem:[#allocation2 + $0xb0] sm:$0xff] }
 0x118   : > { %1238 = vrot.lane.b32.xlu1 %v6431_v60, %s5778_s10  ;;  %1240 = vrot.lane.b32.xlu0 %v6433_v63, %s5778_s10  ;;  %9095 = vst [vmem:[#allocation49_spill] sm:$0xff] %v6455_v1  ;;  %v6457_v63 = vld [vmem:[#allocation2 + $0xc0] sm:$0xff] }
 0x119   : > { %9096 = vst [vmem:[#allocation50_spill] sm:$0xff] %v6457_v63 }
 0x11a   : > { %v6439_v54 = vpop.permute.xlu1 %994  ;;  %v6441_v58 = vpop.permute.xlu0 %996 }
 0x11b   : > { %9090 = vst [vmem:[#allocation44_spill] sm:$0xff] %v6439_v54  ;;  %9091 = vst [vmem:[#allocation45_spill] sm:$0xff] %v6441_v58 }
 0x11c   : > { %1242 = vrot.lane.b32.xlu1 %v6443_v52, %s5778_s10  ;;  %1244 = vrot.lane.b32.xlu0 %v6445_v0, %s5778_s10  ;;  %v6467_v52 = vld [vmem:[#allocation2 + $0xc8] sm:$0xff]  ;;  %v6469_v0 = vld [vmem:[#allocation2 + $0xd8] sm:$0xff] }
 0x11d   : > { %9097 = vst [vmem:[#allocation51_spill] sm:$0xff] %v6467_v52 }
 0x11e   : > { %v6451_v42 = vpop.permute.xlu1 %998  ;;  %v6453_v60 = vpop.permute.xlu0 %1000 }
 0x11f   : > { %9094 = vst [vmem:[#allocation48_spill] sm:$0xff] %v6451_v42 }
 0x120   : > { %1246 = vrot.lane.b32.xlu1 %v6455_v1, %s5778_s10  ;;  %1248 = vrot.lane.b32.xlu0 %v6457_v63, %s5778_s10  ;;  %v6481_v63 = vld [vmem:[#allocation2 + $0xf0] sm:$0xff] }
 0x122   : > { %v6463_v58 = vpop.permute.xlu1 %1002  ;;  %v6465_v54 = vpop.permute.xlu0 %1004 }
 0x124   : > { %1250 = vrot.lane.b32.xlu1 %v6467_v52, %s5778_s10  ;;  %1252 = vrot.lane.b32.xlu0 %v6469_v0, %s5778_s10 }
 0x126   : > { %v6475_v42 = vpop.permute.xlu1 %1006  ;;  %v6477_v1 = vpop.permute.xlu0 %1008 }
 0x128   : > { %1254 = vrot.lane.b32.xlu1 %v6479_v56, %s5778_s10  ;;  %1256 = vrot.lane.b32.xlu0 %v6481_v63, %s5778_s10 }
 0x12a   : > { %v6487_v50 = vpop.permute.xlu1 %1010  ;;  %v6489_v52 = vpop.permute.xlu0 %1012 }
 0x12b   : > { %9098 = vst [vmem:[#allocation52_spill] sm:$0xff] %v6487_v50  ;;  %9099 = vst [vmem:[#allocation53_spill] sm:$0xff] %v6489_v52  ;;  %v6515_v50 = vld [vmem:[#allocation2 + $0x128] sm:$0xff] }
 0x12c   : > { %1258 = vrot.lane.b32.xlu1 %v6491_v48, %s5778_s10  ;;  %1260 = vrot.lane.b32.xlu0 %v6493_v46, %s5778_s10  ;;  %9106 = vst [vmem:[#allocation60_spill] sm:$0xff] %v6515_v50 }
 0x12e   : > { %v6499_v44 = vpop.permute.xlu1 %1014  ;;  %v6501_v40 = vpop.permute.xlu0 %1016 }
 0x12f   : > { %9100 = vst [vmem:[#allocation54_spill] sm:$0xff] %v6499_v44  ;;  %9101 = vst [vmem:[#allocation55_spill] sm:$0xff] %v6501_v40 }
 0x130   : > { %1262 = vrot.lane.b32.xlu1 %v6503_v38, %s5778_s10  ;;  %1264 = vrot.lane.b32.xlu0 %v6505_v36, %s5778_s10  ;;  %v6527_v38 = vld [vmem:[#allocation2 + $0x140] sm:$0xff]  ;;  %v6529_v36 = vld [vmem:[#allocation2 + $0x150] sm:$0xff] }
 0x131   : > { %9110 = vst [vmem:[#allocation64_spill] sm:$0xff] %v6527_v38  ;;  %9111 = vst [vmem:[#allocation65_spill] sm:$0xff] %v6529_v36 }
 0x132   : > { %v6511_v34 = vpop.permute.xlu1 %1018  ;;  %v6513_v52 = vpop.permute.xlu0 %1020 }
 0x133   : > { %9104 = vst [vmem:[#allocation58_spill] sm:$0xff] %v6511_v34  ;;  %9105 = vst [vmem:[#allocation59_spill] sm:$0xff] %v6513_v52 }
 0x134   : > { %1266 = vrot.lane.b32.xlu1 %v6515_v50, %s5778_s10  ;;  %1268 = vrot.lane.b32.xlu0 %v6517_v32, %s5778_s10  ;;  %v6539_v50 = vld [vmem:[#allocation2 + $0x158] sm:$0xff]  ;;  %v6541_v32 = vld [vmem:[#allocation2 + $0x168] sm:$0xff] }
 0x135   : > { %9114 = vst [vmem:[#allocation68_spill] sm:$0xff] %v6539_v50 }
 0x136   : > { %v6523_v40 = vpop.permute.xlu1 %1022  ;;  %v6525_v44 = vpop.permute.xlu0 %1024 }
 0x137   : > { %9108 = vst [vmem:[#allocation62_spill] sm:$0xff] %v6523_v40  ;;  %9109 = vst [vmem:[#allocation63_spill] sm:$0xff] %v6525_v44 }
 0x138   : > { %1270 = vrot.lane.b32.xlu1 %v6527_v38, %s5778_s10  ;;  %1272 = vrot.lane.b32.xlu0 %v6529_v36, %s5778_s10  ;;  %v6551_v38 = vld [vmem:[#allocation2 + $0x170] sm:$0xff]  ;;  %v769_v36 = vld [vmem:[#allocation2 + $0x180] sm:$0xff] }
 0x13a   : > { %v6535_v52 = vpop.permute.xlu1 %1026  ;;  %v6537_v34 = vpop.permute.xlu0 %1096 }
 0x13b   : > { %9112 = vst [vmem:[#allocation66_spill] sm:$0xff] %v6535_v52  ;;  %9113 = vst [vmem:[#allocation67_spill] sm:$0xff] %v6537_v34 }
 0x13c   : > { %1274 = vrot.lane.b32.xlu1 %v6539_v50, %s5778_s10  ;;  %1276 = vrot.lane.b32.xlu0 %v6541_v32, %s5778_s10  ;;  %v770_v50 = vld [vmem:[#allocation2 + $0x188] sm:$0xff] }
 0x13e   : > { %v6547_v44 = vpop.permute.xlu1 %1098  ;;  %v6549_v40 = vpop.permute.xlu0 %1100 }
 0x13f   : > { %9115 = vst [vmem:[#allocation69_spill] sm:$0xff] %v6547_v44  ;;  %9116 = vst [vmem:[#allocation70_spill] sm:$0xff] %v6549_v40 }
 0x140   : > { %1278 = vrot.lane.b32.xlu1 %v6551_v38, %s5778_s10  ;;  %1280 = vrot.lane.b32.xlu0 %v769_v36, %s5778_s10 }
 0x142   : > { %v6556_v34 = vpop.permute.xlu1 %1102  ;;  %v6558_v52 = vpop.permute.xlu0 %1104 }
 0x143   : > { %9117 = vst [vmem:[#allocation71_spill] sm:$0xff] %v6558_v52 }
 0x144   : > { %1282 = vrot.lane.b32.xlu1 %v770_v50, %s5778_s10  ;;  %1348 = vrot.lane.b32.xlu0 %v6099_v11, %s5779_s11 }
 0x146   : > { %v6563_v40 = vpop.permute.xlu1 %1106  ;;  %v6565_v44 = vpop.permute.xlu0 %1108 }
 0x148   : > { %1350 = vrot.lane.b32.xlu1 %v6107_v15, %s5779_s11  ;;  %1352 = vrot.lane.b32.xlu0 %v6105_v13, %s5779_s11 }
 0x14a   : > { %v6571_v36 = vpop.permute.xlu1 %1110  ;;  %v6573_v52 = vpop.permute.xlu0 %1112 }
 0x14b   : > { %9118 = vst [vmem:[#allocation72_spill] sm:$0xff] %v6573_v52  ;;  %v802_v52 = vld [vmem:[#allocation2 + $0x189] sm:$0xff] }
 0x14c   : > { %1354 = vrot.lane.b32.xlu1 %v6115_v17, %s5779_s11  ;;  %1356 = vrot.lane.b32.xlu0 %v6117_v19, %s5779_s11 }
 0x14e   : > { %v6579_v11 = vpop.permute.xlu1 %1114  ;;  %v6581_v50 = vpop.permute.xlu0 %1116 }
 0x14f   : > { %9119 = vst [vmem:[#allocation73_spill] sm:$0xff] %v6579_v11  ;;  %v801_v11 = vld [vmem:[#allocation2 + $0x181] sm:$0xff] }
 0x150   : > { %1358 = vrot.lane.b32.xlu1 %v6125_v21, %s5779_s11  ;;  %1360 = vrot.lane.b32.xlu0 %v6127_v23, %s5779_s11 }
 0x152   : > { %v6587_v13 = vpop.permute.xlu1 %1118  ;;  %v6589_v15 = vpop.permute.xlu0 %1120 }
 0x154   : > { %1362 = vrot.lane.b32.xlu1 %v6135_v25, %s5779_s11  ;;  %1364 = vrot.lane.b32.xlu0 %v6137_v27, %s5779_s11 }
 0x156   : > { %v6595_v17 = vpop.permute.xlu1 %1122  ;;  %v6597_v19 = vpop.permute.xlu0 %1124 }
 0x158   : > { %1366 = vrot.lane.b32.xlu1 %v6145_v29, %s5779_s11  ;;  %1368 = vrot.lane.b32.xlu0 %v6147_v31, %s5779_s11 }
 0x15a   : > { %v6603_v21 = vpop.permute.xlu1 %1126  ;;  %v6605_v23 = vpop.permute.xlu0 %1128 }
 0x15c   : > { %1370 = vrot.lane.b32.xlu1 %v6155_v33, %s5779_s11  ;;  %1372 = vrot.lane.b32.xlu0 %v6157_v35, %s5779_s11 }
 0x15e   : > { %v6611_v25 = vpop.permute.xlu1 %1130  ;;  %v6613_v27 = vpop.permute.xlu0 %1132 }
 0x160   : > { %1374 = vrot.lane.b32.xlu1 %v6165_v37, %s5779_s11  ;;  %1376 = vrot.lane.b32.xlu0 %v6167_v39, %s5779_s11 }
 0x162   : > { %v6619_v29 = vpop.permute.xlu1 %1134  ;;  %v6621_v31 = vpop.permute.xlu0 %1136 }
 0x164   : > { %1378 = vrot.lane.b32.xlu1 %v6175_v41, %s5779_s11  ;;  %1380 = vrot.lane.b32.xlu0 %v6177_v43, %s5779_s11 }
 0x166   : > { %v6627_v33 = vpop.permute.xlu1 %1138  ;;  %v6629_v35 = vpop.permute.xlu0 %1140 }
 0x168   : > { %1382 = vrot.lane.b32.xlu1 %v6185_v45, %s5779_s11  ;;  %1384 = vrot.lane.b32.xlu0 %v6187_v47, %s5779_s11 }
 0x16a   : > { %v6635_v37 = vpop.permute.xlu1 %1142  ;;  %v6637_v39 = vpop.permute.xlu0 %1144 }
 0x16c   : > { %1386 = vrot.lane.b32.xlu1 %v6195_v49, %s5779_s11  ;;  %1388 = vrot.lane.b32.xlu0 %v6197_v51, %s5779_s11 }
 0x16e   : > { %v6643_v41 = vpop.permute.xlu1 %1146  ;;  %v6645_v43 = vpop.permute.xlu0 %1148 }
 0x170   : > { %1390 = vrot.lane.b32.xlu1 %v6205_v53, %s5779_s11  ;;  %1392 = vrot.lane.b32.xlu0 %v6207_v55, %s5779_s11 }
 0x172   : > { %v6651_v45 = vpop.permute.xlu1 %1150  ;;  %v6653_v47 = vpop.permute.xlu0 %1152 }
 0x174   : > { %1394 = vrot.lane.b32.xlu1 %v6215_v57, %s5779_s11  ;;  %1396 = vrot.lane.b32.xlu0 %v6217_v59, %s5779_s11 }
 0x176   : > { %v6659_v49 = vpop.permute.xlu1 %1154  ;;  %v6661_v51 = vpop.permute.xlu0 %1220 }
 0x178   : > { %1398 = vrot.lane.b32.xlu1 %v6225_v61, %s5779_s11  ;;  %1400 = vrot.lane.b32.xlu0 %v6227_v62, %s5779_s11 }
 0x17a   : > { %v6667_v53 = vpop.permute.xlu1 %1222  ;;  %v6669_v55 = vpop.permute.xlu0 %1224 }
 0x17c   : > { %1402 = vrot.lane.b32.xlu1 %v6235_v2, %s5779_s11  ;;  %1404 = vrot.lane.b32.xlu0 %v6237_v3, %s5779_s11 }
 0x17e   : > { %v6675_v57 = vpop.permute.xlu1 %1226  ;;  %v6677_v59 = vpop.permute.xlu0 %1228 }
 0x180   : > { %1406 = vrot.lane.b32.xlu1 %v6243_v4, %s5779_s11  ;;  %1408 = vrot.lane.b32.xlu0 %v801_v11, %s5779_s11 }
 0x182   : > { %v6682_v61 = vpop.permute.xlu1 %1230  ;;  %v6684_v62 = vpop.permute.xlu0 %1232 }
 0x184   : > { %1410 = vrot.lane.b32.xlu1 %v802_v52, %s5779_s11  ;;  %1476 = vrot.lane.b32.xlu0 %v6245_v5, %s5780_s12  ;;  %s5784_s11 = smov 96  }
 0x186   : > { %v6689_v2 = vpop.permute.xlu1 %1234  ;;  %v6691_v3 = vpop.permute.xlu0 %1236 }
 0x188   : > { %1478 = vrot.lane.b32.xlu1 %v6251_v6, %s5780_s12  ;;  %1480 = vrot.lane.b32.xlu0 %v6253_v7, %s5780_s12 }
 0x18a   : > { %v6697_v4 = vpop.permute.xlu1 %1238  ;;  %v6699_v11 = vpop.permute.xlu0 %1240 }
 0x18b   : > { %9120 = vst [vmem:[#allocation74_spill] sm:$0xff] %v6699_v11  ;;  %v9164_v11 = vld [vmem:[#allocation47_spill] sm:$0xff] }
 0x18c   : > { %1482 = vrot.lane.b32.xlu1 %v6259_v8, %s5780_s12  ;;  %1484 = vrot.lane.b32.xlu0 %v6261_v9, %s5780_s12 }
 0x18e   : > { %v6705_v5 = vpop.permute.xlu1 %1242  ;;  %v6707_v52 = vpop.permute.xlu0 %1244 }
 0x18f   : > { %9121 = vst [vmem:[#allocation75_spill] sm:$0xff] %v6705_v5 }
 0x190   : > { %1486 = vrot.lane.b32.xlu1 %v6267_v10, %s5780_s12  ;;  %1488 = vrot.lane.b32.xlu0 %v6269_v12, %s5780_s12  ;;  %v1974_v10 = vsel %vm272_vm0, %v6469_v0, %v6453_v60  ;;  %v1975_v0 = vsel %vm272_vm0, %v6479_v56, %v6463_v58  ;;  %v1978_v56 = vsel %vm272_vm0, %v6493_v46, %v6477_v1  ;;  %v9123_v46 = vld [vmem:[#allocation52_spill] sm:$0xff] }
 0x191   : > { %v2007_v12 = vsel %vm1988_vm4, %v1974_v10, %v6605_v23 }
 0x192   : > { %v6713_v6 = vpop.permute.xlu1 %1246  ;;  %v6715_v7 = vpop.permute.xlu0 %1248 }
 0x194   : > { %1490 = vrot.lane.b32.xlu1 %v6275_v14, %s5780_s12  ;;  %1492 = vrot.lane.b32.xlu0 %v6277_v16, %s5780_s12 }
 0x196   : > { %v6721_v8 = vpop.permute.xlu1 %1250  ;;  %v6723_v9 = vpop.permute.xlu0 %1252 }
 0x198   : > { %1494 = vrot.lane.b32.xlu1 %v6283_v18, %s5780_s12  ;;  %1496 = vrot.lane.b32.xlu0 %v6285_v20, %s5780_s12  ;;  %v1976_v18 = vsel %vm272_vm0, %v6481_v63, %v6465_v54  ;;  %v2008_v20 = vsel %vm1988_vm4, %v1975_v0, %v6611_v25  ;;  %v1977_v54 = vsel %vm272_vm0, %v6491_v48, %v6475_v42  ;;  %v9122_v48 = vld [vmem:[#allocation4_spill] sm:$0xff] }
 0x199   : > { %v2009_v60 = vsel %vm1988_vm4, %v1976_v18, %v6613_v27  ;;  %v2010_v58 = vsel %vm1988_vm4, %v1977_v54, %v6619_v29  ;;  %v2011_v63 = vsel %vm1988_vm4, %v1978_v56, %v6621_v31  ;;  %v9124_v42 = vld [vmem:[#allocation56_spill] sm:$0xff]  ;;  %v9125_v29 = vld [vmem:[#allocation53_spill] sm:$0xff]  ;;  %v9129_v54 = vld [vmem:[#allocation54_spill] sm:$0xff] }
 0x19a   : > { %v6734_v14 = vpop.permute.xlu1 %1254  ;;  %v1257_v16 = vpop.permute.xlu0 %1256  ;;  %v1979_v1 = vsel %vm272_vm0, %v9124_v42, %v9123_v46  ;;  %v9126_v31 = vld [vmem:[#allocation57_spill] sm:$0xff]  ;;  %v9130_v56 = vld [vmem:[#allocation60_spill] sm:$0xff] }
 0x19b   : > { %v6737_v5 = vsel %vm2021_vm5, %v2007_v12, %v1257_v16  ;;  %v1980_v12 = vsel %vm272_vm0, %v9126_v31, %v9125_v29  ;;  %v2012_v16 = vsel %vm1988_vm4, %v1979_v1, %v6627_v33  ;;  %v1981_v33 = vsel %vm272_vm0, %v9130_v56, %v9129_v54  ;;  %v9133_v29 = vld [vmem:[#allocation7_spill] sm:$0xff]  ;;  %v9134_v31 = vld [vmem:[#allocation8_spill] sm:$0xff] }
 0x19c   : > { %1498 = vrot.lane.b32.xlu1 %v6291_v22, %s5780_s12  ;;  %1500 = vrot.lane.b32.xlu0 %v6293_v24, %s5780_s12  ;;  %v2013_v0 = vsel %vm1988_vm4, %v1980_v12, %v6629_v35  ;;  %v9132_v35 = vld [vmem:[#allocation61_spill] sm:$0xff]  ;;  %v9135_v12 = vld [vmem:[#allocation58_spill] sm:$0xff] }
 0x19e   : > { %v1259_v23 = vpop.permute.xlu1 %1258  ;;  %v1261_v10 = vpop.permute.xlu0 %1260 }
 0x19f   : > { %v6754_v22 = vsel %vm2021_vm5, %v2008_v20, %v1259_v23  ;;  %v6757_v24 = vsel %vm2021_vm5, %v2009_v60, %v1261_v10  ;;  %v9127_v23 = vld [vmem:[#allocation5_spill] sm:$0xff]  ;;  %v9128_v10 = vld [vmem:[#allocation6_spill] sm:$0xff] }
 0x1a0   : > { %1502 = vrot.lane.b32.xlu1 %v6299_v26, %s5780_s12  ;;  %1504 = vrot.lane.b32.xlu0 %v6301_v28, %s5780_s12 }
 0x1a2   : > { %v1263_v25 = vpop.permute.xlu1 %1262  ;;  %v1265_v27 = vpop.permute.xlu0 %1264 }
 0x1a3   : > { %v6774_v26 = vsel %vm2021_vm5, %v2010_v58, %v1263_v25  ;;  %v6777_v28 = vsel %vm2021_vm5, %v2011_v63, %v1265_v27  ;;  %v9131_v58 = vld [vmem:[#allocation55_spill] sm:$0xff]  ;;  %v2014_v25 = vsel %vm1988_vm4, %v1981_v33, %v6635_v37 }
 0x1a4   : > { %1506 = vrot.lane.b32.xlu1 %v6307_v30, %s5780_s12  ;;  %1508 = vrot.lane.b32.xlu0 %v9122_v48, %s5780_s12  ;;  %v1982_v63 = vsel %vm272_vm0, %v9132_v35, %v9131_v58  ;;  %v9139_v58 = vld [vmem:[#allocation10_spill] sm:$0xff]  ;;  %v9140_v35 = vld [vmem:[#allocation11_spill] sm:$0xff] }
 0x1a5   : > { %v2015_v27 = vsel %vm1988_vm4, %v1982_v63, %v6637_v39  ;;  %v9138_v39 = vld [vmem:[#allocation65_spill] sm:$0xff]  ;;  %v9141_v63 = vld [vmem:[#allocation62_spill] sm:$0xff] }
 0x1a6   : > { %v1267_v18 = vpop.permute.xlu1 %1266  ;;  %v1269_v20 = vpop.permute.xlu0 %1268 }
 0x1a7   : > { %v6794_v30 = vsel %vm2021_vm5, %v2012_v16, %v1267_v18  ;;  %v6797_v60 = vsel %vm2021_vm5, %v2013_v0, %v1269_v20  ;;  %v9136_v16 = vld [vmem:[#allocation64_spill] sm:$0xff]  ;;  %v9137_v0 = vld [vmem:[#allocation59_spill] sm:$0xff] }
 0x1a8   : > { %1510 = vrot.lane.b32.xlu1 %v9127_v23, %s5780_s12  ;;  %1512 = vrot.lane.b32.xlu0 %v9128_v10, %s5780_s12  ;;  %v1983_v37 = vsel %vm272_vm0, %v9136_v16, %v9135_v12  ;;  %v1984_v18 = vsel %vm272_vm0, %v9138_v39, %v9137_v0  ;;  %v9146_v0 = vld [vmem:[#allocation66_spill] sm:$0xff] }
 0x1a9   : > { %v2016_v20 = vsel %vm1988_vm4, %v1983_v37, %v6643_v41  ;;  %v2017_v23 = vsel %vm1988_vm4, %v1984_v18, %v6645_v43  ;;  %v2225_v37 = vld [vmem:[%s8992_s2 + $0x30] sm:$0x3f]  ;;  %v1987_v39 = vsel %vm272_vm0, %v6551_v38, %v9146_v0  ;;  %v9148_v38 = vld [vmem:[#allocation17_spill] sm:$0xff] }
 0x1aa   : > { %v1271_v48 = vpop.permute.xlu1 %1270  ;;  %v1273_v46 = vpop.permute.xlu0 %1272  ;;  %5073 = vmatprep.subr.msk.mxu0 %vm2330_vm6, %v2225_v37  ;;  %v2020_v18 = vsel %vm1988_vm4, %v1987_v39, %v6659_v49  ;;  %v9154_v0 = vld [vmem:[#allocation30_spill] sm:$0xff] }
 0x1ab   : > { %v6814_v42 = vsel %vm2021_vm5, %v2014_v25, %v1271_v48  ;;  %v6817_v1 = vsel %vm2021_vm5, %v2015_v27, %v1273_v46  ;;  %v9142_v25 = vld [vmem:[#allocation68_spill] sm:$0xff]  ;;  %v9143_v27 = vld [vmem:[#allocation63_spill] sm:$0xff]  ;;  %5074 = vmatpush3.msk.msra.mxu0 %vm2330_vm6, %v2225_v37 }
 0x1ac   : > { %1514 = vrot.lane.b32.xlu1 %v9133_v29, %s5780_s12  ;;  %1516 = vrot.lane.b32.xlu0 %v9134_v31, %s5780_s12  ;;  %v1985_v41 = vsel %vm272_vm0, %v9142_v25, %v9141_v63  ;;  %v1986_v43 = vsel %vm272_vm0, %v6541_v32, %v9143_v27  ;;  %v9144_v32 = vld [vmem:[#allocation12_spill] sm:$0xff]  ;;  %v2222_v63 = vld [vmem:[%s8992_s2 + $0x18] sm:$0xff]  ;;  %v2221_v27 = vld [vmem:[%s8992_s2 + $0x10] sm:$0xff] }
 0x1ad   : > { %v2018_v48 = vsel %vm1988_vm4, %v1985_v41, %v6651_v45  ;;  %v2019_v46 = vsel %vm1988_vm4, %v1986_v43, %v6653_v47  ;;  %v9145_v45 = vld [vmem:[#allocation13_spill] sm:$0xff]  ;;  %v9149_v25 = vld [vmem:[#allocation20_spill] sm:$0xff] }
 0x1ae   : > { %v1275_v10 = vpop.permute.xlu1 %1274  ;;  %v1277_v54 = vpop.permute.xlu0 %1276  ;;  %v2224_v47 = vld [vmem:[%s8992_s2 + $0x28] sm:$0xff] }
 0x1af   : > { %v6834_v56 = vsel %vm2021_vm5, %v2016_v20, %v1275_v10  ;;  %v6837_v33 = vsel %vm2021_vm5, %v2017_v23, %v1277_v54  ;;  %5075 = vmatprep.subr.mxu0 %v2224_v47  ;;  %v2223_v54 = vld [vmem:[%s8992_s2 + $0x20] sm:$0xff]  ;;  %v9150_v41 = vld [vmem:[#allocation21_spill] sm:$0xff] }
 0x1b0   : > { %1518 = vrot.lane.b32.xlu1 %v9139_v58, %s5780_s12  ;;  %1520 = vrot.lane.b32.xlu0 %v9140_v35, %s5780_s12  ;;  %v9147_v58 = vld [vmem:[#allocation16_spill] sm:$0xff] }
 0x1b1   : > { %5076 = vmatpush3.msra.mxu0 %v2224_v47  ;;  %v9153_v47 = vld [vmem:[#allocation27_spill] sm:$0xff] }
 0x1b2   : > { %v1279_v29 = vpop.permute.xlu1 %1278  ;;  %v1281_v31 = vpop.permute.xlu0 %1280  ;;  %5077 = vmatprep.subr.mxu0 %v2223_v54 }
 0x1b3   : > { %v6854_v12 = vsel %vm2021_vm5, %v2018_v48, %v1279_v29  ;;  %v6857_v16 = vsel %vm2021_vm5, %v2019_v46, %v1281_v31  ;;  %5078 = vmatpush3.msra.mxu0 %v2223_v54  ;;  %v6904_v46 = vld [vmem:[#allocation2 + $0x182] sm:$0xff]  ;;  %v869_v54 = vld [vmem:[#allocation2 + $0x39] sm:$0xff] }
 0x1b4   : > { %1522 = vrot.lane.b32.xlu1 %v9144_v32, %s5780_s12  ;;  %1524 = vrot.lane.b32.xlu0 %v9145_v45, %s5780_s12  ;;  %9151 = vst [vmem:[#allocation4_spill] sm:$0xff] %v6904_v46  ;;  %v2220_v29 = vld [vmem:[%s8992_s2 + $0x8] sm:$0xff]  ;;  %v9152_v31 = vld [vmem:[#allocation24_spill] sm:$0xff] }
 0x1b5   : > { %5079 = vmatprep.subr.mxu0 %v2222_v63  ;;  %v2219_v45 = vld [vmem:[%s8992_s2] sm:$0xff] }
 0x1b6   : > { %v1283_v20 = vpop.permute.xlu1 %1282  ;;  %v6874_v23 = vpop.permute.xlu0 %1348  ;;  %5080 = vmatpush3.msra.mxu0 %v2222_v63 }
 0x1b7   : > { %v6877_v10 = vsel %vm2021_vm5, %v2020_v18, %v1283_v20  ;;  %5081 = vmatprep.subr.mxu0 %v2221_v27  ;;  %v868_v20 = vld [vmem:[#allocation2 + $0x31] sm:$0xff] }
 0x1b8   : > { %1526 = vrot.lane.b32.xlu1 %v9147_v58, %s5780_s12  ;;  %1528 = vrot.lane.b32.xlu0 %v9148_v38, %s5780_s12  ;;  %v9155_v58 = vmov 0.0  }
 0x1b9   : > { %5082 = vmatpush3.msra.mxu0 %v2221_v27  ;;  %v9157_v27 = vld [vmem:[#allocation37_spill] sm:$0xff] }
 0x1ba   : > { %v6886_v49 = vpop.permute.xlu1 %1350  ;;  %v6888_v35 = vpop.permute.xlu0 %1352  ;;  %5083 = vmatprep.subr.mxu0 %v2220_v29 }
 0x1bb   : > { %5084 = vmatpush3.msra.mxu0 %v2220_v29  ;;  %v9158_v29 = vld [vmem:[#allocation43_spill] sm:$0xff] }
 0x1bc   : > { %1530 = vrot.lane.b32.xlu1 %v9149_v25, %s5780_s12  ;;  %1532 = vrot.lane.b32.xlu0 %v9150_v41, %s5780_s12  ;;  %v900_v25 = vld [vmem:[#allocation2 + $0x32] sm:$0xff]  ;;  %v901_v41 = vld [vmem:[#allocation2 + $0x3a] sm:$0xff] }
 0x1bd   : > { %5085 = vmatprep.subr.mxu0 %v2219_v45 }
 0x1be   : > { %v6900_v43 = vpop.permute.xlu1 %1354  ;;  %v6902_v48 = vpop.permute.xlu0 %1356  ;;  %5086 = vmatpush3.msra.mxu0 %v2219_v45 }
 0x1bf   : > { %4302 = vmatprep.subr.mxu0 %v9155_v58  ;;  %v9161_v58 = vld [vmem:[#allocation40_spill] sm:$0xff] }
 0x1c0   : > { %1534 = vrot.lane.b32.xlu1 %v9152_v31, %s5780_s12  ;;  %1536 = vrot.lane.b32.xlu0 %v6904_v46, %s5780_s12  ;;  %v1968_v31 = vsel %vm272_vm0, %v9158_v29, %v9157_v27  ;;  %v9162_v27 = vld [vmem:[#allocation46_spill] sm:$0xff] }
 0x1c1   : > { %v2001_v45 = vsel %vm1988_vm4, %v1968_v31, %v6581_v50  ;;  %v9165_v50 = vld [vmem:[#allocation31_spill] sm:$0xff]  ;;  %v9170_v46 = vld [vmem:[#allocation50_spill] sm:$0xff] }
 0x1c2   : > { %v6913_v37 = vpop.permute.xlu1 %1358  ;;  %v6915_v32 = vpop.permute.xlu0 %1360 }
 0x1c4   : > { %1604 = vrot.lane.b32.xlu1 %v9153_v47, %s5781_s29  ;;  %1606 = vrot.lane.b32.xlu0 %v9154_v0, %s5781_s29  ;;  %v2034_v47 = vsel %vm2021_vm5, %v2001_v45, %v6707_v52  ;;  %v9166_v52 = vld [vmem:[#allocation34_spill] sm:$0xff] }
 0x1c6   : > { %v6924_v39 = vpop.permute.xlu1 %1362  ;;  %v6926_v18 = vpop.permute.xlu0 %1364 }
 0x1c8   : > { %1732 = vrot.lane.b32.xlu1 %v868_v20, %s5782_s30  ;;  %1734 = vrot.lane.b32.xlu0 %v869_v54, %s5782_s30 }
 0x1ca   : > { %v6931_v38 = vpop.permute.xlu1 %1366  ;;  %v6933_v63 = vpop.permute.xlu0 %1368 }
 0x1cb   : > { %9156 = vst [vmem:[#allocation52_spill] sm:$0xff] %v6933_v63  ;;  %v1969_v63 = vsel %vm272_vm0, %v9162_v27, %v9161_v58 }
 0x1cc   : > { %1860 = vrot.lane.b32.xlu1 %v900_v25, %s5783_s8  ;;  %1862 = vrot.lane.b32.xlu0 %v901_v41, %s5783_s8  ;;  %v9163_v25 = vld [vmem:[#allocation41_spill] sm:$0xff]  ;;  %v2002_v31 = vsel %vm1988_vm4, %v1969_v63, %v6587_v13  ;;  %v9167_v13 = vld [vmem:[#allocation44_spill] sm:$0xff] }
 0x1cd   : > { %v1970_v41 = vsel %vm272_vm0, %v9164_v11, %v9163_v25  ;;  %v9168_v63 = vld [vmem:[#allocation49_spill] sm:$0xff] }
 0x1ce   : > { %v6944_v0 = vpop.permute.xlu1 %1370  ;;  %v1373_v20 = vpop.permute.xlu0 %1372  ;;  %v2003_v45 = vsel %vm1988_vm4, %v1970_v41, %v6589_v15  ;;  %v1971_v15 = vsel %vm272_vm0, %v9168_v63, %v9167_v13  ;;  %v9169_v41 = vld [vmem:[#allocation45_spill] sm:$0xff]  ;;  %v903_v13 = vld [vmem:[#allocation2 + $0x52] sm:$0xff] }
 0x1cf   : > { %9159 = vst [vmem:[#allocation56_spill] sm:$0xff] %v6944_v0  ;;  %v6947_v54 = vsel %vm2054_vm7, %v2034_v47, %v1373_v20  ;;  %v2035_v47 = vsel %vm2021_vm5, %v2002_v31, %v6713_v6  ;;  %v2036_v58 = vsel %vm2021_vm5, %v2003_v45, %v6715_v7  ;;  %v871_v0 = vld [vmem:[#allocation2 + $0x51] sm:$0xff]  ;;  %v1972_v6 = vsel %vm272_vm0, %v9170_v46, %v9169_v41 }
 0x1d0   : > { %9160 = vst [vmem:[#allocation53_spill] sm:$0xff] %v6947_v54  ;;  %1608 = vrot.lane.b32.xlu1 %v9165_v50, %s5781_s29  ;;  %1610 = vrot.lane.b32.xlu0 %v9166_v52, %s5781_s29  ;;  %v870_v52 = vld [vmem:[#allocation2 + $0x49] sm:$0xff]  ;;  %v2004_v7 = vsel %vm1988_vm4, %v1971_v15, %v6595_v17  ;;  %v2005_v31 = vsel %vm1988_vm4, %v1972_v6, %v6597_v19  ;;  %v9171_v17 = vld [vmem:[#allocation48_spill] sm:$0xff]  ;;  %v9172_v15 = vld [vmem:[#allocation51_spill] sm:$0xff] }
 0x1d1   : > { %v2037_v45 = vsel %vm2021_vm5, %v2004_v7, %v6721_v8  ;;  %v1973_v19 = vsel %vm272_vm0, %v9172_v15, %v9171_v17 }
 0x1d2   : > { %v1375_v20 = vpop.permute.xlu1 %1374  ;;  %v1377_v25 = vpop.permute.xlu0 %1376  ;;  %v2006_v8 = vsel %vm1988_vm4, %v1973_v19, %v6603_v21 }
 0x1d3   : > { %v6968_v54 = vsel %vm2054_vm7, %v2035_v47, %v1375_v20  ;;  %v6971_v50 = vsel %vm2054_vm7, %v2036_v58, %v1377_v25  ;;  %v2038_v47 = vsel %vm2021_vm5, %v2005_v31, %v6723_v9  ;;  %v2039_v9 = vsel %vm2021_vm5, %v2006_v8, %v6734_v14  ;;  %v904_v8 = vld [vmem:[#allocation2 + $0x62] sm:$0xff] }
 0x1d4   : > { %1736 = vrot.lane.b32.xlu1 %v870_v52, %s5782_s30  ;;  %1738 = vrot.lane.b32.xlu0 %v871_v0, %s5782_s30  ;;  %v902_v0 = vld [vmem:[#allocation2 + $0x4a] sm:$0xff] }
 0x1d6   : > { %v1379_v58 = vpop.permute.xlu1 %1378  ;;  %v1381_v20 = vpop.permute.xlu0 %1380 }
 0x1d7   : > { %v6990_v25 = vsel %vm2054_vm7, %v2037_v45, %v1379_v58  ;;  %v6993_v52 = vsel %vm2054_vm7, %v2038_v47, %v1381_v20  ;;  %v9173_v45 = vld [vmem:[#allocation35_spill] sm:$0xff]  ;;  %v9174_v47 = vld [vmem:[#allocation38_spill] sm:$0xff] }
 0x1d8   : > { %1864 = vrot.lane.b32.xlu1 %v902_v0, %s5783_s8  ;;  %1866 = vrot.lane.b32.xlu0 %v903_v13, %s5783_s8  ;;  %v872_v0 = vld [vmem:[#allocation2 + $0x61] sm:$0xff]  ;;  %v873_v13 = vld [vmem:[#allocation2 + $0x69] sm:$0xff] }
 0x1da   : > { %v1383_v41 = vpop.permute.xlu1 %1382  ;;  %v1385_v6 = vpop.permute.xlu0 %1384 }
 0x1db   : > { %v7005_v7 = vsel %vm2054_vm7, %v2039_v9, %v1383_v41  ;;  %v7009_v31 = vsel %vm2054_vm7, %v6737_v5, %v1385_v6  ;;  %v905_v9 = vld [vmem:[#allocation2 + $0x6a] sm:$0xff] }
 0x1dc   : > { %1612 = vrot.lane.b32.xlu1 %v9173_v45, %s5781_s29  ;;  %1614 = vrot.lane.b32.xlu0 %v9174_v47, %s5781_s29  ;;  %v9181_v45 = vld [vmem:[#allocation39_spill] sm:$0xff] }
 0x1de   : > { %v1387_v58 = vpop.permute.xlu1 %1386  ;;  %v1389_v21 = vpop.permute.xlu0 %1388 }
 0x1df   : > { %v7017_v14 = vsel %vm2054_vm7, %v6754_v22, %v1387_v58  ;;  %v7021_v20 = vsel %vm2054_vm7, %v6757_v24, %v1389_v21 }
 0x1e0   : > { %9175 = vst [vmem:[#allocation57_spill] sm:$0xff] %v7017_v14  ;;  %9176 = vst [vmem:[#allocation5_spill] sm:$0xff] %v7021_v20  ;;  %1740 = vrot.lane.b32.xlu1 %v872_v0, %s5782_s30  ;;  %1742 = vrot.lane.b32.xlu0 %v873_v13, %s5782_s30  ;;  %v874_v0 = vld [vmem:[#allocation2 + $0x79] sm:$0xff]  ;;  %v875_v13 = vld [vmem:[#allocation2 + $0x81] sm:$0xff] }
 0x1e1   : > { %v919_v14 = vld [vmem:[#allocation2 + $0x112] sm:$0xff] }
 0x1e2   : > { %v1391_v5 = vpop.permute.xlu1 %1390  ;;  %v1393_v17 = vpop.permute.xlu0 %1392 }
 0x1e3   : > { %v7027_v19 = vsel %vm2054_vm7, %v6774_v26, %v1391_v5  ;;  %v7031_v22 = vsel %vm2054_vm7, %v6777_v28, %v1393_v17  ;;  %v9182_v28 = vld [vmem:[#allocation42_spill] sm:$0xff] }
 0x1e4   : > { %9177 = vst [vmem:[#allocation6_spill] sm:$0xff] %v7027_v19  ;;  %9178 = vst [vmem:[#allocation54_spill] sm:$0xff] %v7031_v22  ;;  %1868 = vrot.lane.b32.xlu1 %v904_v8, %s5783_s8  ;;  %1870 = vrot.lane.b32.xlu0 %v905_v9, %s5783_s8  ;;  %v906_v8 = vld [vmem:[#allocation2 + $0x7a] sm:$0xff]  ;;  %v907_v9 = vld [vmem:[#allocation2 + $0x82] sm:$0xff] }
 0x1e5   : > { %v885_v22 = vld [vmem:[#allocation2 + $0xf9] sm:$0xff] }
 0x1e6   : > { %v1395_v24 = vpop.permute.xlu1 %1394  ;;  %v1397_v41 = vpop.permute.xlu0 %1396  ;;  %v917_v19 = vld [vmem:[#allocation2 + $0xfa] sm:$0xff] }
 0x1e7   : > { %v7037_v6 = vsel %vm2054_vm7, %v6794_v30, %v1395_v24  ;;  %v7041_v26 = vsel %vm2054_vm7, %v6797_v60, %v1397_v41 }
 0x1e8   : > { %9179 = vst [vmem:[#allocation60_spill] sm:$0xff] %v7037_v6  ;;  %9180 = vst [vmem:[#allocation55_spill] sm:$0xff] %v7041_v26  ;;  %1616 = vrot.lane.b32.xlu1 %v9181_v45, %s5781_s29  ;;  %1618 = vrot.lane.b32.xlu0 %v9182_v28, %s5781_s29  ;;  %v853_v26 = vld [vmem:[#allocation2 + $0xf8] sm:$0xff] }
 0x1e9   : > { %v884_v6 = vld [vmem:[#allocation2 + $0xf1] sm:$0xff] }
 0x1ea   : > { %v1399_v47 = vpop.permute.xlu1 %1398  ;;  %v1401_v58 = vpop.permute.xlu0 %1400 }
 0x1eb   : > { %v7049_v21 = vsel %vm2054_vm7, %v6814_v42, %v1399_v47  ;;  %v7053_v30 = vsel %vm2054_vm7, %v6817_v1, %v1401_v58  ;;  %v876_v47 = vld [vmem:[#allocation2 + $0x91] sm:$0xff] }
 0x1ec   : > { %9183 = vst [vmem:[#allocation61_spill] sm:$0xff] %v7049_v21  ;;  %9184 = vst [vmem:[#allocation7_spill] sm:$0xff] %v7053_v30  ;;  %1744 = vrot.lane.b32.xlu1 %v874_v0, %s5782_s30  ;;  %1746 = vrot.lane.b32.xlu0 %v875_v13, %s5782_s30  ;;  %v909_v0 = vld [vmem:[#allocation2 + $0x9a] sm:$0xff]  ;;  %v915_v30 = vld [vmem:[#allocation2 + $0xe2] sm:$0xff] }
 0x1ed   : > { %v852_v21 = vld [vmem:[#allocation2 + $0xf0] sm:$0xff] }
 0x1ee   : > { %v1403_v60 = vpop.permute.xlu1 %1402  ;;  %v1405_v5 = vpop.permute.xlu0 %1404 }
 0x1ef   : > { %v7059_v17 = vsel %vm2054_vm7, %v6834_v56, %v1403_v60  ;;  %v7063_v42 = vsel %vm2054_vm7, %v6837_v33, %v1405_v5  ;;  %v878_v5 = vld [vmem:[#allocation2 + $0xa9] sm:$0xff] }
 0x1f0   : > { %9185 = vst [vmem:[#allocation8_spill] sm:$0xff] %v7059_v17  ;;  %9186 = vst [vmem:[#allocation58_spill] sm:$0xff] %v7063_v42  ;;  %1872 = vrot.lane.b32.xlu1 %v906_v8, %s5783_s8  ;;  %1874 = vrot.lane.b32.xlu0 %v907_v9, %s5783_s8  ;;  %v879_v8 = vld [vmem:[#allocation2 + $0xb1] sm:$0xff]  ;;  %v883_v42 = vld [vmem:[#allocation2 + $0xe1] sm:$0xff] }
 0x1f1   : > { %v914_v17 = vld [vmem:[#allocation2 + $0xda] sm:$0xff] }
 0x1f2   : > { %v1407_v1 = vpop.permute.xlu1 %1406  ;;  %v1409_v24 = vpop.permute.xlu0 %1408 }
 0x1f3   : > { %v7069_v41 = vsel %vm2054_vm7, %v6854_v12, %v1407_v1  ;;  %v7073_v56 = vsel %vm2054_vm7, %v6857_v16, %v1409_v24  ;;  %v877_v12 = vld [vmem:[#allocation2 + $0x99] sm:$0xff]  ;;  %v910_v24 = vld [vmem:[#allocation2 + $0xaa] sm:$0xff] }
 0x1f4   : > { %9187 = vst [vmem:[#allocation64_spill] sm:$0xff] %v7069_v41  ;;  %9188 = vst [vmem:[#allocation59_spill] sm:$0xff] %v7073_v56  ;;  %1620 = vrot.lane.b32.xlu1 %v9158_v29, %s5781_s29  ;;  %1622 = vrot.lane.b32.xlu0 %v9162_v27, %s5781_s29  ;;  %v908_v29 = vld [vmem:[#allocation2 + $0x92] sm:$0xff]  ;;  %v851_v56 = vld [vmem:[#allocation2 + $0xe0] sm:$0xff] }
 0x1f5   : > { %v882_v41 = vld [vmem:[#allocation2 + $0xd9] sm:$0xff] }
 0x1f6   : > { %v1411_v33 = vpop.permute.xlu1 %1410  ;;  %v7079_v45 = vpop.permute.xlu0 %1476 }
 0x1f7   : > { %v7083_v28 = vsel %vm2054_vm7, %v6877_v10, %v1411_v33  ;;  %v911_v33 = vld [vmem:[#allocation2 + $0xb2] sm:$0xff] }
 0x1f8   : > { %9189 = vst [vmem:[#allocation65_spill] sm:$0xff] %v7083_v28  ;;  %1748 = vrot.lane.b32.xlu1 %v876_v47, %s5782_s30  ;;  %1750 = vrot.lane.b32.xlu0 %v877_v12, %s5782_s30  ;;  %v850_v28 = vld [vmem:[#allocation2 + $0xd8] sm:$0xff] }
 0x1fa   : > { %v7087_v16 = vpop.permute.xlu1 %1478  ;;  %v7089_v58 = vpop.permute.xlu0 %1480 }
 0x1fc   : > { %1876 = vrot.lane.b32.xlu1 %v908_v29, %s5783_s8  ;;  %1878 = vrot.lane.b32.xlu0 %v909_v0, %s5783_s8  ;;  %v880_v29 = vld [vmem:[#allocation2 + $0xc1] sm:$0xff]  ;;  %v881_v0 = vld [vmem:[#allocation2 + $0xc9] sm:$0xff] }
 0x1fe   : > { %v7093_v27 = vpop.permute.xlu1 %1482  ;;  %v7095_v10 = vpop.permute.xlu0 %1484 }
 0x200   : > { %1624 = vrot.lane.b32.xlu1 %v9164_v11, %s5781_s29  ;;  %1626 = vrot.lane.b32.xlu0 %v9168_v63, %s5781_s29 }
 0x202   : > { %v7101_v13 = vpop.permute.xlu1 %1486  ;;  %v7103_v60 = vpop.permute.xlu0 %1488 }
 0x204   : > { %1752 = vrot.lane.b32.xlu1 %v878_v5, %s5782_s30  ;;  %1754 = vrot.lane.b32.xlu0 %v879_v8, %s5782_s30 }
 0x206   : > { %v7107_v9 = vpop.permute.xlu1 %1490  ;;  %v7109_v1 = vpop.permute.xlu0 %1492 }
 0x208   : > { %1880 = vrot.lane.b32.xlu1 %v910_v24, %s5783_s8  ;;  %1882 = vrot.lane.b32.xlu0 %v911_v33, %s5783_s8  ;;  %v912_v24 = vld [vmem:[#allocation2 + $0xc2] sm:$0xff]  ;;  %v913_v33 = vld [vmem:[#allocation2 + $0xca] sm:$0xff] }
 0x20a   : > { %v7113_v11 = vpop.permute.xlu1 %1494  ;;  %v7115_v63 = vpop.permute.xlu0 %1496 }
 0x20c   : > { %1628 = vrot.lane.b32.xlu1 %v9170_v46, %s5781_s29  ;;  %1630 = vrot.lane.b32.xlu0 %v9172_v15, %s5781_s29 }
 0x20e   : > { %v7121_v47 = vpop.permute.xlu1 %1498  ;;  %v7123_v12 = vpop.permute.xlu0 %1500 }
 0x210   : > { %1756 = vrot.lane.b32.xlu1 %v880_v29, %s5782_s30  ;;  %1758 = vrot.lane.b32.xlu0 %v881_v0, %s5782_s30 }
 0x212   : > { %v7127_v5 = vpop.permute.xlu1 %1502  ;;  %v7129_v8 = vpop.permute.xlu0 %1504 }
 0x214   : > { %1884 = vrot.lane.b32.xlu1 %v912_v24, %s5783_s8  ;;  %1886 = vrot.lane.b32.xlu0 %v913_v33, %s5783_s8 }
 0x216   : > { %v7133_v46 = vpop.permute.xlu1 %1506  ;;  %v7135_v15 = vpop.permute.xlu0 %1508 }
 0x218   : > { %1632 = vrot.lane.b32.xlu1 %v850_v28, %s5781_s29  ;;  %1634 = vrot.lane.b32.xlu0 %v851_v56, %s5781_s29 }
 0x21a   : > { %v7139_v29 = vpop.permute.xlu1 %1510  ;;  %v7141_v0 = vpop.permute.xlu0 %1512 }
 0x21c   : > { %1760 = vrot.lane.b32.xlu1 %v882_v41, %s5782_s30  ;;  %1762 = vrot.lane.b32.xlu0 %v883_v42, %s5782_s30 }
 0x21e   : > { %v7145_v24 = vpop.permute.xlu1 %1514  ;;  %v7147_v33 = vpop.permute.xlu0 %1516 }
 0x21f   : > { %9190 = vst [vmem:[#allocation10_spill] sm:$0xff] %v7147_v33  ;;  %v918_v33 = vld [vmem:[#allocation2 + $0x10a] sm:$0xff] }
 0x220   : > { %1888 = vrot.lane.b32.xlu1 %v914_v17, %s5783_s8  ;;  %1890 = vrot.lane.b32.xlu0 %v915_v30, %s5783_s8 }
 0x222   : > { %v7151_v56 = vpop.permute.xlu1 %1518  ;;  %v7153_v28 = vpop.permute.xlu0 %1520 }
 0x223   : > { %9191 = vst [vmem:[#allocation11_spill] sm:$0xff] %v7151_v56  ;;  %9192 = vst [vmem:[#allocation62_spill] sm:$0xff] %v7153_v28  ;;  %v916_v28 = vld [vmem:[#allocation2 + $0xf2] sm:$0xff]  ;;  %v886_v56 = vld [vmem:[#allocation2 + $0x109] sm:$0xff] }
 0x224   : > { %1636 = vrot.lane.b32.xlu1 %v852_v21, %s5781_s29  ;;  %1638 = vrot.lane.b32.xlu0 %v853_v26, %s5781_s29 }
 0x226   : > { %v7157_v42 = vpop.permute.xlu1 %1522  ;;  %v7159_v41 = vpop.permute.xlu0 %1524 }
 0x227   : > { %9193 = vst [vmem:[#allocation68_spill] sm:$0xff] %v7157_v42  ;;  %9194 = vst [vmem:[#allocation63_spill] sm:$0xff] %v7159_v41  ;;  %v854_v41 = vld [vmem:[#allocation2 + $0x108] sm:$0xff]  ;;  %v855_v42 = vld [vmem:[#allocation2 + $0x110] sm:$0xff] }
 0x228   : > { %1764 = vrot.lane.b32.xlu1 %v884_v6, %s5782_s30  ;;  %1766 = vrot.lane.b32.xlu0 %v885_v22, %s5782_s30  ;;  %v643_v22 = vld [vmem:[#allocation2] sm:$0xff] }
 0x22a   : > { %v7163_v30 = vpop.permute.xlu1 %1526  ;;  %v7165_v17 = vpop.permute.xlu0 %1528 }
 0x22b   : > { %9195 = vst [vmem:[#allocation12_spill] sm:$0xff] %v7163_v30  ;;  %9196 = vst [vmem:[#allocation13_spill] sm:$0xff] %v7165_v17  ;;  %v644_v30 = vld [vmem:[#allocation2 + $0x8] sm:$0xff] }
 0x22c   : > { %1892 = vrot.lane.b32.xlu1 %v916_v28, %s5783_s8  ;;  %1894 = vrot.lane.b32.xlu0 %v917_v19, %s5783_s8  ;;  %v887_v28 = vld [vmem:[#allocation2 + $0x111] sm:$0xff]  ;;  %v9201_v19 = vld [vmem:[#allocation9_spill] sm:$0xff] }
 0x22e   : > { %v7169_v26 = vpop.permute.xlu1 %1530  ;;  %v7171_v21 = vpop.permute.xlu0 %1532 }
 0x22f   : > { %9197 = vst [vmem:[#allocation66_spill] sm:$0xff] %v7169_v26  ;;  %9198 = vst [vmem:[#allocation16_spill] sm:$0xff] %v7171_v21  ;;  %v1956_v21 = vsel %vm272_vm0, %v643_v22, %v9201_v19  ;;  %v9202_v26 = vld [vmem:[#allocation14_spill] sm:$0xff] }
 0x230   : > { %1640 = vrot.lane.b32.xlu1 %v854_v41, %s5781_s29  ;;  %1642 = vrot.lane.b32.xlu0 %v855_v42, %s5781_s29  ;;  %v1957_v41 = vsel %vm272_vm0, %v644_v30, %v9202_v26 }
 0x232   : > { %v7175_v6 = vpop.permute.xlu1 %1534  ;;  %v7177_v17 = vpop.permute.xlu0 %1536 }
 0x233   : > { %9199 = vst [vmem:[#allocation17_spill] sm:$0xff] %v7175_v6  ;;  %9200 = vst [vmem:[#allocation20_spill] sm:$0xff] %v7177_v17  ;;  %v9203_v17 = vld [vmem:[#allocation15_spill] sm:$0xff] }
 0x234   : > { %1768 = vrot.lane.b32.xlu1 %v886_v56, %s5782_s30  ;;  %1770 = vrot.lane.b32.xlu0 %v887_v28, %s5782_s30  ;;  %v1989_v6 = vsel %vm1988_vm4, %v1956_v21, %v9203_v17  ;;  %v9204_v56 = vld [vmem:[#allocation18_spill] sm:$0xff]  ;;  %v856_v17 = vld [vmem:[#allocation2 + $0x120] sm:$0xff]  ;;  %v857_v21 = vld [vmem:[#allocation2 + $0x128] sm:$0xff] }
 0x235   : > { %v1990_v28 = vsel %vm1988_vm4, %v1957_v41, %v9204_v56  ;;  %v2022_v22 = vsel %vm2021_vm5, %v1989_v6, %v6661_v51 }
 0x236   : > { %v1605_v20 = vpop.permute.xlu1 %1604  ;;  %v1607_v42 = vpop.permute.xlu0 %1606  ;;  %v2023_v30 = vsel %vm2021_vm5, %v1990_v28, %v6667_v53 }
 0x238   : > { %1896 = vrot.lane.b32.xlu1 %v918_v33, %s5783_s8  ;;  %1898 = vrot.lane.b32.xlu0 %v919_v14, %s5783_s8  ;;  %v2055_v33 = vsel %vm2054_vm7, %v2022_v22, %v6874_v23  ;;  %v2056_v14 = vsel %vm2054_vm7, %v2023_v30, %v6886_v49  ;;  %v888_v22 = vld [vmem:[#allocation2 + $0x121] sm:$0xff] }
 0x239   : > { %v2088_v41 = vsel %vm2087_vm8, %v2055_v33, %v7079_v45  ;;  %v2089_v51 = vsel %vm2087_vm8, %v2056_v14, %v7087_v16  ;;  %v889_v16 = vld [vmem:[#allocation2 + $0x129] sm:$0xff]  ;;  %v5756_v33 = vld [vmem:[#allocation2 + $0x18] sm:$0xff] }
 0x23a   : > { %v1733_v26 = vpop.permute.xlu1 %1732  ;;  %v1735_v19 = vpop.permute.xlu0 %1734  ;;  %v2121_v53 = vsel %vm2120_vm9, %v2088_v41, %v1605_v20  ;;  %v2122_v23 = vsel %vm2120_vm9, %v2089_v51, %v1607_v42  ;;  %v9205_v14 = vld [vmem:[#allocation19_spill] sm:$0xff]  ;;  %v9206_v41 = vld [vmem:[#allocation22_spill] sm:$0xff] }
 0x23b   : > { %v2154_v49 = vsel %vm2153_vm10, %v2121_v53, %v1733_v26  ;;  %v2155_v6 = vsel %vm2153_vm10, %v2122_v23, %v1735_v19  ;;  %v920_v26 = vld [vmem:[#allocation2 + $0x122] sm:$0xff]  ;;  %v921_v19 = vld [vmem:[#allocation2 + $0x12a] sm:$0xff]  ;;  %v9207_v53 = vld [vmem:[#allocation67_spill] sm:$0xff] }
 0x23c   : > { %1644 = vrot.lane.b32.xlu1 %v856_v17, %s5781_s29  ;;  %1646 = vrot.lane.b32.xlu0 %v857_v21, %s5781_s29  ;;  %v1958_v17 = vsel %vm272_vm0, %v5756_v33, %v9205_v14  ;;  %v5757_v21 = vld [vmem:[#allocation2 + $0x20] sm:$0xff] }
 0x23d   : > { %v1959_v51 = vsel %vm272_vm0, %v5757_v21, %v9206_v41  ;;  %v1991_v23 = vsel %vm1988_vm4, %v1958_v17, %v9207_v53  ;;  %v922_v53 = vld [vmem:[#allocation2 + $0x13a] sm:$0xff] }
 0x23e   : > { %v1861_v56 = vpop.permute.xlu1 %1860  ;;  %v1863_v28 = vpop.permute.xlu0 %1862 }
 0x23f   : > { %v2188_v45 = vsel %vm2186_vm11, %v2155_v6, %v1863_v28  ;;  %v2187_v30 = vsel %vm2186_vm11, %v2154_v49, %v1861_v56  ;;  %v9208_v49 = vld [vmem:[#allocation69_spill] sm:$0xff]  ;;  %v2024_v56 = vsel %vm2021_vm5, %v1991_v23, %v6669_v55 }
 0x240   : > { %1772 = vrot.lane.b32.xlu1 %v888_v22, %s5782_s30  ;;  %1774 = vrot.lane.b32.xlu0 %v889_v16, %s5782_s30  ;;  %v1992_v6 = vsel %vm1988_vm4, %v1959_v51, %v9208_v49  ;;  %v2057_v16 = vsel %vm2054_vm7, %v2024_v56, %v6888_v35  ;;  %v890_v51 = vld [vmem:[#allocation2 + $0x139] sm:$0xff]  ;;  %v923_v23 = vld [vmem:[#allocation2 + $0x142] sm:$0xff]  ;;  %v5758_v49 = vld [vmem:[#allocation2 + $0x30] sm:$0xff] }
 0x241   : > { %5087 = vmatprep.mubr.msk.f32.mxu0 %vm2233_vm12, %v2187_v30  ;;  %v2025_v28 = vsel %vm2021_vm5, %v1992_v6, %v6675_v57  ;;  %v2090_v33 = vsel %vm2087_vm8, %v2057_v16, %v7089_v58  ;;  %v9209_v6 = vld [vmem:[#allocation23_spill] sm:$0xff]  ;;  %v9211_v16 = vld [vmem:[#allocation70_spill] sm:$0xff] }
 0x242   : > { %5088 = vmatmul.mubr.msk.f32.vlgmr.msra.gmra.mxu0 %vm2233_vm12, %v2188_v45  ;;  %v1609_v20 = vpop.permute.xlu1 %1608  ;;  %v1611_v42 = vpop.permute.xlu0 %1610  ;;  %v2058_v30 = vsel %vm2054_vm7, %v2025_v28, %v6900_v43  ;;  %v1960_v56 = vsel %vm272_vm0, %v5758_v49, %v9209_v6  ;;  %v5759_v28 = vld [vmem:[#allocation2 + $0x38] sm:$0xff]  ;;  %v5760_v49 = vld [vmem:[#allocation2 + $0x48] sm:$0xff]  ;;  %v9212_v6 = vld [vmem:[#allocation26_spill] sm:$0xff] }
 0x243   : > { %v2091_v14 = vsel %vm2087_vm8, %v2058_v30, %v7093_v27  ;;  %v2123_v55 = vsel %vm2120_vm9, %v2090_v33, %v1609_v20  ;;  %v891_v27 = vld [vmem:[#allocation2 + $0x141] sm:$0xff]  ;;  %v1993_v30 = vsel %vm1988_vm4, %v1960_v56, %v9211_v16  ;;  %v1962_v56 = vsel %vm272_vm0, %v5760_v49, %v9212_v6  ;;  %v9214_v16 = vld [vmem:[#allocation71_spill] sm:$0xff] }
 0x244   : > { %1900 = vrot.lane.b32.xlu1 %v920_v26, %s5783_s8  ;;  %1902 = vrot.lane.b32.xlu0 %v921_v19, %s5783_s8  ;;  %v858_v26 = vld [vmem:[#allocation2 + $0x138] sm:$0xff]  ;;  %v859_v19 = vld [vmem:[#allocation2 + $0x140] sm:$0xff]  ;;  %v2124_v57 = vsel %vm2120_vm9, %v2091_v14, %v1611_v42 }
 0x246   : > { %v1737_v45 = vpop.permute.xlu1 %1736  ;;  %v1739_v22 = vpop.permute.xlu0 %1738 }
 0x247   : > { %v2156_v35 = vsel %vm2153_vm10, %v2123_v55, %v1737_v45  ;;  %v2157_v43 = vsel %vm2153_vm10, %v2124_v57, %v1739_v22  ;;  %v9210_v45 = vld [vmem:[#allocation25_spill] sm:$0xff] }
 0x248   : > { %1648 = vrot.lane.b32.xlu1 %v858_v26, %s5781_s29  ;;  %1650 = vrot.lane.b32.xlu0 %v859_v19, %s5781_s29  ;;  %v1961_v22 = vsel %vm272_vm0, %v5759_v28, %v9210_v45  ;;  %v2026_v19 = vsel %vm2021_vm5, %v1993_v30, %v6677_v59  ;;  %v5761_v28 = vld [vmem:[#allocation2 + $0x50] sm:$0xff]  ;;  %v9213_v45 = vld [vmem:[#allocation28_spill] sm:$0xff]  ;;  %v1995_v30 = vsel %vm1988_vm4, %v1962_v56, %v9214_v16 }
 0x249   : > { %v1994_v26 = vsel %vm1988_vm4, %v1961_v22, %v6556_v34  ;;  %v2059_v57 = vsel %vm2054_vm7, %v2026_v19, %v6902_v48  ;;  %v1963_v22 = vsel %vm272_vm0, %v5761_v28, %v9213_v45  ;;  %v2028_v19 = vsel %vm2021_vm5, %v1995_v30, %v6684_v62  ;;  %v864_v30 = vld [vmem:[#allocation2 + $0x180] sm:$0xff] }
 0x24a   : > { %v1865_v17 = vpop.permute.xlu1 %1864  ;;  %v1867_v21 = vpop.permute.xlu0 %1866  ;;  %v2027_v33 = vsel %vm2021_vm5, %v1994_v26, %v6682_v61  ;;  %v1996_v26 = vsel %vm1988_vm4, %v1963_v22, %v6563_v40 }
 0x24b   : > { %v2189_v41 = vsel %vm2186_vm11, %v2156_v35, %v1865_v17  ;;  %v2190_v58 = vsel %vm2186_vm11, %v2157_v43, %v1867_v21  ;;  %v2060_v35 = vsel %vm2054_vm7, %v2027_v33, %v6913_v37  ;;  %v860_v43 = vld [vmem:[#allocation2 + $0x150] sm:$0xff]  ;;  %v861_v17 = vld [vmem:[#allocation2 + $0x158] sm:$0xff]  ;;  %v2092_v21 = vsel %vm2087_vm8, %v2059_v57, %v7095_v10 }
 0x24c   : > { %1776 = vrot.lane.b32.xlu1 %v890_v51, %s5782_s30  ;;  %1778 = vrot.lane.b32.xlu0 %v891_v27, %s5782_s30  ;;  %v2093_v34 = vsel %vm2087_vm8, %v2060_v35, %v7101_v13  ;;  %v892_v27 = vld [vmem:[#allocation2 + $0x151] sm:$0xff]  ;;  %v893_v13 = vld [vmem:[#allocation2 + $0x159] sm:$0xff]  ;;  %v2029_v33 = vsel %vm2021_vm5, %v1996_v26, %v6689_v2  ;;  %v2061_v57 = vsel %vm2054_vm7, %v2028_v19, %v6915_v32  ;;  %v865_v26 = vld [vmem:[#allocation2 + $0x188] sm:$0xff] }
 0x24d   : > { %5090 = vmatprep.mubr.msk.f32.mxu0 %vm2233_vm12, %v2189_v41  ;;  %v2062_v35 = vsel %vm2054_vm7, %v2029_v33, %v6924_v39 }
 0x24e   : > { %5091 = vmatmul.mubr.msk.f32.gmra.mxu0 %vm2233_vm12, %v2190_v58  ;;  %v1613_v20 = vpop.permute.xlu1 %1612  ;;  %v1615_v42 = vpop.permute.xlu0 %1614  ;;  %v2095_v40 = vsel %vm2087_vm8, %v2062_v35, %v7107_v9  ;;  %v895_v9 = vld [vmem:[#allocation2 + $0x171] sm:$0xff] }
 0x24f   : > { %v2125_v59 = vsel %vm2120_vm9, %v2092_v21, %v1613_v20  ;;  %v2126_v61 = vsel %vm2120_vm9, %v2093_v34, %v1615_v42  ;;  %v2094_v21 = vsel %vm2087_vm8, %v2061_v57, %v7103_v60 }
 0x250   : > { %1904 = vrot.lane.b32.xlu1 %v922_v53, %s5783_s8  ;;  %1906 = vrot.lane.b32.xlu0 %v923_v23, %s5783_s8  ;;  %v924_v53 = vld [vmem:[#allocation2 + $0x152] sm:$0xff]  ;;  %v925_v23 = vld [vmem:[#allocation2 + $0x15a] sm:$0xff] }
 0x252   : > { %v1741_v14 = vpop.permute.xlu1 %1740  ;;  %v1743_v55 = vpop.permute.xlu0 %1742 }
 0x253   : > { %v2158_v48 = vsel %vm2153_vm10, %v2125_v59, %v1741_v14  ;;  %v2159_v37 = vsel %vm2153_vm10, %v2126_v61, %v1743_v55 }
 0x254   : > { %1652 = vrot.lane.b32.xlu1 %v860_v43, %s5781_s29  ;;  %1654 = vrot.lane.b32.xlu0 %v861_v17, %s5781_s29  ;;  %v862_v43 = vld [vmem:[#allocation2 + $0x168] sm:$0xff]  ;;  %v863_v17 = vld [vmem:[#allocation2 + $0x170] sm:$0xff] }
 0x256   : > { %v1869_v41 = vpop.permute.xlu1 %1868  ;;  %v1871_v58 = vpop.permute.xlu0 %1870 }
 0x257   : > { %v2191_v51 = vsel %vm2186_vm11, %v2158_v48, %v1869_v41  ;;  %v2192_v10 = vsel %vm2186_vm11, %v2159_v37, %v1871_v58  ;;  %v894_v48 = vld [vmem:[#allocation2 + $0x169] sm:$0xff] }
 0x258   : > { %1780 = vrot.lane.b32.xlu1 %v892_v27, %s5782_s30  ;;  %1782 = vrot.lane.b32.xlu0 %v893_v13, %s5782_s30  ;;  %v926_v58 = vld [vmem:[#allocation2 + $0x16a] sm:$0xff] }
 0x259   : > { %5093 = vmatprep.mubr.msk.f32.mxu0 %vm2233_vm12, %v2191_v51  ;;  %v927_v51 = vld [vmem:[#allocation2 + $0x172] sm:$0xff]  ;;  %v9215_v27 = vld [vmem:[#allocation29_spill] sm:$0xff] }
 0x25a   : > { %5094 = vmatmul.mubr.msk.f32.gmra.mxu0 %vm2233_vm12, %v2192_v10  ;;  %v1617_v20 = vpop.permute.xlu1 %1616  ;;  %v1619_v42 = vpop.permute.xlu0 %1618  ;;  %v5762_v10 = vld [vmem:[#allocation2 + $0x60] sm:$0xff] }
 0x25b   : > { %v2127_v62 = vsel %vm2120_vm9, %v2094_v21, %v1617_v20  ;;  %v2128_v2 = vsel %vm2120_vm9, %v2095_v40, %v1619_v42  ;;  %v1964_v13 = vsel %vm272_vm0, %v5762_v10, %v9215_v27  ;;  %v5763_v20 = vld [vmem:[#allocation2 + $0x68] sm:$0xff]  ;;  %v9216_v42 = vld [vmem:[#allocation32_spill] sm:$0xff] }
 0x25c   : > { %1908 = vrot.lane.b32.xlu1 %v924_v53, %s5783_s8  ;;  %1910 = vrot.lane.b32.xlu0 %v925_v23, %s5783_s8  ;;  %v1965_v53 = vsel %vm272_vm0, %v5763_v20, %v9216_v42  ;;  %v1997_v23 = vsel %vm1988_vm4, %v1964_v13, %v6565_v44  ;;  %v9217_v21 = vld [vmem:[#allocation33_spill] sm:$0xff]  ;;  %v9224_v27 = vld [vmem:[#allocation52_spill] sm:$0xff] }
 0x25d   : > { %v1998_v49 = vsel %vm1988_vm4, %v1965_v53, %v6571_v36  ;;  %v2030_v6 = vsel %vm2021_vm5, %v1997_v23, %v6691_v3  ;;  %v9225_v20 = vld [vmem:[#allocation56_spill] sm:$0xff] }
 0x25e   : > { %v1745_v14 = vpop.permute.xlu1 %1744  ;;  %v1747_v55 = vpop.permute.xlu0 %1746  ;;  %v2031_v56 = vsel %vm2021_vm5, %v1998_v49, %v6697_v4  ;;  %v2063_v22 = vsel %vm2054_vm7, %v2030_v6, %v6926_v18 }
 0x25f   : > { %v2160_v32 = vsel %vm2153_vm10, %v2127_v62, %v1745_v14  ;;  %v2161_v39 = vsel %vm2153_vm10, %v2128_v2, %v1747_v55  ;;  %v2064_v16 = vsel %vm2054_vm7, %v2031_v56, %v6931_v38  ;;  %v2096_v44 = vsel %vm2087_vm8, %v2063_v22, %v7109_v1  ;;  %v896_v55 = vld [vmem:[#allocation2 + $0x181] sm:$0xff] }
 0x260   : > { %1656 = vrot.lane.b32.xlu1 %v862_v43, %s5781_s29  ;;  %1658 = vrot.lane.b32.xlu0 %v863_v17, %s5781_s29  ;;  %v2097_v36 = vsel %vm2087_vm8, %v2064_v16, %v7113_v11  ;;  %v897_v11 = vld [vmem:[#allocation2 + $0x189] sm:$0xff]  ;;  %v5764_v17 = vld [vmem:[#allocation2 + $0x78] sm:$0xff]  ;;  %v5765_v62 = vld [vmem:[#allocation2 + $0x80] sm:$0xff] }
 0x261   : > { %v929_v43 = vld [vmem:[#allocation2 + $0x18a] sm:$0xff]  ;;  %v1966_v40 = vsel %vm272_vm0, %v5764_v17, %v9217_v21  ;;  %v9218_v2 = vld [vmem:[#allocation36_spill] sm:$0xff] }
 0x262   : > { %v1873_v34 = vpop.permute.xlu1 %1872  ;;  %v1875_v59 = vpop.permute.xlu0 %1874  ;;  %v867_v56 = vld [vmem:[#allocation2 + $0x1a0] sm:$0xff] }
 0x263   : > { %v2193_v61 = vsel %vm2186_vm11, %v2160_v32, %v1873_v34  ;;  %v2194_v60 = vsel %vm2186_vm11, %v2161_v39, %v1875_v59  ;;  %v1967_v32 = vsel %vm272_vm0, %v5765_v62, %v9218_v2  ;;  %v9219_v39 = vld [vmem:[#allocation4_spill] sm:$0xff]  ;;  %v2102_v62 = vsel %vm2087_vm8, %v6971_v50, %v7129_v8 }
 0x264   : > { %1784 = vrot.lane.b32.xlu1 %v894_v48, %s5782_s30  ;;  %1786 = vrot.lane.b32.xlu0 %v895_v9, %s5782_s30  ;;  %v9220_v34 = vld [vmem:[#allocation72_spill] sm:$0xff]  ;;  %v866_v48 = vld [vmem:[#allocation2 + $0x198] sm:$0xff]  ;;  %v9222_v9 = vld [vmem:[#allocation74_spill] sm:$0xff]  ;;  %v2103_v2 = vsel %vm2087_vm8, %v6990_v25, %v7133_v46  ;;  %vm4034_vm0 = vcmask 785408  }
 0x265   : > { %5096 = vmatprep.mubr.msk.f32.mxu0 %vm2233_vm12, %v2193_v61  ;;  %v1999_v59 = vsel %vm1988_vm4, %v1966_v40, %v9220_v34  ;;  %v9221_v61 = vld [vmem:[#allocation73_spill] sm:$0xff] }
 0x266   : > { %5097 = vmatmul.mubr.msk.f32.gmra.mxu0 %vm2233_vm12, %v2194_v60  ;;  %v1621_v37 = vpop.permute.xlu1 %1620  ;;  %v1623_v41 = vpop.permute.xlu0 %1622  ;;  %v2000_v60 = vsel %vm1988_vm4, %v1967_v32, %v9221_v61 }
 0x267   : > { %v2129_v3 = vsel %vm2120_vm9, %v2096_v44, %v1621_v37  ;;  %v2130_v4 = vsel %vm2120_vm9, %v2097_v36, %v1623_v41  ;;  %v2032_v37 = vsel %vm2021_vm5, %v1999_v59, %v9222_v9  ;;  %v9223_v41 = vld [vmem:[#allocation75_spill] sm:$0xff] }
 0x268   : > { %1912 = vrot.lane.b32.xlu1 %v926_v58, %s5783_s8  ;;  %1914 = vrot.lane.b32.xlu0 %v927_v51, %s5783_s8  ;;  %v2033_v58 = vsel %vm2021_vm5, %v2000_v60, %v9223_v41  ;;  %v2065_v13 = vsel %vm2054_vm7, %v2032_v37, %v9224_v27  ;;  %v930_v44 = vld [vmem:[#allocation2 + $0x19a] sm:$0xff]  ;;  %v2104_v37 = vsel %vm2087_vm8, %v6993_v52, %v7135_v15 }
 0x269   : > { %v2066_v42 = vsel %vm2054_vm7, %v2033_v58, %v9225_v20  ;;  %v2098_v53 = vsel %vm2087_vm8, %v2065_v13, %v7115_v63  ;;  %v2105_v41 = vsel %vm2087_vm8, %v7005_v7, %v7139_v29 }
 0x26a   : > { %v1749_v28 = vpop.permute.xlu1 %1748  ;;  %v1751_v45 = vpop.permute.xlu0 %1750  ;;  %v2099_v23 = vsel %vm2087_vm8, %v2066_v42, %v7121_v47 }
 0x26b   : > { %v2162_v18 = vsel %vm2153_vm10, %v2129_v3, %v1749_v28  ;;  %v2163_v38 = vsel %vm2153_vm10, %v2130_v4, %v1751_v45  ;;  %v898_v28 = vld [vmem:[#allocation2 + $0x199] sm:$0xff]  ;;  %v931_v4 = vld [vmem:[#allocation2 + $0x1a2] sm:$0xff] }
 0x26c   : > { %1660 = vrot.lane.b32.xlu1 %v864_v30, %s5781_s29  ;;  %1662 = vrot.lane.b32.xlu0 %v865_v26, %s5781_s29  ;;  %v899_v26 = vld [vmem:[#allocation2 + $0x1a1] sm:$0xff] }
 0x26e   : > { %v1877_v19 = vpop.permute.xlu1 %1876  ;;  %v1879_v33 = vpop.permute.xlu0 %1878 }
 0x26f   : > { %v2195_v14 = vsel %vm2186_vm11, %v2162_v18, %v1877_v19  ;;  %v2196_v1 = vsel %vm2186_vm11, %v2163_v38, %v1879_v33  ;;  %v9226_v19 = vld [vmem:[#allocation53_spill] sm:$0xff] }
 0x270   : > { %1788 = vrot.lane.b32.xlu1 %v896_v55, %s5782_s30  ;;  %1790 = vrot.lane.b32.xlu0 %v897_v11, %s5782_s30  ;;  %v2100_v33 = vsel %vm2087_vm8, %v9226_v19, %v7123_v12 }
 0x271   : > { %5099 = vmatprep.mubr.msk.f32.mxu0 %vm2233_vm12, %v2195_v14  ;;  %v2101_v14 = vsel %vm2087_vm8, %v6968_v54, %v7127_v5 }
 0x272   : > { %5100 = vmatmul.mubr.msk.f32.gmra.mxu0 %vm2233_vm12, %v2196_v1  ;;  %v1625_v57 = vpop.permute.xlu1 %1624  ;;  %v1627_v35 = vpop.permute.xlu0 %1626 }
 0x273   : > { %v2131_v49 = vsel %vm2120_vm9, %v2098_v53, %v1625_v57  ;;  %v2132_v6 = vsel %vm2120_vm9, %v2099_v23, %v1627_v35  ;;  %v2106_v23 = vsel %vm2087_vm8, %v7009_v31, %v7141_v0 }
 0x274   : > { %1916 = vrot.lane.b32.xlu1 %v9219_v39, %s5783_s8  ;;  %1918 = vrot.lane.b32.xlu0 %v929_v43, %s5783_s8 }
 0x276   : > { %v1753_v51 = vpop.permute.xlu1 %1752  ;;  %v1755_v10 = vpop.permute.xlu0 %1754 }
 0x277   : > { %v2164_v45 = vsel %vm2153_vm10, %v2131_v49, %v1753_v51  ;;  %v2165_v22 = vsel %vm2153_vm10, %v2132_v6, %v1755_v10  ;;  %v9227_v49 = vld [vmem:[#allocation57_spill] sm:$0xff] }
 0x278   : > { %1538 = vrot.lane.b32.xlu1 %v929_v43, %s5780_s12  ;;  %1664 = vrot.lane.b32.xlu0 %v866_v48, %s5781_s29  ;;  %v2107_v6 = vsel %vm2087_vm8, %v9227_v49, %v7145_v24  ;;  %s5785_s12 = smov 64  }
 0x27a   : > { %v1881_v16 = vpop.permute.xlu1 %1880  ;;  %v1883_v30 = vpop.permute.xlu0 %1882 }
 0x27b   : > { %v2197_v63 = vsel %vm2186_vm11, %v2164_v45, %v1881_v16  ;;  %v2198_v47 = vsel %vm2186_vm11, %v2165_v22, %v1883_v30 }
 0x27c   : > { %1666 = vrot.lane.b32.xlu1 %v867_v56, %s5781_s29  ;;  %1792 = vrot.lane.b32.xlu0 %v898_v28, %s5782_s30 }
 0x27d   : > { %5102 = vmatprep.mubr.msk.f32.mxu0 %vm2233_vm12, %v2197_v63 }
 0x27e   : > { %5103 = vmatmul.mubr.msk.f32.gmra.mxu0 %vm2233_vm12, %v2198_v47  ;;  %v1629_v36 = vpop.permute.xlu1 %1628  ;;  %v1631_v3 = vpop.permute.xlu0 %1630 }
 0x27f   : > { %v2133_v1 = vsel %vm2120_vm9, %v2100_v33, %v1629_v36  ;;  %v2134_v55 = vsel %vm2120_vm9, %v2101_v14, %v1631_v3  ;;  %v9229_v36 = vld [vmem:[#allocation5_spill] sm:$0xff] }
 0x280   : > { %1794 = vrot.lane.b32.xlu1 %v899_v26, %s5782_s30  ;;  %1920 = vrot.lane.b32.xlu0 %v930_v44, %s5783_s8  ;;  %v9228_v44 = vld [vmem:[#allocation10_spill] sm:$0xff] }
 0x281   : > { %v2108_v3 = vsel %vm2087_vm8, %v9229_v36, %v9228_v44 }
 0x282   : > { %v1757_v18 = vpop.permute.xlu1 %1756  ;;  %v1759_v38 = vpop.permute.xlu0 %1758 }
 0x283   : > { %v2166_v11 = vsel %vm2153_vm10, %v2133_v1, %v1757_v18  ;;  %v2167_v57 = vsel %vm2153_vm10, %v2134_v55, %v1759_v38  ;;  %v9231_v18 = vld [vmem:[#allocation6_spill] sm:$0xff] }
 0x284   : > { %1922 = vrot.lane.b32.xlu1 %v931_v4, %s5783_s8  ;;  %v9230_v4 = vld [vmem:[#allocation11_spill] sm:$0xff] }
 0x285   : > { %v2109_v38 = vsel %vm2087_vm8, %v9231_v18, %v9230_v4 }
 0x286   : > { %v1885_v35 = vpop.permute.xlu1 %1884  ;;  %v1887_v43 = vpop.permute.xlu0 %1886 }
 0x287   : > { %v2199_v17 = vsel %vm2186_vm11, %v2166_v11, %v1885_v35  ;;  %v2200_v12 = vsel %vm2186_vm11, %v2167_v57, %v1887_v43 }
 0x288   : > { %5105 = vmatprep.mubr.msk.f32.mxu0 %vm2233_vm12, %v2199_v17 }
 0x289   : > { %5106 = vmatmul.mubr.msk.f32.gmra.mxu0 %vm2233_vm12, %v2200_v12 }
 0x28a   : > { %v1633_v54 = vpop.permute.xlu1 %1632  ;;  %v1635_v5 = vpop.permute.xlu0 %1634 }
 0x28b   : > { %v2135_v32 = vsel %vm2120_vm9, %v2102_v62, %v1633_v54  ;;  %v2136_v39 = vsel %vm2120_vm9, %v2103_v2, %v1635_v5  ;;  %v9232_v5 = vld [vmem:[#allocation62_spill] sm:$0xff]  ;;  %v9234_v62 = vld [vmem:[#allocation68_spill] sm:$0xff] }
 0x28c   : > { %v9235_v2 = vld [vmem:[#allocation60_spill] sm:$0xff] }
 0x28e   : > { %v1761_v21 = vpop.permute.xlu1 %1760  ;;  %v1763_v40 = vpop.permute.xlu0 %1762 }
 0x28f   : > { %v2168_v34 = vsel %vm2153_vm10, %v2135_v32, %v1761_v21  ;;  %v2169_v59 = vsel %vm2153_vm10, %v2136_v39, %v1763_v40  ;;  %v9233_v21 = vld [vmem:[#allocation54_spill] sm:$0xff]  ;;  %v2111_v32 = vsel %vm2087_vm8, %v9235_v2, %v9234_v62 }
 0x290   : > { %v2110_v40 = vsel %vm2087_vm8, %v9233_v21, %v9232_v5 }
 0x292   : > { %v1889_v61 = vpop.permute.xlu1 %1888  ;;  %v1891_v60 = vpop.permute.xlu0 %1890 }
 0x293   : > { %v2201_v48 = vsel %vm2186_vm11, %v2168_v34, %v1889_v61  ;;  %v2202_v9 = vsel %vm2186_vm11, %v2169_v59, %v1891_v60 }
 0x294   : > { %5108 = vmatprep.mubr.msk.f32.mxu0 %vm2233_vm12, %v2201_v48 }
 0x295   : > { %5109 = vmatmul.mubr.msk.f32.gmra.mxu0 %vm2233_vm12, %v2202_v9 }
 0x296   : > { %v1637_v50 = vpop.permute.xlu1 %1636  ;;  %v1639_v25 = vpop.permute.xlu0 %1638 }
 0x297   : > { %v2137_v58 = vsel %vm2120_vm9, %v2104_v37, %v1637_v50  ;;  %v2138_v51 = vsel %vm2120_vm9, %v2105_v41, %v1639_v25  ;;  %v9236_v41 = vld [vmem:[#allocation63_spill] sm:$0xff] }
 0x29a   : > { %v1765_v8 = vpop.permute.xlu1 %1764  ;;  %v1767_v46 = vpop.permute.xlu0 %1766 }
 0x29b   : > { %v2170_v10 = vsel %vm2153_vm10, %v2137_v58, %v1765_v8  ;;  %v2171_v27 = vsel %vm2153_vm10, %v2138_v51, %v1767_v46  ;;  %v9237_v58 = vld [vmem:[#allocation55_spill] sm:$0xff] }
 0x29c   : > { %v2112_v51 = vsel %vm2087_vm8, %v9237_v58, %v9236_v41 }
 0x29e   : > { %v1893_v13 = vpop.permute.xlu1 %1892  ;;  %v1895_v20 = vpop.permute.xlu0 %1894 }
 0x29f   : > { %v2203_v42 = vsel %vm2186_vm11, %v2170_v10, %v1893_v13  ;;  %v2204_v53 = vsel %vm2186_vm11, %v2171_v27, %v1895_v20  ;;  %v9238_v10 = vld [vmem:[#allocation12_spill] sm:$0xff]  ;;  %v9239_v27 = vld [vmem:[#allocation61_spill] sm:$0xff] }
 0x2a0   : > { %5111 = vmatprep.mubr.msk.f32.mxu0 %vm2233_vm12, %v2203_v42  ;;  %v2113_v13 = vsel %vm2087_vm8, %v9239_v27, %v9238_v10  ;;  %v7531_v27 = vld [vmem:[%s8993_s3] ss:$0 sm:$0xff] }
 0x2a1   : > { %5112 = vmatmul.mubr.msk.f32.gmra.mxu0 %vm2233_vm12, %v2204_v53 }
 0x2a2   : > { %v1641_v52 = vpop.permute.xlu1 %1640  ;;  %v1643_v7 = vpop.permute.xlu0 %1642 }
 0x2a3   : > { %v2139_v56 = vsel %vm2120_vm9, %v2106_v23, %v1641_v52  ;;  %v2140_v28 = vsel %vm2120_vm9, %v2107_v6, %v1643_v7 }
 0x2a6   : > { %v1769_v15 = vpop.permute.xlu1 %1768  ;;  %v1771_v29 = vpop.permute.xlu0 %1770 }
 0x2a7   : > { %v2172_v45 = vsel %vm2153_vm10, %v2139_v56, %v1769_v15  ;;  %v2173_v22 = vsel %vm2153_vm10, %v2140_v28, %v1771_v29 }
 0x2aa   : > { %v1897_v16 = vpop.permute.xlu1 %1896  ;;  %v1899_v30 = vpop.permute.xlu0 %1898 }
 0x2ab   : > { %v2205_v63 = vsel %vm2186_vm11, %v2172_v45, %v1897_v16  ;;  %v2206_v47 = vsel %vm2186_vm11, %v2173_v22, %v1899_v30  ;;  %v9240_v45 = vld [vmem:[#allocation13_spill] sm:$0xff]  ;;  %v9241_v22 = vld [vmem:[#allocation7_spill] sm:$0xff]  ;;  %v9242_v30 = vld [vmem:[#allocation66_spill] sm:$0xff] }
 0x2ac   : > { %5114 = vmatprep.mubr.msk.f32.mxu0 %vm2233_vm12, %v2205_v63  ;;  %v2114_v16 = vsel %vm2087_vm8, %v9241_v22, %v9240_v45  ;;  %v9243_v63 = vld [vmem:[#allocation8_spill] sm:$0xff] }
 0x2ad   : > { %5115 = vmatmul.mubr.msk.f32.gmra.mxu0 %vm2233_vm12, %v2206_v47  ;;  %v2115_v47 = vsel %vm2087_vm8, %v9243_v63, %v9242_v30 }
 0x2ae   : > { %v1645_v31 = vpop.permute.xlu1 %1644  ;;  %v1647_v0 = vpop.permute.xlu0 %1646 }
 0x2af   : > { %v2141_v19 = vsel %vm2120_vm9, %v2108_v3, %v1645_v31  ;;  %v2142_v33 = vsel %vm2120_vm9, %v2109_v38, %v1647_v0 }
 0x2b2   : > { %v1773_v24 = vpop.permute.xlu1 %1772  ;;  %v1775_v26 = vpop.permute.xlu0 %1774 }
 0x2b3   : > { %v2174_v14 = vsel %vm2153_vm10, %v2141_v19, %v1773_v24  ;;  %v2175_v1 = vsel %vm2153_vm10, %v2142_v33, %v1775_v26 }
 0x2b6   : > { %v1901_v55 = vpop.permute.xlu1 %1900  ;;  %v1903_v11 = vpop.permute.xlu0 %1902 }
 0x2b7   : > { %v2207_v57 = vsel %vm2186_vm11, %v2174_v14, %v1901_v55  ;;  %v2208_v35 = vsel %vm2186_vm11, %v2175_v1, %v1903_v11  ;;  %v9244_v14 = vld [vmem:[#allocation16_spill] sm:$0xff]  ;;  %v9245_v1 = vld [vmem:[#allocation58_spill] sm:$0xff]  ;;  %v9246_v11 = vld [vmem:[#allocation17_spill] sm:$0xff] }
 0x2b8   : > { %5117 = vmatprep.mubr.msk.f32.mxu0 %vm2233_vm12, %v2207_v57  ;;  %v2116_v55 = vsel %vm2087_vm8, %v9245_v1, %v9244_v14  ;;  %v9247_v57 = vld [vmem:[#allocation64_spill] sm:$0xff] }
 0x2b9   : > { %5118 = vmatmul.mubr.msk.f32.gmra.mxu0 %vm2233_vm12, %v2208_v35  ;;  %v2117_v35 = vsel %vm2087_vm8, %v9247_v57, %v9246_v11 }
 0x2ba   : > { %v1649_v43 = vpop.permute.xlu1 %1648  ;;  %v1651_v17 = vpop.permute.xlu0 %1650 }
 0x2bb   : > { %v2143_v39 = vsel %vm2120_vm9, %v2110_v40, %v1649_v43  ;;  %v2144_v34 = vsel %vm2120_vm9, %v2111_v32, %v1651_v17 }
 0x2be   : > { %v1777_v12 = vpop.permute.xlu1 %1776  ;;  %v1779_v54 = vpop.permute.xlu0 %1778 }
 0x2bf   : > { %v2176_v59 = vsel %vm2153_vm10, %v2143_v39, %v1777_v12  ;;  %v2177_v61 = vsel %vm2153_vm10, %v2144_v34, %v1779_v54 }
 0x2c2   : > { %v1905_v60 = vpop.permute.xlu1 %1904  ;;  %v1907_v48 = vpop.permute.xlu0 %1906 }
 0x2c3   : > { %v2209_v9 = vsel %vm2186_vm11, %v2176_v59, %v1905_v60  ;;  %v2210_v50 = vsel %vm2186_vm11, %v2177_v61, %v1907_v48  ;;  %v9248_v59 = vld [vmem:[#allocation20_spill] sm:$0xff]  ;;  %v9249_v61 = vld [vmem:[#allocation59_spill] sm:$0xff] }
 0x2c4   : > { %5120 = vmatprep.mubr.msk.f32.mxu0 %vm2233_vm12, %v2209_v9  ;;  %v2118_v60 = vsel %vm2087_vm8, %v9249_v61, %v9248_v59 }
 0x2c5   : > { %5121 = vmatmul.mubr.msk.f32.gmra.mxu0 %vm2233_vm12, %v2210_v50 }
 0x2c6   : > { %v1653_v25 = vpop.permute.xlu1 %1652  ;;  %v1655_v8 = vpop.permute.xlu0 %1654 }
 0x2c7   : > { %v2145_v20 = vsel %vm2120_vm9, %v2112_v51, %v1653_v25  ;;  %v2146_v42 = vsel %vm2120_vm9, %v2113_v13, %v1655_v8 }
 0x2ca   : > { %v1781_v46 = vpop.permute.xlu1 %1780  ;;  %v1783_v37 = vpop.permute.xlu0 %1782 }
 0x2cb   : > { %v2178_v53 = vsel %vm2153_vm10, %v2145_v20, %v1781_v46  ;;  %v2179_v52 = vsel %vm2153_vm10, %v2146_v42, %v1783_v37  ;;  %v9250_v46 = vld [vmem:[#allocation65_spill] sm:$0xff] }
 0x2ce   : > { %v1909_v7 = vpop.permute.xlu1 %1908  ;;  %v1911_v15 = vpop.permute.xlu0 %1910 }
 0x2cf   : > { %v2211_v29 = vsel %vm2186_vm11, %v2178_v53, %v1909_v7  ;;  %v2212_v23 = vsel %vm2186_vm11, %v2179_v52, %v1911_v15 }
 0x2d0   : > { %5123 = vmatprep.mubr.msk.f32.mxu0 %vm2233_vm12, %v2211_v29 }
 0x2d1   : > { %5124 = vmatmul.mubr.msk.f32.gmra.mxu0 %vm2233_vm12, %v2212_v23 }
 0x2d2   : > { %v1657_v49 = vpop.permute.xlu1 %1656  ;;  %v1659_v6 = vpop.permute.xlu0 %1658 }
 0x2d3   : > { %v2147_v31 = vsel %vm2120_vm9, %v2114_v16, %v1657_v49  ;;  %v2148_v0 = vsel %vm2120_vm9, %v2115_v47, %v1659_v6 }
 0x2d6   : > { %v1785_v56 = vpop.permute.xlu1 %1784  ;;  %v1787_v28 = vpop.permute.xlu0 %1786 }
 0x2d7   : > { %v2180_v24 = vsel %vm2153_vm10, %v2147_v31, %v1785_v56  ;;  %v2181_v26 = vsel %vm2153_vm10, %v2148_v0, %v1787_v28 }
 0x2da   : > { %v1913_v44 = vpop.permute.xlu1 %1912  ;;  %v1915_v36 = vpop.permute.xlu0 %1914 }
 0x2db   : > { %v2213_v3 = vsel %vm2186_vm11, %v2180_v24, %v1913_v44  ;;  %v2214_v4 = vsel %vm2186_vm11, %v2181_v26, %v1915_v36 }
 0x2dc   : > { %5126 = vmatprep.mubr.msk.f32.mxu0 %vm2233_vm12, %v2213_v3 }
 0x2dd   : > { %5127 = vmatmul.mubr.msk.f32.gmra.mxu0 %vm2233_vm12, %v2214_v4 }
 0x2de   : > { %v1661_v18 = vpop.permute.xlu1 %1660  ;;  %v1663_v38 = vpop.permute.xlu0 %1662 }
 0x2df   : > { %v2149_v43 = vsel %vm2120_vm9, %v2116_v55, %v1661_v18  ;;  %v2150_v17 = vsel %vm2120_vm9, %v2117_v35, %v1663_v38 }
 0x2e2   : > { %v1789_v19 = vpop.permute.xlu1 %1788  ;;  %v1791_v33 = vpop.permute.xlu0 %1790 }
 0x2e3   : > { %v2182_v12 = vsel %vm2153_vm10, %v2149_v43, %v1789_v19  ;;  %v2183_v54 = vsel %vm2153_vm10, %v2150_v17, %v1791_v33 }
 0x2e6   : > { %v1917_v5 = vpop.permute.xlu1 %1916  ;;  %v1919_v21 = vpop.permute.xlu0 %1918 }
 0x2e7   : > { %v2215_v40 = vsel %vm2186_vm11, %v2182_v12, %v1917_v5  ;;  %v2216_v62 = vsel %vm2186_vm11, %v2183_v54, %v1919_v21 }
 0x2e8   : > { %5129 = vmatprep.mubr.msk.f32.mxu0 %vm2233_vm12, %v2215_v40 }
 0x2e9   : > { %5130 = vmatmul.mubr.msk.f32.gmra.mxu0 %vm2233_vm12, %v2216_v62 }
 0x2ea   : > { %v1539_v2 = vpop.permute.xlu1 %1538  ;;  %v1665_v32 = vpop.permute.xlu0 %1664 }
 0x2eb   : > { %v2151_v48 = vsel %vm2120_vm9, %v2118_v60, %v1665_v32  ;;  %v2119_v37 = vsel %vm2087_vm8, %v9250_v46, %v1539_v2 }
 0x2ee   : > { %v1667_v39 = vpop.permute.xlu1 %1666  ;;  %v1793_v34 = vpop.permute.xlu0 %1792 }
 0x2ef   : > { %v2184_v9 = vsel %vm2153_vm10, %v2151_v48, %v1793_v34  ;;  %v2152_v41 = vsel %vm2120_vm9, %v2119_v37, %v1667_v39 }
 0x2f2   : > { %v1795_v50 = vpop.permute.xlu1 %1794  ;;  %v1921_v25 = vpop.permute.xlu0 %1920 }
 0x2f3   : > { %v2217_v8 = vsel %vm2186_vm11, %v2184_v9, %v1921_v25  ;;  %v2185_v58 = vsel %vm2153_vm10, %v2152_v41, %v1795_v50 }
 0x2f4   : > { %5132 = vmatprep.mubr.msk.f32.mxu0 %vm2233_vm12, %v2217_v8 }
 0x2f6   : > { %v1923_v51 = vpop.permute.xlu1 %1922 }
 0x2f7   : > { %v2218_v10 = vsel %vm2186_vm11, %v2185_v58, %v1923_v51  ;;  %v9253_v58 = vmov 0.0  }
 0x2f8   : > { %5133 = vmatmul.mubr.msk.f32.gmra.mxu0 %vm2233_vm12, %v2218_v10  ;;  %334 = vst.msk [vmem:[#allocation3 + $0x20] sm:$0xff] %vm328_vm13, %v9253_v58  ;;  %329 = vst.msk [vmem:[#allocation3] sm:$0xff] %vm328_vm13, %v9253_v58 }
 0x2f9   : > { %335 = vst.msk [vmem:[#allocation3 + $0x28] sm:$0x3] %vm331_vm14, %v9253_v58  ;;  %332 = vst.msk [vmem:[#allocation3 + $0x10] sm:$0x3] %vm331_vm14, %v9253_v58 }
 0x2fa   : > { %330 = vst.msk [vmem:[#allocation3 + $0x8] sm:$0xff] %vm328_vm13, %v9253_v58  ;;  %333 = vst.msk [vmem:[#allocation3 + $0x18] sm:$0xff] %vm328_vm13, %v9253_v58 }
 0x2fb   : > { %336 = vst.msk [vmem:[#allocation3 + $0x30] sm:$0xff] %vm328_vm13, %v9253_v58  ;;  %337 = vst.msk [vmem:[#allocation3 + $0x38] sm:$0xff] %vm328_vm13, %v9253_v58 }
 0x2fc   : > { %338 = vst.msk [vmem:[#allocation3 + $0x40] sm:$0x3] %vm331_vm14, %v9253_v58  ;;  %341 = vst.msk [vmem:[#allocation3 + $0x58] sm:$0x3] %vm331_vm14, %v9253_v58 }
 0x2fd   : > { %339 = vst.msk [vmem:[#allocation3 + $0x48] sm:$0xff] %vm328_vm13, %v9253_v58  ;;  %340 = vst.msk [vmem:[#allocation3 + $0x50] sm:$0xff] %vm328_vm13, %v9253_v58 }
 0x2fe   : > { %342 = vst.msk [vmem:[#allocation3 + $0x60] sm:$0xff] %vm328_vm13, %v9253_v58  ;;  %343 = vst.msk [vmem:[#allocation3 + $0x68] sm:$0xff] %vm328_vm13, %v9253_v58 }
 0x2ff   : > { %344 = vst.msk [vmem:[#allocation3 + $0x70] sm:$0x3] %vm331_vm14, %v9253_v58  ;;  %347 = vst.msk [vmem:[#allocation3 + $0x88] sm:$0x3] %vm331_vm14, %v9253_v58 }
 0x300   : > { %345 = vst.msk [vmem:[#allocation3 + $0x78] sm:$0xff] %vm328_vm13, %v9253_v58  ;;  %346 = vst.msk [vmem:[#allocation3 + $0x80] sm:$0xff] %vm328_vm13, %v9253_v58 }
 0x301   : > { %348 = vst.msk [vmem:[#allocation3 + $0x90] sm:$0xff] %vm328_vm13, %v9253_v58  ;;  %349 = vst.msk [vmem:[#allocation3 + $0x98] sm:$0xff] %vm328_vm13, %v9253_v58 }
 0x302   : > { %v5089_v13 = vpop.f32.mrf.mxu0  ;;  %350 = vst.msk [vmem:[#allocation3 + $0xa0] sm:$0x3] %vm331_vm14, %v9253_v58  ;;  %353 = vst.msk [vmem:[#allocation3 + $0xb8] sm:$0x3] %vm331_vm14, %v9253_v58 }
 0x303   : > { %v7534_v20 = vadd.f32 %v5089_v13, %v7531_v27  ;;  %351 = vst.msk [vmem:[#allocation3 + $0xa8] sm:$0xff] %vm328_vm13, %v9253_v58  ;;  %352 = vst.msk [vmem:[#allocation3 + $0xb0] sm:$0xff] %vm328_vm13, %v9253_v58 }
 0x304   : > { %v2400_v42 = vpop.f32.mrf.mxu0  ;;  %354 = vst.msk [vmem:[#allocation3 + $0xc0] sm:$0xff] %vm328_vm13, %v9253_v58  ;;  %355 = vst.msk [vmem:[#allocation3 + $0xc8] sm:$0xff] %vm328_vm13, %v9253_v58 }
 0x305   : > { %v7537_v53 = vadd.f32 %v7531_v27, %v2400_v42  ;;  %2593 = vrot.lane.b32.xlu1 %v7534_v20, %s5784_s11  ;;  %356 = vst.msk [vmem:[#allocation3 + $0xd0] sm:$0x3] %vm331_vm14, %v9253_v58  ;;  %359 = vst.msk [vmem:[#allocation3 + $0xe8] sm:$0x3] %vm331_vm14, %v9253_v58 }
 0x306   : > { %357 = vst.msk [vmem:[#allocation3 + $0xd8] sm:$0xff] %vm328_vm13, %v9253_v58  ;;  %358 = vst.msk [vmem:[#allocation3 + $0xe0] sm:$0xff] %vm328_vm13, %v9253_v58 }
 0x307   : > { %2591 = vrot.lane.b32.xlu0 %v7537_v53, %s5784_s11  ;;  %360 = vst.msk [vmem:[#allocation3 + $0xf0] sm:$0xff] %vm328_vm13, %v9253_v58  ;;  %361 = vst.msk [vmem:[#allocation3 + $0xf8] sm:$0xff] %vm328_vm13, %v9253_v58 }
 0x308   : > { %362 = vst.msk [vmem:[#allocation3 + $0x100] sm:$0x3] %vm331_vm14, %v9253_v58  ;;  %365 = vst.msk [vmem:[#allocation3 + $0x118] sm:$0x3] %vm331_vm14, %v9253_v58 }
 0x309   : > { %363 = vst.msk [vmem:[#allocation3 + $0x108] sm:$0xff] %vm328_vm13, %v9253_v58  ;;  %364 = vst.msk [vmem:[#allocation3 + $0x110] sm:$0xff] %vm328_vm13, %v9253_v58 }
 0x30a   : > { %366 = vst.msk [vmem:[#allocation3 + $0x120] sm:$0xff] %vm328_vm13, %v9253_v58  ;;  %367 = vst.msk [vmem:[#allocation3 + $0x128] sm:$0xff] %vm328_vm13, %v9253_v58 }
 0x30b   : > { %368 = vst.msk [vmem:[#allocation3 + $0x130] sm:$0x3] %vm331_vm14, %v9253_v58  ;;  %371 = vst.msk [vmem:[#allocation3 + $0x148] sm:$0x3] %vm331_vm14, %v9253_v58 }
 0x30c   : > { %369 = vst.msk [vmem:[#allocation3 + $0x138] sm:$0xff] %vm328_vm13, %v9253_v58  ;;  %370 = vst.msk [vmem:[#allocation3 + $0x140] sm:$0xff] %vm328_vm13, %v9253_v58 }
 0x30d   : > { %372 = vst.msk [vmem:[#allocation3 + $0x150] sm:$0xff] %vm328_vm13, %v9253_v58  ;;  %373 = vst.msk [vmem:[#allocation3 + $0x158] sm:$0xff] %vm328_vm13, %v9253_v58 }
 0x30e   : > { %v5092_v52 = vpop.f32.mrf.mxu0  ;;  %374 = vst.msk [vmem:[#allocation3 + $0x160] sm:$0x3] %vm331_vm14, %v9253_v58  ;;  %377 = vst.msk [vmem:[#allocation3 + $0x178] sm:$0x3] %vm331_vm14, %v9253_v58 }
 0x30f   : > { %v7544_v7 = vadd.f32 %v5092_v52, %v7531_v27  ;;  %375 = vst.msk [vmem:[#allocation3 + $0x168] sm:$0xff] %vm328_vm13, %v9253_v58  ;;  %376 = vst.msk [vmem:[#allocation3 + $0x170] sm:$0xff] %vm328_vm13, %v9253_v58 }
 0x310   : > { %v2410_v15 = vpop.f32.mrf.mxu0  ;;  %378 = vst.msk [vmem:[#allocation3 + $0x180] sm:$0xff] %vm328_vm13, %v9253_v58  ;;  %379 = vst.msk [vmem:[#allocation3 + $0x188] sm:$0xff] %vm328_vm13, %v9253_v58 }
 0x311   : > { %v7547_v29 = vadd.f32 %v7531_v27, %v2410_v15  ;;  %2597 = vrot.lane.b32.xlu1 %v7544_v7, %s5784_s11  ;;  %380 = vst.msk [vmem:[#allocation3 + $0x190] sm:$0x3] %vm331_vm14, %v9253_v58  ;;  %383 = vst.msk [vmem:[#allocation3 + $0x1a8] sm:$0x3] %vm331_vm14, %v9253_v58 }
 0x312   : > { %381 = vst.msk [vmem:[#allocation3 + $0x198] sm:$0xff] %vm328_vm13, %v9253_v58  ;;  %382 = vst.msk [vmem:[#allocation3 + $0x1a0] sm:$0xff] %vm328_vm13, %v9253_v58 }
 0x313   : > { %2595 = vrot.lane.b32.xlu0 %v7547_v29, %s5784_s11 }
 0x31a   : > { %v5095_v23 = vpop.f32.mrf.mxu0 }
 0x31b   : > { %v7554_v49 = vadd.f32 %v5095_v23, %v7531_v27 }
 0x31c   : > { %v2420_v6 = vpop.f32.mrf.mxu0 }
 0x31d   : > { %v7557_v56 = vadd.f32 %v7531_v27, %v2420_v6  ;;  %2601 = vrot.lane.b32.xlu1 %v7554_v49, %s5784_s11 }
 0x31f   : > { %2599 = vrot.lane.b32.xlu0 %v7557_v56, %s5784_s11 }
 0x326   : > { %v5098_v28 = vpop.f32.mrf.mxu0 }
 0x327   : > { %v7564_v45 = vadd.f32 %v5098_v28, %v7531_v27  ;;  %v2944_v28 = vld [vmem:[#allocation3 + $0x1] sm:$0xff] }
 0x328   : > { %v2430_v22 = vpop.f32.mrf.mxu0 }
 0x329   : > { %v7567_v16 = vadd.f32 %v7531_v27, %v2430_v22  ;;  %2605 = vrot.lane.b32.xlu1 %v7564_v45, %s5784_s11  ;;  %v2945_v22 = vld [vmem:[#allocation3 + $0x9] sm:$0xff] }
 0x32b   : > { %2603 = vrot.lane.b32.xlu0 %v7567_v16, %s5784_s11 }
 0x332   : > { %v5101_v30 = vpop.f32.mrf.mxu0 }
 0x333   : > { %v7574_v63 = vadd.f32 %v5101_v30, %v7531_v27 }
 0x334   : > { %v2440_v47 = vpop.f32.mrf.mxu0 }
 0x335   : > { %v7577_v31 = vadd.f32 %v7531_v27, %v2440_v47  ;;  %2609 = vrot.lane.b32.xlu1 %v7574_v63, %s5784_s11 }
 0x337   : > { %2607 = vrot.lane.b32.xlu0 %v7577_v31, %s5784_s11 }
 0x33e   : > { %v5104_v0 = vpop.f32.mrf.mxu0 }
 0x33f   : > { %v7584_v24 = vadd.f32 %v5104_v0, %v7531_v27  ;;  %v5276_v0 = vpack.i.bf16 %v2945_v22, %v2944_v28 }
 0x340   : > { %v2450_v26 = vpop.f32.mrf.mxu0 }
 0x341   : > { %v7587_v44 = vadd.f32 %v7531_v27, %v2450_v26  ;;  %2613 = vrot.lane.b32.xlu1 %v7584_v24, %s5784_s11 }
 0x343   : > { %2611 = vrot.lane.b32.xlu0 %v7587_v44, %s5784_s11 }
 0x349   : > { %v5107_v36 = vpop.f32.mrf.mxu0 }
 0x34a   : > { %v7594_v3 = vadd.f32 %v5107_v36, %v7531_v27 }
 0x34b   : > { %v2460_v4 = vpop.f32.mrf.mxu0 }
 0x34c   : > { %v7597_v18 = vadd.f32 %v7531_v27, %v2460_v4  ;;  %2617 = vrot.lane.b32.xlu1 %v7594_v3, %s5784_s11 }
 0x34e   : > { %2615 = vrot.lane.b32.xlu0 %v7597_v18, %s5784_s11 }
 0x355   : > { %v5110_v38 = vpop.f32.mrf.mxu0 }
 0x356   : > { %v7604_v19 = vadd.f32 %v5110_v38, %v7531_v27 }
 0x357   : > { %v2470_v33 = vpop.f32.mrf.mxu0 }
 0x358   : > { %v7607_v14 = vadd.f32 %v7531_v27, %v2470_v33  ;;  %2621 = vrot.lane.b32.xlu1 %v7604_v19, %s5784_s11 }
 0x35a   : > { %2619 = vrot.lane.b32.xlu0 %v7607_v14, %s5784_s11 }
 0x361   : > { %v5113_v1 = vpop.f32.mrf.mxu0 }
 0x362   : > { %v7614_v55 = vadd.f32 %v5113_v1, %v7531_v27 }
 0x363   : > { %v2480_v11 = vpop.f32.mrf.mxu0 }
 0x364   : > { %v7617_v57 = vadd.f32 %v7531_v27, %v2480_v11  ;;  %2625 = vrot.lane.b32.xlu1 %v7614_v55, %s5784_s11 }
 0x366   : > { %2623 = vrot.lane.b32.xlu0 %v7617_v57, %s5784_s11 }
 0x36d   : > { %v5116_v35 = vpop.f32.mrf.mxu0 }
 0x36e   : > { %v7624_v43 = vadd.f32 %v5116_v35, %v7531_v27  ;;  %v4178_v35 = vld [vmem:[%s8994_s4 + $0x78] sm:$0xff] }
 0x36f   : > { %v2490_v17 = vpop.f32.mrf.mxu0  ;;  %5223 = vmatpush1.msra.mxu1 %v4178_v35  ;;  %4303 = vmatpush1.msra.mxu0 %v4178_v35  ;;  %v4169_v35 = vld [vmem:[%s8994_s4 + $0x30] sm:$0xff] }
 0x370   : > { %v7627_v12 = vadd.f32 %v7531_v27, %v2490_v17  ;;  %2629 = vrot.lane.b32.xlu1 %v7624_v43, %s5784_s11  ;;  %v4177_v17 = vld [vmem:[%s8994_s4 + $0x70] sm:$0xff]  ;;  %5192 = vmatprep.subr.mxu1 %v9253_v58 }
 0x371   : > { %4304 = vmatprep.subr.mxu0 %v9253_v58  ;;  %5224 = vmatpush1.msra.mxu1 %v4177_v17 }
 0x372   : > { %2627 = vrot.lane.b32.xlu0 %v7627_v12, %s5784_s11  ;;  %4305 = vmatpush1.msra.mxu0 %v4177_v17 }
 0x373   : > { %5193 = vmatprep.subr.mxu1 %v9253_v58  ;;  %4306 = vmatprep.subr.mxu0 %v9253_v58 }
 0x379   : > { %v5119_v54 = vpop.f32.mrf.mxu0  ;;  %v7855_v52 = vpop.permute.xlu0 %2591 }
 0x37a   : > { %v7634_v5 = vadd.f32 %v5119_v54, %v7531_v27 }
 0x37b   : > { %v2500_v21 = vpop.f32.mrf.mxu0 }
 0x37c   : > { %v7637_v40 = vadd.f32 %v7531_v27, %v2500_v21  ;;  %2633 = vrot.lane.b32.xlu1 %v7634_v5, %s5784_s11 }
 0x37e   : > { %2631 = vrot.lane.b32.xlu0 %v7637_v40, %s5784_s11 }
 0x385   : > { %v5122_v62 = vpop.f32.mrf.mxu0  ;;  %v7863_v23 = vpop.permute.xlu0 %2595 }
 0x386   : > { %v7644_v2 = vadd.f32 %v5122_v62, %v7531_v27  ;;  %v4176_v62 = vld [vmem:[%s8994_s4 + $0x68] sm:$0xff] }
 0x387   : > { %v2510_v32 = vpop.f32.mrf.mxu0  ;;  %5225 = vmatpush1.msra.mxu1 %v4176_v62  ;;  %4307 = vmatpush1.msra.mxu0 %v4176_v62 }
 0x388   : > { %v7647_v39 = vadd.f32 %v7531_v27, %v2510_v32  ;;  %2637 = vrot.lane.b32.xlu1 %v7644_v2, %s5784_s11  ;;  %v4175_v32 = vld [vmem:[%s8994_s4 + $0x60] sm:$0xff]  ;;  %5194 = vmatprep.subr.mxu1 %v9253_v58 }
 0x389   : > { %4308 = vmatprep.subr.mxu0 %v9253_v58  ;;  %5226 = vmatpush1.msra.mxu1 %v4175_v32 }
 0x38a   : > { %2635 = vrot.lane.b32.xlu0 %v7647_v39, %s5784_s11  ;;  %4309 = vmatpush1.msra.mxu0 %v4175_v32  ;;  %v4168_v32 = vld [vmem:[%s8994_s4 + $0x28] sm:$0xff] }
 0x38b   : > { %5195 = vmatprep.subr.mxu1 %v9253_v58  ;;  %4310 = vmatprep.subr.mxu0 %v9253_v58 }
 0x391   : > { %v5125_v34 = vpop.f32.mrf.mxu0  ;;  %v7871_v30 = vpop.permute.xlu0 %2599 }
 0x392   : > { %v7654_v59 = vadd.f32 %v5125_v34, %v7531_v27 }
 0x393   : > { %v2520_v61 = vpop.f32.mrf.mxu0 }
 0x394   : > { %v7657_v60 = vadd.f32 %v7531_v27, %v2520_v61  ;;  %2641 = vrot.lane.b32.xlu1 %v7654_v59, %s5784_s11 }
 0x396   : > { %2639 = vrot.lane.b32.xlu0 %v7657_v60, %s5784_s11 }
 0x39d   : > { %v5128_v48 = vpop.f32.mrf.mxu0  ;;  %v7879_v26 = vpop.permute.xlu0 %2603 }
 0x39e   : > { %v7664_v9 = vadd.f32 %v5128_v48, %v7531_v27  ;;  %v4174_v48 = vld [vmem:[%s8994_s4 + $0x58] sm:$0xff] }
 0x39f   : > { %v2530_v50 = vpop.f32.mrf.mxu0  ;;  %5227 = vmatpush1.msra.mxu1 %v4174_v48  ;;  %4311 = vmatpush1.msra.mxu0 %v4174_v48  ;;  %v4167_v48 = vld [vmem:[%s8994_s4 + $0x20] sm:$0xff] }
 0x3a0   : > { %v7667_v25 = vadd.f32 %v7531_v27, %v2530_v50  ;;  %2645 = vrot.lane.b32.xlu1 %v7664_v9, %s5784_s11  ;;  %v4173_v50 = vld [vmem:[%s8994_s4 + $0x50] sm:$0xff]  ;;  %5196 = vmatprep.subr.mxu1 %v9253_v58 }
 0x3a1   : > { %4312 = vmatprep.subr.mxu0 %v9253_v58  ;;  %5228 = vmatpush1.msra.mxu1 %v4173_v50 }
 0x3a2   : > { %2643 = vrot.lane.b32.xlu0 %v7667_v25, %s5784_s11  ;;  %4313 = vmatpush1.msra.mxu0 %v4173_v50 }
 0x3a3   : > { %5197 = vmatprep.subr.mxu1 %v9253_v58  ;;  %4314 = vmatprep.subr.mxu0 %v9253_v58 }
 0x3a9   : > { %v5131_v8 = vpop.f32.mrf.mxu0  ;;  %v7884_v4 = vpop.permute.xlu0 %2607 }
 0x3aa   : > { %v7674_v46 = vadd.f32 %v5131_v8, %v7531_v27 }
 0x3ab   : > { %v2540_v37 = vpop.f32.mrf.mxu0 }
 0x3ac   : > { %9251 = vst [vmem:[#allocation21_spill] sm:$0xff] %v7674_v46  ;;  %v7677_v41 = vadd.f32 %v7531_v27, %v2540_v37  ;;  %2649 = vrot.lane.b32.xlu1 %v7674_v46, %s5784_s11 }
 0x3ae   : > { %9252 = vst [vmem:[#allocation24_spill] sm:$0xff] %v7677_v41  ;;  %2647 = vrot.lane.b32.xlu0 %v7677_v41, %s5784_s11 }
 0x3b5   : > { %v7888_v33 = vpop.permute.xlu0 %2611 }
 0x3b8   : > { %v5134_v51 = vpop.f32.mrf.mxu0 }
 0x3b9   : > { %v7792_v10 = vadd.f32 %v5134_v51, %v7531_v27  ;;  %v4172_v51 = vld [vmem:[%s8994_s4 + $0x48] sm:$0xff] }
 0x3ba   : > { %v2550_v13 = vpop.f32.mrf.mxu0  ;;  %5229 = vmatpush1.msra.mxu1 %v4172_v51  ;;  %4315 = vmatpush1.msra.mxu0 %v4172_v51 }
 0x3bb   : > { %9254 = vst [vmem:[#allocation27_spill] sm:$0xff] %v7792_v10  ;;  %v7795_v42 = vadd.f32 %v7531_v27, %v2550_v13  ;;  %2653 = vrot.lane.b32.xlu1 %v7792_v10, %s5784_s11  ;;  %v7851_v27 = vpop.permute.xlu1 %2593  ;;  %v4171_v13 = vld [vmem:[%s8994_s4 + $0x40] sm:$0xff]  ;;  %5198 = vmatprep.subr.mxu1 %v9253_v58 }
 0x3bc   : > { %4316 = vmatprep.subr.mxu0 %v9253_v58  ;;  %5230 = vmatpush1.msra.mxu1 %v4171_v13 }
 0x3bd   : > { %9255 = vst [vmem:[#allocation30_spill] sm:$0xff] %v7795_v42  ;;  %2651 = vrot.lane.b32.xlu0 %v7795_v42, %s5784_s11  ;;  %4317 = vmatpush1.msra.mxu0 %v4171_v13  ;;  %v4166_v13 = vld [vmem:[%s8994_s4 + $0x18] sm:$0xff] }
 0x3be   : > { %5199 = vmatprep.subr.mxu1 %v9253_v58  ;;  %4318 = vmatprep.subr.mxu0 %v9253_v58 }
 0x3bf   : > { %2753 = vrot.lane.b32.xlu1 %v7534_v20, %s5785_s12  ;;  %v7859_v15 = vpop.permute.xlu1 %2597 }
 0x3c0   : > { %v7892_v11 = vpop.permute.xlu0 %2615 }
 0x3c1   : > { %2751 = vrot.lane.b32.xlu0 %v7537_v53, %s5785_s12 }
 0x3c3   : > { %2757 = vrot.lane.b32.xlu1 %v7544_v7, %s5785_s12  ;;  %v7867_v6 = vpop.permute.xlu1 %2601 }
 0x3c5   : > { %2755 = vrot.lane.b32.xlu0 %v7547_v29, %s5785_s12 }
 0x3c7   : > { %2761 = vrot.lane.b32.xlu1 %v7554_v49, %s5785_s12  ;;  %v7875_v47 = vpop.permute.xlu1 %2605 }
 0x3c9   : > { %2759 = vrot.lane.b32.xlu0 %v7557_v56, %s5785_s12 }
 0x3cb   : > { %2765 = vrot.lane.b32.xlu1 %v7564_v45, %s5785_s12  ;;  %v7881_v36 = vpop.permute.xlu1 %2609 }
 0x3cc   : > { %v7904_v21 = vpop.permute.xlu0 %2619 }
 0x3cd   : > { %2763 = vrot.lane.b32.xlu0 %v7567_v16, %s5785_s12 }
 0x3cf   : > { %2769 = vrot.lane.b32.xlu1 %v7574_v63, %s5785_s12  ;;  %v7886_v38 = vpop.permute.xlu1 %2613 }
 0x3d1   : > { %2767 = vrot.lane.b32.xlu0 %v7577_v31, %s5785_s12 }
 0x3d3   : > { %2773 = vrot.lane.b32.xlu1 %v7584_v24, %s5785_s12  ;;  %v7890_v1 = vpop.permute.xlu1 %2617 }
 0x3d5   : > { %2771 = vrot.lane.b32.xlu0 %v7587_v44, %s5785_s12 }
 0x3d7   : > { %2777 = vrot.lane.b32.xlu1 %v7594_v3, %s5785_s12  ;;  %v7900_v54 = vpop.permute.xlu1 %2621 }
 0x3d8   : > { %v7918_v61 = vpop.permute.xlu0 %2623 }
 0x3d9   : > { %2775 = vrot.lane.b32.xlu0 %v7597_v18, %s5785_s12 }
 0x3db   : > { %2781 = vrot.lane.b32.xlu1 %v7604_v19, %s5785_s12  ;;  %v7914_v34 = vpop.permute.xlu1 %2625 }
 0x3dd   : > { %2779 = vrot.lane.b32.xlu0 %v7607_v14, %s5785_s12 }
 0x3df   : > { %2785 = vrot.lane.b32.xlu1 %v7614_v55, %s5785_s12 }
 0x3e1   : > { %2783 = vrot.lane.b32.xlu0 %v7617_v57, %s5785_s12 }
 0x3e2   : > { %v7928_v8 = vpop.permute.xlu1 %2629 }
 0x3e3   : > { %2789 = vrot.lane.b32.xlu1 %v7624_v43, %s5785_s12 }
 0x3e4   : > { %v7932_v37 = vpop.permute.xlu0 %2627 }
 0x3e5   : > { %2787 = vrot.lane.b32.xlu0 %v7627_v12, %s5785_s12 }
 0x3e7   : > { %2793 = vrot.lane.b32.xlu1 %v7634_v5, %s5785_s12 }
 0x3e9   : > { %2791 = vrot.lane.b32.xlu0 %v7637_v40, %s5785_s12 }
 0x3eb   : > { %2797 = vrot.lane.b32.xlu1 %v7644_v2, %s5785_s12 }
 0x3ed   : > { %2795 = vrot.lane.b32.xlu0 %v7647_v39, %s5785_s12 }
 0x3ee   : > { %v7942_v28 = vpop.permute.xlu1 %2633 }
 0x3ef   : > { %2801 = vrot.lane.b32.xlu1 %v7654_v59, %s5785_s12 }
 0x3f0   : > { %v7946_v22 = vpop.permute.xlu0 %2631 }
 0x3f1   : > { %2799 = vrot.lane.b32.xlu0 %v7657_v60, %s5785_s12 }
 0x3f3   : > { %2805 = vrot.lane.b32.xlu1 %v7664_v9, %s5785_s12 }
 0x3f5   : > { %2803 = vrot.lane.b32.xlu0 %v7667_v25, %s5785_s12 }
 0x3f7   : > { %2809 = vrot.lane.b32.xlu1 %v7674_v46, %s5785_s12 }
 0x3f9   : > { %2807 = vrot.lane.b32.xlu0 %v7677_v41, %s5785_s12  ;;  %v4194_v41 = vld [vmem:[%s8994_s4 + $0xf8] sm:$0xff] }
 0x3fa   : > { %v7956_v17 = vpop.permute.xlu1 %2637 }
 0x3fb   : > { %2813 = vrot.lane.b32.xlu1 %v7792_v10, %s5785_s12  ;;  %v2688_v10 = vmul.f32 %v7851_v27, %v7534_v20 }
 0x3fc   : > { %v7960_v62 = vpop.permute.xlu0 %2635 }
 0x3fd   : > { %2811 = vrot.lane.b32.xlu0 %v7795_v42, %s5785_s12  ;;  %v4163_v42 = vld [vmem:[%s8994_s4] sm:$0xff]  ;;  %v2720_v46 = vadd.f32 %v2688_v10, %v7534_v20 }
 0x3fe   : > { %v4191_v10 = vld [vmem:[%s8994_s4 + $0xe0] sm:$0xff] }
 0x401   : > { %5277 = vrot.lane.b32.xlu0 %v5276_v0, %s5786_s13  ;;  %v4170_v0 = vld [vmem:[%s8994_s4 + $0x38] sm:$0xff] }
 0x402   : > { %5231 = vmatpush1.msra.mxu1 %v4170_v0  ;;  %4319 = vmatpush1.msra.mxu0 %v4170_v0  ;;  %v4165_v0 = vld [vmem:[%s8994_s4 + $0x10] sm:$0xff] }
 0x403   : > { %5200 = vmatprep.subr.mxu1 %v9253_v58  ;;  %4320 = vmatprep.subr.mxu0 %v9253_v58 }
 0x404   : > { %5232 = vmatpush1.msra.mxu1 %v4169_v35  ;;  %4321 = vmatpush1.msra.mxu0 %v4169_v35 }
 0x405   : > { %5201 = vmatprep.subr.mxu1 %v9253_v58  ;;  %4322 = vmatprep.subr.mxu0 %v9253_v58 }
 0x406   : > { %v7970_v50 = vpop.permute.xlu1 %2641  ;;  %5233 = vmatpush1.msra.mxu1 %v4168_v32  ;;  %4323 = vmatpush1.msra.mxu0 %v4168_v32 }
 0x407   : > { %5202 = vmatprep.subr.mxu1 %v9253_v58  ;;  %4324 = vmatprep.subr.mxu0 %v9253_v58 }
 0x408   : > { %v7974_v51 = vpop.permute.xlu0 %2639  ;;  %5234 = vmatpush1.msra.mxu1 %v4167_v48  ;;  %4325 = vmatpush1.msra.mxu0 %v4167_v48  ;;  %v4164_v48 = vld [vmem:[%s8994_s4 + $0x8] sm:$0xff] }
 0x409   : > { %5203 = vmatprep.subr.mxu1 %v9253_v58  ;;  %4326 = vmatprep.subr.mxu0 %v9253_v58 }
 0x40a   : > { %5235 = vmatpush1.msra.mxu1 %v4166_v13  ;;  %4327 = vmatpush1.msra.mxu0 %v4166_v13 }
 0x40b   : > { %5204 = vmatprep.subr.mxu1 %v9253_v58  ;;  %4328 = vmatprep.subr.mxu0 %v9253_v58 }
 0x40c   : > { %5236 = vmatpush1.msra.mxu1 %v4165_v0  ;;  %4329 = vmatpush1.msra.mxu0 %v4165_v0 }
 0x40d   : > { %5205 = vmatprep.subr.mxu1 %v9253_v58  ;;  %4330 = vmatprep.subr.mxu0 %v9253_v58 }
 0x40e   : > { %5237 = vmatpush1.msra.mxu1 %v4164_v48  ;;  %4331 = vmatpush1.msra.mxu0 %v4164_v48  ;;  %v4193_v48 = vld [vmem:[%s8994_s4 + $0xf0] sm:$0xff] }
 0x40f   : > { %5206 = vmatprep.subr.mxu1 %v9253_v58  ;;  %4332 = vmatprep.subr.mxu0 %v9253_v58 }
 0x410   : > { %5238 = vmatpush1.msra.mxu1 %v4163_v42  ;;  %4333 = vmatpush1.msra.mxu0 %v4163_v42  ;;  %v2687_v42 = vmul.f32 %v7855_v52, %v7537_v53 }
 0x411   : > { %5207 = vmatprep.subr.mxu1 %v9253_v58  ;;  %4334 = vmatprep.subr.mxu0 %v9253_v58 }
 0x412   : > { %v7984_v35 = vpop.permute.xlu1 %2645  ;;  %5239 = vmatpush2.msra.mxu1 %v4194_v41  ;;  %4335 = vmatpush2.msra.mxu0 %v4194_v41  ;;  %v4192_v41 = vld [vmem:[%s8994_s4 + $0xe8] sm:$0xff] }
 0x413   : > { %5208 = vmatprep.subr.mxu1 %v9253_v58  ;;  %4336 = vmatprep.subr.mxu0 %v9253_v58 }
 0x414   : > { %v7988_v32 = vpop.permute.xlu0 %2643  ;;  %5240 = vmatpush2.msra.mxu1 %v4193_v48  ;;  %4337 = vmatpush2.msra.mxu0 %v4193_v48 }
 0x415   : > { %5209 = vmatprep.subr.mxu1 %v9253_v58  ;;  %4338 = vmatprep.subr.mxu0 %v9253_v58 }
 0x416   : > { %5241 = vmatpush2.msra.mxu1 %v4192_v41  ;;  %4339 = vmatpush2.msra.mxu0 %v4192_v41 }
 0x417   : > { %5210 = vmatprep.subr.mxu1 %v9253_v58  ;;  %4340 = vmatprep.subr.mxu0 %v9253_v58 }
 0x418   : > { %5242 = vmatpush2.msra.mxu1 %v4191_v10  ;;  %4341 = vmatpush2.msra.mxu0 %v4191_v10 }
 0x419   : > { %5211 = vmatprep.subr.mxu1 %v9253_v58  ;;  %4342 = vmatprep.subr.mxu0 %v9253_v58 }
 0x41e   : > { %v7998_v13 = vpop.permute.xlu1 %2649 }
 0x41f   : > { %9256 = vst [vmem:[#allocation37_spill] sm:$0xff] %v7998_v13 }
 0x420   : > { %v8002_v0 = vpop.permute.xlu0 %2647 }
 0x421   : > { %9257 = vst [vmem:[#allocation43_spill] sm:$0xff] %v8002_v0  ;;  %v2690_v0 = vmul.f32 %v7859_v15, %v7544_v7  ;;  %v2692_v15 = vmul.f32 %v7867_v6, %v7554_v49 }
 0x42d   : > { %v8014_v13 = vpop.permute.xlu1 %2653 }
 0x42e   : > { %9258 = vst [vmem:[#allocation40_spill] sm:$0xff] %v8014_v13  ;;  %v2719_v13 = vadd.f32 %v2687_v42, %v7537_v53  ;;  %v4190_v53 = vld [vmem:[%s8994_s4 + $0xd8] sm:$0xff]  ;;  %v2691_v42 = vmul.f32 %v7871_v30, %v7557_v56 }
 0x42f   : > { %v8020_v27 = vpop.permute.xlu0 %2651  ;;  %5243 = vmatpush2.msra.mxu1 %v4190_v53  ;;  %4343 = vmatpush2.msra.mxu0 %v4190_v53  ;;  %v2695_v53 = vmul.f32 %v7884_v4, %v7577_v31  ;;  %v4185_v4 = vld [vmem:[%s8994_s4 + $0xb0] sm:$0xff] }
 0x430   : > { %9259 = vst [vmem:[#allocation46_spill] sm:$0xff] %v8020_v27  ;;  %v2689_v27 = vmul.f32 %v7863_v23, %v7547_v29  ;;  %v2722_v23 = vadd.f32 %v2690_v0, %v7544_v7  ;;  %5212 = vmatprep.subr.mxu1 %v9253_v58  ;;  %v4189_v0 = vld [vmem:[%s8994_s4 + $0xd0] sm:$0xff]  ;;  %4344 = vmatprep.subr.mxu0 %v9253_v58 }
 0x431   : > { %v2754_v52 = vpop.permute.xlu1 %2753  ;;  %5244 = vmatpush2.msra.mxu1 %v4189_v0  ;;  %4345 = vmatpush2.msra.mxu0 %v4189_v0  ;;  %v2723_v10 = vadd.f32 %v2691_v42, %v7557_v56  ;;  %v4186_v56 = vld [vmem:[%s8994_s4 + $0xb8] sm:$0xff]  ;;  %v2698_v0 = vmul.f32 %v7886_v38, %v7584_v24  ;;  %v2697_v38 = vmul.f32 %v7888_v33, %v7587_v44 }
 0x432   : > { %v2848_v48 = vadd.f32 %v2754_v52, %v2720_v46  ;;  %v2694_v52 = vmul.f32 %v7875_v47, %v7564_v45  ;;  %5213 = vmatprep.subr.mxu1 %v9253_v58  ;;  %4346 = vmatprep.subr.mxu0 %v9253_v58  ;;  %v2700_v33 = vmul.f32 %v7890_v1, %v7594_v3 }
 0x433   : > { %v2752_v20 = vpop.permute.xlu0 %2751  ;;  %v2729_v1 = vadd.f32 %v2697_v38, %v7587_v44  ;;  %v2703_v38 = vmul.f32 %v7918_v61, %v7617_v57  ;;  %v2706_v61 = vmul.f32 %v7928_v8, %v7624_v43 }
 0x434   : > { %2881 = vst.msk [vmem:[#allocation3 + $0x21] sm:$0xff] %vm328_vm13, %v2848_v48  ;;  %v2847_v41 = vadd.f32 %v2752_v20, %v2719_v13  ;;  %v2721_v13 = vadd.f32 %v2689_v27, %v7547_v29  ;;  %v2724_v48 = vadd.f32 %v2692_v15, %v7554_v49  ;;  %v4188_v29 = vld [vmem:[%s8994_s4 + $0xc8] sm:$0xff]  ;;  %v2693_v20 = vmul.f32 %v7879_v26, %v7567_v16  ;;  %v4187_v15 = vld [vmem:[%s8994_s4 + $0xc0] sm:$0xff] }
 0x435   : > { %v2758_v46 = vpop.permute.xlu1 %2757  ;;  %5245 = vmatpush2.msra.mxu1 %v4188_v29  ;;  %4347 = vmatpush2.msra.mxu0 %v4188_v29  ;;  %v2727_v29 = vadd.f32 %v2695_v53, %v7577_v31 }
 0x436   : > { %2880 = vst.msk [vmem:[#allocation3 + $0x19] sm:$0xff] %vm328_vm13, %v2847_v41  ;;  %v2850_v6 = vadd.f32 %v2758_v46, %v2722_v23  ;;  %5214 = vmatprep.subr.mxu1 %v9253_v58  ;;  %4348 = vmatprep.subr.mxu0 %v9253_v58  ;;  %v2696_v41 = vmul.f32 %v7881_v36, %v7574_v63 }
 0x437   : > { %v2756_v7 = vpop.permute.xlu0 %2755  ;;  %v2726_v23 = vadd.f32 %v2694_v52, %v7564_v45  ;;  %5246 = vmatpush2.msra.mxu1 %v4187_v15  ;;  %4349 = vmatpush2.msra.mxu0 %v4187_v15  ;;  %v2725_v45 = vadd.f32 %v2693_v20, %v7567_v16  ;;  %v2730_v15 = vadd.f32 %v2698_v0, %v7584_v24 }
 0x438   : > { %2883 = vst.msk [vmem:[#allocation3 + $0x39] sm:$0xff] %vm328_vm13, %v2850_v6  ;;  %v2849_v30 = vadd.f32 %v2756_v7, %v2721_v13  ;;  %5215 = vmatprep.subr.mxu1 %v9253_v58  ;;  %4350 = vmatprep.subr.mxu0 %v9253_v58  ;;  %v2728_v16 = vadd.f32 %v2696_v41, %v7574_v63  ;;  %v4182_v41 = vld [vmem:[%s8994_s4 + $0x98] sm:$0xff] }
 0x439   : > { %v2762_v27 = vpop.permute.xlu1 %2761  ;;  %5247 = vmatpush2.msra.mxu1 %v4186_v56  ;;  %4351 = vmatpush2.msra.mxu0 %v4186_v56 }
 0x43a   : > { %2882 = vst.msk [vmem:[#allocation3 + $0x31] sm:$0xff] %vm328_vm13, %v2849_v30  ;;  %v2852_v47 = vadd.f32 %v2762_v27, %v2724_v48  ;;  %5216 = vmatprep.subr.mxu1 %v9253_v58  ;;  %4352 = vmatprep.subr.mxu0 %v9253_v58  ;;  %v4184_v30 = vld [vmem:[%s8994_s4 + $0xa8] sm:$0xff] }
 0x43b   : > { %v2760_v49 = vpop.permute.xlu0 %2759  ;;  %v2947_v6 = vld [vmem:[#allocation3 + $0x21] sm:$0xff]  ;;  %5248 = vmatpush2.msra.mxu1 %v4185_v4  ;;  %4353 = vmatpush2.msra.mxu0 %v4185_v4 }
 0x43c   : > { %2885 = vst.msk [vmem:[#allocation3 + $0x51] sm:$0xff] %vm328_vm13, %v2852_v47  ;;  %v2851_v26 = vadd.f32 %v2760_v49, %v2723_v10  ;;  %5217 = vmatprep.subr.mxu1 %v9253_v58  ;;  %4354 = vmatprep.subr.mxu0 %v9253_v58  ;;  %v4183_v10 = vld [vmem:[%s8994_s4 + $0xa0] sm:$0xff] }
 0x43d   : > { %v2766_v46 = vpop.permute.xlu1 %2765  ;;  %v2946_v42 = vld [vmem:[#allocation3 + $0x19] sm:$0xff]  ;;  %5249 = vmatpush2.msra.mxu1 %v4184_v30  ;;  %4355 = vmatpush2.msra.mxu0 %v4184_v30  ;;  %v4179_v30 = vld [vmem:[%s8994_s4 + $0x80] sm:$0xff] }
 0x43e   : > { %2884 = vst.msk [vmem:[#allocation3 + $0x49] sm:$0xff] %vm328_vm13, %v2851_v26  ;;  %v2854_v36 = vadd.f32 %v2766_v46, %v2726_v23  ;;  %v5281_v13 = vpack.i.bf16 %v2947_v6, %v2946_v42  ;;  %5218 = vmatprep.subr.mxu1 %v9253_v58  ;;  %v2699_v26 = vmul.f32 %v7892_v11, %v7597_v18  ;;  %v4181_v42 = vld [vmem:[%s8994_s4 + $0x90] sm:$0xff] }
 0x43f   : > { %v2764_v7 = vpop.permute.xlu0 %2763  ;;  %v8103_v20 = vld [vmem:[#allocation3 + $0x39] sm:$0xff]  ;;  %5250 = vmatpush2.msra.mxu1 %v4183_v10  ;;  %4356 = vmatprep.subr.mxu0 %v9253_v58  ;;  %v2702_v6 = vmul.f32 %v7900_v54, %v7604_v19  ;;  %v2701_v54 = vmul.f32 %v7904_v21, %v7607_v14  ;;  %v2704_v21 = vmul.f32 %v7914_v34, %v7614_v55 }
 0x440   : > { %2887 = vst.msk [vmem:[#allocation3 + $0x69] sm:$0xff] %vm328_vm13, %v2854_v36  ;;  %v2853_v52 = vadd.f32 %v2764_v7, %v2725_v45  ;;  %5282 = vrot.lane.b32.xlu1 %v5281_v13, %s5786_s13  ;;  %5219 = vmatprep.subr.mxu1 %v9253_v58  ;;  %v2732_v36 = vadd.f32 %v2700_v33, %v7594_v3  ;;  %v4180_v45 = vld [vmem:[%s8994_s4 + $0x88] sm:$0xff] }
 0x441   : > { %v2770_v48 = vpop.permute.xlu1 %2769  ;;  %v8101_v27 = vld [vmem:[#allocation3 + $0x31] sm:$0xff]  ;;  %5251 = vmatpush2.msra.mxu1 %v4182_v41  ;;  %4357 = vmatpush2.msra.mxu0 %v4183_v10  ;;  %v2731_v7 = vadd.f32 %v2699_v26, %v7597_v18  ;;  %v2733_v33 = vadd.f32 %v2701_v54, %v7607_v14  ;;  %v2736_v14 = vadd.f32 %v2704_v21, %v7614_v55 }
 0x442   : > { %2886 = vst.msk [vmem:[#allocation3 + $0x61] sm:$0xff] %vm328_vm13, %v2853_v52  ;;  %v2856_v63 = vadd.f32 %v2770_v48, %v2728_v16  ;;  %v5286_v47 = vpack.i.bf16 %v8103_v20, %v8101_v27  ;;  %5220 = vmatprep.subr.mxu1 %v9253_v58  ;;  %4358 = vmatprep.subr.mxu0 %v9253_v58 }
 0x443   : > { %v2768_v31 = vpop.permute.xlu0 %2767  ;;  %v8128_v53 = vld [vmem:[#allocation3 + $0x51] sm:$0xff]  ;;  %5252 = vmatpush2.msra.mxu1 %v4181_v42  ;;  %4359 = vmatpush2.msra.mxu0 %v4182_v41 }
 0x444   : > { %2889 = vst.msk [vmem:[#allocation3 + $0x81] sm:$0xff] %vm328_vm13, %v2856_v63  ;;  %v2855_v49 = vadd.f32 %v2768_v31, %v2727_v29  ;;  %5287 = vrot.lane.b32.xlu0 %v5286_v47, %s5786_s13  ;;  %5221 = vmatprep.subr.mxu1 %v9253_v58  ;;  %v2734_v29 = vadd.f32 %v2702_v6, %v7604_v19 }
 0x445   : > { %v2774_v23 = vpop.permute.xlu1 %2773  ;;  %v8126_v56 = vld [vmem:[#allocation3 + $0x49] sm:$0xff]  ;;  %5253 = vmatpush2.msra.mxu1 %v4180_v45  ;;  %4360 = vmatprep.subr.mxu0 %v9253_v58 }
 0x446   : > { %2888 = vst.msk [vmem:[#allocation3 + $0x79] sm:$0xff] %vm328_vm13, %v2855_v49  ;;  %v2858_v24 = vadd.f32 %v2774_v23, %v2730_v15  ;;  %v5291_v46 = vpack.i.bf16 %v8128_v53, %v8126_v56  ;;  %5222 = vmatprep.subr.mxu1 %v9253_v58  ;;  %4361 = vmatpush2.msra.mxu0 %v4181_v42 }
 0x447   : > { %v2772_v11 = vpop.permute.xlu0 %2771  ;;  %v8152_v0 = vld [vmem:[#allocation3 + $0x69] sm:$0xff]  ;;  %5254 = vmatpush2.msra.mxu1 %v4179_v30  ;;  %4362 = vmatprep.subr.mxu0 %v9253_v58 }
 0x448   : > { %2891 = vst.msk [vmem:[#allocation3 + $0x99] sm:$0xff] %vm328_vm13, %v2858_v24  ;;  %v2857_v44 = vadd.f32 %v2772_v11, %v2729_v1  ;;  %5292 = vrot.lane.b32.xlu1 %v5291_v46, %s5786_s13  ;;  %v8174_v47 = vld [vmem:[#allocation3 + $0x6a] sm:$0xff]  ;;  %4363 = vmatpush2.msra.mxu0 %v4180_v45  ;;  %v2735_v24 = vadd.f32 %v2703_v38, %v7617_v57 }
 0x449   : > { %v2778_v13 = vpop.permute.xlu1 %2777  ;;  %v8150_v4 = vld [vmem:[#allocation3 + $0x61] sm:$0xff]  ;;  %4364 = vmatprep.subr.mxu0 %v9253_v58  ;;  %v8193_v46 = vld [vmem:[#allocation3 + $0x4a] sm:$0xff]  ;;  %v2705_v58 = vmul.f32 %v7932_v37, %v7627_v12  ;;  %v2708_v57 = vmul.f32 %v7942_v28, %v7634_v5  ;;  %v2738_v37 = vadd.f32 %v2706_v61, %v7624_v43 }
 0x44a   : > { %2890 = vst.msk [vmem:[#allocation3 + $0x91] sm:$0xff] %vm328_vm13, %v2857_v44  ;;  %v2860_v3 = vadd.f32 %v2778_v13, %v2732_v36  ;;  %v5296_v52 = vpack.i.bf16 %v8152_v0, %v8150_v4  ;;  %v8161_v16 = vld [vmem:[#allocation3 + $0x62] sm:$0xff]  ;;  %4365 = vmatpush2.msra.mxu0 %v4179_v30  ;;  %v2707_v36 = vmul.f32 %v7946_v22, %v7637_v40 }
 0x44b   : > { %v2776_v18 = vpop.permute.xlu0 %2775  ;;  %v2955_v10 = vld [vmem:[#allocation3 + $0x81] sm:$0xff]  ;;  %v5306_v49 = vpack.i.bf16 %v8174_v47, %v8161_v16  ;;  %v2737_v54 = vadd.f32 %v2705_v58, %v7627_v12  ;;  %v2710_v22 = vmul.f32 %v7956_v17, %v7644_v2  ;;  %v2740_v12 = vadd.f32 %v2708_v57, %v7634_v5 }
 0x44c   : > { %2893 = vst.msk [vmem:[#allocation3 + $0xb1] sm:$0xff] %vm328_vm13, %v2860_v3  ;;  %v2859_v48 = vadd.f32 %v2776_v18, %v2731_v7  ;;  %5297 = vrot.lane.b32.xlu0 %v5296_v52, %s5786_s13  ;;  %v8191_v1 = vld [vmem:[#allocation3 + $0x60] sm:$0xff]  ;;  %v8211_v13 = vld [vmem:[#allocation3 + $0x68] sm:$0xff]  ;;  %v8213_v7 = vld [vmem:[#allocation3 + $0x52] sm:$0xff] }
 0x44d   : > { %v2782_v63 = vpop.permute.xlu1 %2781  ;;  %v2954_v31 = vld [vmem:[#allocation3 + $0x79] sm:$0xff]  ;;  %v5326_v3 = vpack.i.bf16 %v8211_v13, %v2955_v10  ;;  %v8231_v38 = vld [vmem:[#allocation3 + $0x82] sm:$0xff] }
 0x44e   : > { %2892 = vst.msk [vmem:[#allocation3 + $0xa9] sm:$0xff] %vm328_vm13, %v2859_v48  ;;  %v2862_v34 = vadd.f32 %v2782_v63, %v2734_v29  ;;  %v5301_v19 = vpack.i.bf16 %v2955_v10, %v2954_v31  ;;  %v8181_v41 = vld [vmem:[#allocation3 + $0x78] sm:$0xff]  ;;  %v5316_v11 = vpack.i.bf16 %v8191_v1, %v2954_v31  ;;  %v8201_v6 = vld [vmem:[#allocation3 + $0x80] sm:$0xff]  ;;  %v2739_v29 = vadd.f32 %v2707_v36, %v7637_v40 }
 0x44f   : > { %v2780_v15 = vpop.permute.xlu0 %2779  ;;  %v5311_v42 = vpack.i.bf16 %v8193_v46, %v8181_v41  ;;  %v5321_v52 = vpack.i.bf16 %v8213_v7, %v8201_v6  ;;  %v8220_v43 = vld [vmem:[#allocation3 + $0x7a] sm:$0xff]  ;;  %v2709_v63 = vmul.f32 %v7960_v62, %v7647_v39  ;;  %v2712_v40 = vmul.f32 %v7970_v50, %v7654_v59  ;;  %v2976_v57 = vld [vmem:[#allocation3 + $0x2] sm:$0xff] }
 0x450   : > { %2895 = vst.msk [vmem:[#allocation3 + $0xc9] sm:$0xff] %vm328_vm13, %v2862_v34  ;;  %v2861_v26 = vadd.f32 %v2780_v15, %v2733_v33  ;;  %5307 = vrot.lane.b32.xlu0 %v5306_v49, %s5786_s13  ;;  %5302 = vrot.lane.b32.xlu1 %v5301_v19, %s5786_s13  ;;  %v5331_v31 = vpack.i.bf16 %v8231_v38, %v8220_v43 }
 0x451   : > { %v2786_v23 = vpop.permute.xlu1 %2785  ;;  %v8222_v30 = vld [vmem:[#allocation3 + $0x90] sm:$0xff]  ;;  %v8242_v5 = vld [vmem:[#allocation3 + $0x98] sm:$0xff]  ;;  %v2742_v49 = vadd.f32 %v2710_v22, %v7644_v2  ;;  %v2741_v61 = vadd.f32 %v2709_v63, %v7647_v39  ;;  %v2714_v2 = vmul.f32 %v7984_v35, %v7664_v9  ;;  %v2744_v39 = vadd.f32 %v2712_v40, %v7654_v59  ;;  %v9267_v40 = vld [vmem:[#allocation46_spill] sm:$0xff] }
 0x452   : > { %2894 = vst.msk [vmem:[#allocation3 + $0xc1] sm:$0xff] %vm328_vm13, %v2861_v26  ;;  %v2864_v8 = vadd.f32 %v2786_v23, %v2736_v14  ;;  %v5336_v10 = vpack.i.bf16 %v8161_v16, %v8222_v30  ;;  %v8240_v33 = vld [vmem:[#allocation3 + $0x91] sm:$0xff]  ;;  %v2711_v16 = vmul.f32 %v7974_v51, %v7657_v60  ;;  %v5346_v26 = vpack.i.bf16 %v8174_v47, %v8242_v5  ;;  %v8258_v23 = vld [vmem:[#allocation3 + $0x99] sm:$0xff] }
 0x453   : > { %v2784_v55 = vpop.permute.xlu0 %2783  ;;  %v5341_v50 = vpack.i.bf16 %v8181_v41, %v8240_v33  ;;  %v3072_v47 = vld [vmem:[#allocation3 + $0x1a] sm:$0xff]  ;;  %v5351_v35 = vpack.i.bf16 %v8201_v6, %v8258_v23  ;;  %v9263_v6 = vld [vmem:[#allocation43_spill] sm:$0xff]  ;;  %v5366_v22 = vpack.i.bf16 %v8220_v43, %v2976_v57  ;;  %v9265_v63 = vld [vmem:[#allocation40_spill] sm:$0xff] }
 0x454   : > { %2897 = vst.msk [vmem:[#allocation3 + $0xe1] sm:$0xff] %vm328_vm13, %v2864_v8  ;;  %v2863_v44 = vadd.f32 %v2784_v55, %v2735_v24  ;;  %5317 = vrot.lane.b32.xlu0 %v5316_v11, %s5784_s11  ;;  %5312 = vrot.lane.b32.xlu1 %v5311_v42, %s5785_s12  ;;  %v3082_v24 = vld [vmem:[#allocation3 + $0x92] sm:$0xff]  ;;  %v2743_v58 = vadd.f32 %v2711_v16, %v7657_v60 }
 0x455   : > { %v2790_v45 = vpop.permute.xlu1 %2789  ;;  %v2713_v8 = vmul.f32 %v7988_v32, %v7667_v25  ;;  %v8272_v42 = vpack.i.bf16 %v3082_v24, %v3072_v47  ;;  %v9261_v59 = vld [vmem:[#allocation37_spill] sm:$0xff]  ;;  %v2746_v32 = vadd.f32 %v2714_v2, %v7664_v9  ;;  %v3084_v57 = vld [vmem:[#allocation3 + $0xaa] sm:$0xff] }
 0x456   : > { %2896 = vst.msk [vmem:[#allocation3 + $0xd9] sm:$0xff] %vm328_vm13, %v2863_v44  ;;  %v2866_v28 = vadd.f32 %v2790_v45, %v2738_v37  ;;  %v3115_v44 = vld [vmem:[#allocation3 + $0xa8] sm:$0xff]  ;;  %v9260_v37 = vld [vmem:[#allocation21_spill] sm:$0xff]  ;;  %v9262_v45 = vld [vmem:[#allocation24_spill] sm:$0xff] }
 0x457   : > { %v2788_v18 = vpop.permute.xlu0 %2787  ;;  %v2716_v36 = vmul.f32 %v9261_v59, %v9260_v37  ;;  %v3106_v2 = vld [vmem:[#allocation3 + $0x38] sm:$0xff] }
 0x458   : > { %2899 = vst.msk [vmem:[#allocation3 + $0xf9] sm:$0xff] %vm328_vm13, %v2866_v28  ;;  %v2865_v21 = vadd.f32 %v2788_v18, %v2737_v54  ;;  %5327 = vrot.lane.b32.xlu0 %v5326_v3, %s5784_s11  ;;  %5322 = vrot.lane.b32.xlu1 %v5321_v52, %s5785_s12  ;;  %v2715_v28 = vmul.f32 %v9263_v6, %v9262_v45  ;;  %v3105_v3 = vld [vmem:[#allocation3 + $0x30] sm:$0xff] }
 0x459   : > { %v2794_v48 = vpop.permute.xlu1 %2793  ;;  %v2745_v18 = vadd.f32 %v2713_v8, %v7667_v25  ;;  %v2748_v25 = vadd.f32 %v2716_v36, %v9260_v37  ;;  %v8310_v47 = vld [vmem:[#allocation3 + $0xb1] sm:$0xff]  ;;  %v3149_v6 = vld [vmem:[#allocation3 + $0xc1] sm:$0xff] }
 0x45a   : > { %2898 = vst.msk [vmem:[#allocation3 + $0xf1] sm:$0xff] %vm328_vm13, %v2865_v21  ;;  %v2868_v17 = vadd.f32 %v2794_v48, %v2740_v12  ;;  %v8286_v21 = vpack.i.bf16 %v3115_v44, %v3105_v3  ;;  %v8288_v48 = vld [vmem:[#allocation3 + $0xa9] sm:$0xff]  ;;  %v2747_v43 = vadd.f32 %v2715_v28, %v9262_v45  ;;  %v3009_v44 = vld [vmem:[#allocation3 + $0x20] sm:$0xff]  ;;  %v3074_v37 = vld [vmem:[#allocation3 + $0x32] sm:$0xff] }
 0x45b   : > { %v2792_v34 = vpop.permute.xlu0 %2791  ;;  %v2977_v8 = vld [vmem:[#allocation3 + $0xa] sm:$0xff]  ;;  %v5401_v59 = vpack.i.bf16 %v8242_v5, %v3009_v44  ;;  %v5406_v36 = vpack.i.bf16 %v3084_v57, %v3074_v37  ;;  %v5426_v5 = vpack.i.bf16 %v3149_v6, %v8126_v56  ;;  %v3085_v28 = vld [vmem:[#allocation3 + $0xb2] sm:$0xff] }
 0x45c   : > { %2901 = vst.msk [vmem:[#allocation3 + $0x111] sm:$0xff] %vm328_vm13, %v2868_v17  ;;  %v2867_v62 = vadd.f32 %v2792_v34, %v2739_v29  ;;  %5332 = vrot.lane.b32.xlu1 %v5331_v31, %s5786_s13  ;;  %5337 = vrot.lane.b32.xlu0 %v5336_v10, %s5785_s12  ;;  %v9264_v29 = vld [vmem:[#allocation27_spill] sm:$0xff]  ;;  %v3008_v10 = vld [vmem:[#allocation3 + $0x18] sm:$0xff]  ;;  %v9266_v34 = vld [vmem:[#allocation30_spill] sm:$0xff] }
 0x45d   : > { %v2798_v19 = vpop.permute.xlu1 %2797  ;;  %v2718_v9 = vmul.f32 %v9265_v63, %v9264_v29  ;;  %v5376_v16 = vpack.i.bf16 %v8222_v30, %v3008_v10  ;;  %v8324_v45 = vld [vmem:[#allocation3 + $0x48] sm:$0xff] }
 0x45e   : > { %2900 = vst.msk [vmem:[#allocation3 + $0x109] sm:$0xff] %vm328_vm13, %v2867_v62  ;;  %v2870_v15 = vadd.f32 %v2798_v19, %v2742_v49  ;;  %v2717_v62 = vmul.f32 %v9267_v40, %v9266_v34  ;;  %v5371_v19 = vpack.i.bf16 %v8288_v48, %v8101_v27  ;;  %v3118_v3 = vld [vmem:[#allocation3 + $0xc8] sm:$0xff] }
 0x45f   : > { %v2796_v14 = vpop.permute.xlu0 %2795 }
 0x460   : > { %2903 = vst.msk [vmem:[#allocation3 + $0x129] sm:$0xff] %vm328_vm13, %v2870_v15  ;;  %v2869_v51 = vadd.f32 %v2796_v14, %v2741_v61  ;;  %5342 = vrot.lane.b32.xlu1 %v5341_v50, %s5784_s11  ;;  %5347 = vrot.lane.b32.xlu0 %v5346_v26, %s5785_s12  ;;  %v3116_v61 = vld [vmem:[#allocation3 + $0xb0] sm:$0xff]  ;;  %v3083_v50 = vld [vmem:[#allocation3 + $0x9a] sm:$0xff]  ;;  %v2750_v14 = vadd.f32 %v2718_v9, %v9264_v29 }
 0x461   : > { %v2802_v41 = vpop.permute.xlu1 %2801  ;;  %v2749_v27 = vadd.f32 %v2717_v62, %v9266_v34  ;;  %v3151_v29 = vld [vmem:[#allocation3 + $0xd9] sm:$0xff]  ;;  %v3152_v9 = vld [vmem:[#allocation3 + $0xe1] sm:$0xff]  ;;  %v3153_v10 = vld [vmem:[#allocation3 + $0xf1] sm:$0xff] }
 0x462   : > { %2902 = vst.msk [vmem:[#allocation3 + $0x121] sm:$0xff] %vm328_vm13, %v2869_v51  ;;  %v2872_v11 = vadd.f32 %v2802_v41, %v2744_v39  ;;  %v3073_v51 = vld [vmem:[#allocation3 + $0x22] sm:$0xff]  ;;  %v5386_v39 = vpack.i.bf16 %v3116_v61, %v3106_v2  ;;  %v3121_v34 = vld [vmem:[#allocation3 + $0xf0] sm:$0xff]  ;;  %v3122_v62 = vld [vmem:[#allocation3 + $0xf8] sm:$0xff] }
 0x463   : > { %v2800_v55 = vpop.permute.xlu0 %2799  ;;  %v5381_v41 = vpack.i.bf16 %v3083_v50, %v3073_v51 }
 0x464   : > { %2905 = vst.msk [vmem:[#allocation3 + $0x141] sm:$0xff] %vm328_vm13, %v2872_v11  ;;  %v2871_v60 = vadd.f32 %v2800_v55, %v2743_v58  ;;  %5352 = vrot.lane.b32.xlu1 %v5351_v35, %s5784_s11  ;;  %5357 = vrot.lane.b32.xlu0 %v8272_v42, %s5786_s13  ;;  %v5396_v35 = vpack.i.bf16 %v8310_v47, %v8103_v20 }
 0x465   : > { %v2806_v54 = vpop.permute.xlu1 %2805  ;;  %v5391_v55 = vpack.i.bf16 %v8231_v38, %v2977_v8  ;;  %v3124_v51 = vld [vmem:[#allocation3 + $0x110] sm:$0xff] }
 0x466   : > { %2904 = vst.msk [vmem:[#allocation3 + $0x139] sm:$0xff] %vm328_vm13, %v2871_v60  ;;  %v2874_v52 = vadd.f32 %v2806_v54, %v2746_v32  ;;  %v3117_v60 = vld [vmem:[#allocation3 + $0xc0] sm:$0xff]  ;;  %v5436_v54 = vpack.i.bf16 %v8258_v23, %v3085_v28  ;;  %v5466_v23 = vpack.i.bf16 %v8213_v7, %v8288_v48  ;;  %v3087_v48 = vld [vmem:[#allocation3 + $0xca] sm:$0xff] }
 0x467   : > { %v2804_v12 = vpop.permute.xlu0 %2803  ;;  %v3075_v32 = vld [vmem:[#allocation3 + $0x3a] sm:$0xff]  ;;  %v5416_v38 = vpack.i.bf16 %v3117_v60, %v8324_v45  ;;  %v5491_v63 = vpack.i.bf16 %v8310_v47, %v3087_v48  ;;  %v8384_v47 = vld [vmem:[#allocation3 + $0x10a] sm:$0xff] }
 0x468   : > { %2907 = vst.msk [vmem:[#allocation3 + $0x159] sm:$0xff] %vm328_vm13, %v2874_v52  ;;  %v2873_v17 = vadd.f32 %v2804_v12, %v2745_v18  ;;  %5367 = vrot.lane.b32.xlu0 %v5366_v22, %s5785_s12  ;;  %5362 = vrot.lane.b32.xlu1 %v8286_v21, %s5785_s12  ;;  %v5411_v20 = vpack.i.bf16 %v3075_v32, %v8240_v33  ;;  %v8338_v33 = vld [vmem:[#allocation3 + $0x50] sm:$0xff]  ;;  %v3120_v7 = vld [vmem:[#allocation3 + $0xe0] sm:$0xff] }
 0x469   : > { %v2810_v31 = vpop.permute.xlu1 %2809  ;;  %v5441_v52 = vpack.i.bf16 %v3118_v3, %v8338_v33  ;;  %v3150_v18 = vld [vmem:[#allocation3 + $0xc9] sm:$0xff]  ;;  %v8394_v57 = vld [vmem:[#allocation3 + $0x121] sm:$0xff] }
 0x46a   : > { %2906 = vst.msk [vmem:[#allocation3 + $0x151] sm:$0xff] %vm328_vm13, %v2873_v17  ;;  %v2876_v49 = vadd.f32 %v2810_v31, %v2748_v25  ;;  %v5451_v56 = vpack.i.bf16 %v3150_v18, %v8128_v53  ;;  %v8355_v53 = vld [vmem:[%s8994_s4 + $0x118] sm:$0xff]  ;;  %v5506_v17 = vpack.i.bf16 %v3152_v9, %v8152_v0  ;;  %v5501_v25 = vpack.i.bf16 %v3085_v28, %v3075_v32  ;;  %v3088_v31 = vld [vmem:[#allocation3 + $0xda] sm:$0xff] }
 0x46b   : > { %v2808_v15 = vpop.permute.xlu0 %2807  ;;  %5135 = vmatprep.subr.mxu0 %v8355_v53  ;;  %v5536_v0 = vpack.i.bf16 %v3087_v48, %v3122_v62  ;;  %v3125_v44 = vld [vmem:[#allocation3 + $0x120] sm:$0xff]  ;;  %v8401_v32 = vld [vmem:[#allocation3 + $0x128] sm:$0xff] }
 0x46c   : > { %2909 = vst.msk [vmem:[#allocation3 + $0x171] sm:$0xff] %vm328_vm13, %v2876_v49  ;;  %v2875_v26 = vadd.f32 %v2808_v15, %v2747_v43  ;;  %5377 = vrot.lane.b32.xlu0 %v5376_v16, %s5784_s11  ;;  %5372 = vrot.lane.b32.xlu1 %v5371_v19, %s5784_s11  ;;  %v5516_v43 = vpack.i.bf16 %v3149_v6, %v3088_v31  ;;  %v3089_v49 = vld [vmem:[#allocation3 + $0xe2] sm:$0xff]  ;;  %v3154_v19 = vld [vmem:[#allocation3 + $0xf9] sm:$0xff] }
 0x46d   : > { %v2814_v24 = vpop.permute.xlu1 %2813  ;;  %v5531_v16 = vpack.i.bf16 %v3150_v18, %v3089_v49  ;;  %v3090_v15 = vld [vmem:[#allocation3 + $0xf2] sm:$0xff]  ;;  %v5541_v61 = vpack.i.bf16 %v3120_v7, %v3154_v19  ;;  %v8413_v3 = vld [vmem:[#allocation3 + $0x122] sm:$0xff] }
 0x46e   : > { %2908 = vst.msk [vmem:[#allocation3 + $0x169] sm:$0xff] %vm328_vm13, %v2875_v26  ;;  %v2878_v30 = vadd.f32 %v2814_v24, %v2750_v14  ;;  %v5546_v50 = vpack.i.bf16 %v3151_v29, %v3090_v15  ;;  %v3155_v26 = vld [vmem:[#allocation3 + $0x109] sm:$0xff]  ;;  %v5581_v60 = vpack.i.bf16 %v3090_v15, %v3125_v44  ;;  %v8421_v48 = vld [vmem:[#allocation3 + $0x138] sm:$0xff] }
 0x46f   : > { %v2812_v58 = vpop.permute.xlu0 %2811  ;;  %v3123_v14 = vld [vmem:[#allocation3 + $0x108] sm:$0xff]  ;;  %v5556_v24 = vpack.i.bf16 %v3121_v34, %v3155_v26 }
 0x470   : > { %2911 = vst.msk [vmem:[#allocation3 + $0x189] sm:$0xff] %vm328_vm13, %v2878_v30  ;;  %v2877_v11 = vadd.f32 %v2812_v58, %v2749_v27  ;;  %5387 = vrot.lane.b32.xlu0 %v5386_v39, %s5785_s12  ;;  %5382 = vrot.lane.b32.xlu1 %v5381_v41, %s5786_s13  ;;  %v5551_v2 = vpack.i.bf16 %v3088_v31, %v3123_v14  ;;  %v3091_v30 = vld [vmem:[#allocation3 + $0xfa] sm:$0xff]  ;;  %v8382_v58 = vld [vmem:[#allocation3 + $0x111] sm:$0xff] }
 0x471   : > { %v8438_v15 = vld [vmem:[#allocation3 + $0x12a] sm:$0xff] }
 0x472   : > { %2910 = vst.msk [vmem:[#allocation3 + $0x181] sm:$0xff] %vm328_vm13, %v2877_v11 }
 0x473   : > { %v8378_v27 = vpop.permute.xlu0 %5277 }
 0x474   : > { %5397 = vrot.lane.b32.xlu0 %v5396_v35, %s5784_s11  ;;  %5392 = vrot.lane.b32.xlu1 %v5391_v55, %s5785_s12  ;;  %v5571_v35 = vpack.i.bf16 %v3122_v62, %v8382_v58  ;;  %v5576_v55 = vpack.i.bf16 %v3153_v10, %v8384_v47 }
 0x478   : > { %5402 = vrot.lane.b32.xlu1 %v5401_v59, %s5784_s11  ;;  %5407 = vrot.lane.b32.xlu0 %v5406_v36, %s5786_s13 }
 0x47c   : > { %5412 = vrot.lane.b32.xlu1 %v5411_v20, %s5786_s13  ;;  %5417 = vrot.lane.b32.xlu0 %v5416_v38, %s5785_s12  ;;  %v8403_v20 = vld [vmem:[#allocation3 + $0x112] sm:$0xff] }
 0x47d   : > { %v5591_v28 = vpack.i.bf16 %v3154_v19, %v8403_v20  ;;  %v8436_v19 = vld [vmem:[#allocation3 + $0x140] sm:$0xff] }
 0x480   : > { %5422 = vrot.lane.b32.xlu1 %v8272_v42, %s5785_s12  ;;  %5427 = vrot.lane.b32.xlu0 %v5426_v5, %s5784_s11  ;;  %v3086_v42 = vld [vmem:[#allocation3 + $0xc2] sm:$0xff]  ;;  %v5596_v5 = vpack.i.bf16 %v3091_v30, %v8401_v32 }
 0x481   : > { %v5461_v22 = vpack.i.bf16 %v3086_v42, %v8193_v46  ;;  %v5481_v46 = vpack.i.bf16 %v3151_v29, %v8150_v4  ;;  %v5521_v40 = vpack.i.bf16 %v3086_v42, %v3121_v34 }
 0x484   : > { %5432 = vrot.lane.b32.xlu1 %v8286_v21, %s5784_s11  ;;  %5437 = vrot.lane.b32.xlu0 %v5436_v54, %s5786_s13  ;;  %v3119_v21 = vld [vmem:[#allocation3 + $0xd8] sm:$0xff]  ;;  %v8411_v54 = vld [vmem:[#allocation3 + $0x129] sm:$0xff] }
 0x485   : > { %v5471_v12 = vpack.i.bf16 %v3119_v21, %v8191_v1  ;;  %v5496_v1 = vpack.i.bf16 %v3120_v7, %v8211_v13  ;;  %v5526_v13 = vpack.i.bf16 %v3119_v21, %v3153_v10  ;;  %v8419_v7 = vld [vmem:[#allocation3 + $0x139] sm:$0xff] }
 0x488   : > { %5442 = vrot.lane.b32.xlu1 %v5441_v52, %s5785_s12  ;;  %5447 = vrot.lane.b32.xlu0 %v5381_v41, %s5785_s12  ;;  %v5561_v41 = vpack.i.bf16 %v3152_v9, %v3091_v30  ;;  %v5626_v30 = vpack.i.bf16 %v8403_v20, %v8436_v19 }
 0x48c   : > { %5452 = vrot.lane.b32.xlu1 %v5451_v56, %s5784_s11  ;;  %5457 = vrot.lane.b32.xlu0 %v5386_v39, %s5784_s11  ;;  %v5566_v39 = vpack.i.bf16 %v3089_v49, %v3124_v51 }
 0x490   : > { %5467 = vrot.lane.b32.xlu0 %v5466_v23, %s5786_s13  ;;  %5462 = vrot.lane.b32.xlu1 %v5461_v22, %s5786_s13  ;;  %v5601_v23 = vpack.i.bf16 %v3124_v51, %v8411_v54  ;;  %v5606_v22 = vpack.i.bf16 %v3155_v26, %v8413_v3 }
 0x494   : > { %5477 = vrot.lane.b32.xlu0 %v5406_v36, %s5785_s12  ;;  %5472 = vrot.lane.b32.xlu1 %v5471_v12, %s5785_s12  ;;  %v5586_v36 = vpack.i.bf16 %v3123_v14, %v8394_v57 }
 0x498   : > { %5487 = vrot.lane.b32.xlu0 %v5416_v38, %s5784_s11  ;;  %5482 = vrot.lane.b32.xlu1 %v5481_v46, %s5784_s11 }
 0x49c   : > { %5497 = vrot.lane.b32.xlu0 %v5496_v1, %s5785_s12  ;;  %5492 = vrot.lane.b32.xlu1 %v5491_v63, %s5786_s13 }
 0x4a0   : > { %5507 = vrot.lane.b32.xlu0 %v5506_v17, %s5784_s11  ;;  %5502 = vrot.lane.b32.xlu1 %v5501_v25, %s5785_s12 }
 0x4a4   : > { %5512 = vrot.lane.b32.xlu1 %v5441_v52, %s5784_s11  ;;  %5517 = vrot.lane.b32.xlu0 %v5516_v43, %s5786_s13 }
 0x4a8   : > { %5527 = vrot.lane.b32.xlu0 %v5526_v13, %s5784_s11  ;;  %5522 = vrot.lane.b32.xlu1 %v5521_v40, %s5785_s12  ;;  %v5616_v13 = vpack.i.bf16 %v3125_v44, %v8419_v7  ;;  %v5611_v40 = vpack.i.bf16 %v8384_v47, %v8421_v48 }
 0x4ac   : > { %5537 = vrot.lane.b32.xlu0 %v5536_v0, %s5785_s12  ;;  %5532 = vrot.lane.b32.xlu1 %v5531_v16, %s5786_s13 }
 0x4b0   : > { %5542 = vrot.lane.b32.xlu1 %v5541_v61, %s5784_s11  ;;  %5547 = vrot.lane.b32.xlu0 %v5546_v50, %s5786_s13 }
 0x4b2   : > { %v8388_v8 = vpop.permute.xlu1 %5282 }
 0x4b4   : > { %5557 = vrot.lane.b32.xlu0 %v5556_v24, %s5784_s11  ;;  %5552 = vrot.lane.b32.xlu1 %v5551_v2, %s5785_s12 }
 0x4b6   : > { %v8390_v11 = vpop.permute.xlu0 %5287 }
 0x4b8   : > { %5567 = vrot.lane.b32.xlu0 %v5566_v39, %s5785_s12  ;;  %5562 = vrot.lane.b32.xlu1 %v5561_v41, %s5786_s13  ;;  %v5621_v39 = vpack.i.bf16 %v8382_v58, %v8438_v15 }
 0x4ba   : > { %v5293_v37 = vpop.permute.xlu1 %5292 }
 0x4bb   : > { %v5294_v52 = vunpack.i.l.bf16 %v5293_v37  ;;  %v5295_v1 = vunpack.i.h.bf16 %v5293_v37 }
 0x4bc   : > { %5572 = vrot.lane.b32.xlu1 %v5571_v35, %s5784_s11  ;;  %5577 = vrot.lane.b32.xlu0 %v5576_v55, %s5786_s13  ;;  %v8454_v35 = vld [vmem:[#allocation3 + $0x141] sm:$0xff] }
 0x4bd   : > { %v3975_v17 = vsel %vm328_vm13, %v8324_v45, %v5294_v52  ;;  %v3047_v45 = vld [vmem:[#allocation3 + $0x69] sm:$0xff]  ;;  %v3976_v50 = vsel %vm328_vm13, %v8338_v33, %v5295_v1  ;;  %v8456_v55 = vld [vmem:[#allocation3 + $0x13a] sm:$0xff] }
 0x4be   : > { %v8398_v59 = vpop.permute.xlu0 %5297  ;;  %v2920_v52 = vld [vmem:[#allocation3 + $0x60] sm:$0xff] }
 0x4bf   : > { %v5299_v47 = vunpack.i.l.bf16 %v8398_v59 }
 0x4c0   : > { %5587 = vrot.lane.b32.xlu0 %v5586_v36, %s5784_s11  ;;  %5582 = vrot.lane.b32.xlu1 %v5581_v60, %s5785_s12  ;;  %v3048_v36 = vld [vmem:[#allocation3 + $0x79] sm:$0xff]  ;;  %v5300_v60 = vunpack.i.h.bf16 %v8398_v59 }
 0x4c2   : > { %v8407_v38 = vpop.permute.xlu1 %5302  ;;  %v5308_v6 = vpop.permute.xlu0 %5307 }
 0x4c3   : > { %v5309_v18 = vunpack.i.l.bf16 %v5308_v6  ;;  %v5310_v63 = vunpack.i.h.bf16 %v5308_v6 }
 0x4c4   : > { %5597 = vrot.lane.b32.xlu0 %v5596_v5, %s5785_s12  ;;  %5592 = vrot.lane.b32.xlu1 %v5591_v28, %s5786_s13  ;;  %v5631_v5 = vpack.i.bf16 %v8401_v32, %v8454_v35  ;;  %v5636_v28 = vpack.i.bf16 %v8394_v57, %v8456_v55 }
 0x4c5   : > { %v4073_v9 = vsel %vm328_vm13, %v8150_v4, %v5309_v18  ;;  %v4074_v61 = vsel %vm328_vm13, %v3047_v45, %v5310_v63  ;;  %v2912_v45 = vld [vmem:[#allocation3] sm:$0xff] }
 0x4c6   : > { %v5313_v56 = vpop.permute.xlu1 %5312  ;;  %v5318_v42 = vpop.permute.xlu0 %5317 }
 0x4c7   : > { %v5315_v21 = vunpack.i.h.bf16 %v5313_v56  ;;  %v5314_v12 = vunpack.i.l.bf16 %v5313_v56  ;;  %v5320_v29 = vunpack.i.h.bf16 %v5318_v42  ;;  %v5319_v46 = vunpack.i.l.bf16 %v5318_v42 }
 0x4c8   : > { %5602 = vrot.lane.b32.xlu1 %v5601_v23, %s5784_s11  ;;  %5607 = vrot.lane.b32.xlu0 %v5606_v22, %s5786_s13  ;;  %v3977_v23 = vsel %vm328_vm13, %v2920_v52, %v5299_v47  ;;  %v8467_v22 = vld [vmem:[#allocation3 + $0x151] sm:$0xff] }
 0x4c9   : > { %v4105_v25 = vsel %vm4001_vm15, %v4073_v9, %v5314_v12  ;;  %v4008_v31 = vsel %vm4001_vm15, %v3975_v17, %v5315_v21  ;;  %v8469_v21 = vld [vmem:[#allocation3 + $0x150] sm:$0xff]  ;;  %v5646_v9 = vpack.i.bf16 %v8421_v48, %v8467_v22 }
 0x4ca   : > { %v5323_v43 = vpop.permute.xlu1 %5322  ;;  %v5328_v10 = vpop.permute.xlu0 %5327  ;;  %v4137_v34 = vsel %vm4034_vm0, %v4105_v25, %v5319_v46  ;;  %v4041_v62 = vsel %vm4034_vm0, %v4008_v31, %v5320_v29  ;;  %v5641_v17 = vpack.i.bf16 %v8413_v3, %v8469_v21  ;;  %v3049_v25 = vld [vmem:[#allocation3 + $0x81] sm:$0xff] }
 0x4cb   : > { %v5325_v49 = vunpack.i.h.bf16 %v5323_v43  ;;  %v5324_v4 = vunpack.i.l.bf16 %v5323_v43  ;;  %v5330_v0 = vunpack.i.h.bf16 %v5328_v10  ;;  %v5329_v16 = vunpack.i.l.bf16 %v5328_v10  ;;  %4396 = vmatprep.mubr.f32.mxu1 %v4137_v34  ;;  %v2921_v31 = vld [vmem:[#allocation3 + $0x68] sm:$0xff] }
 0x4cc   : > { %5617 = vrot.lane.b32.xlu0 %v5616_v13, %s5784_s11  ;;  %5612 = vrot.lane.b32.xlu1 %v5611_v40, %s5785_s12  ;;  %v8481_v43 = vld [vmem:[#allocation3 + $0x142] sm:$0xff]  ;;  %v3978_v40 = vsel %vm328_vm13, %v2921_v31, %v5300_v60 }
 0x4cd   : > { %4397 = vmatmul.mubr.f32.vlgmr.msra.gmra.mxu1 %v4041_v62  ;;  %v4106_v26 = vsel %vm4001_vm15, %v4074_v61, %v5324_v4  ;;  %v4009_v14 = vsel %vm4001_vm15, %v3976_v50, %v5325_v49  ;;  %v8485_v62 = vld [vmem:[#allocation3 + $0x158] sm:$0xff]  ;;  %v5279_v49 = vunpack.i.l.bf16 %v8378_v27  ;;  %v5304_v61 = vunpack.i.l.bf16 %v8407_v38 }
 0x4ce   : > { %v5333_v24 = vpop.permute.xlu1 %5332  ;;  %v5338_v2 = vpop.permute.xlu0 %5337  ;;  %v4138_v51 = vsel %vm4034_vm0, %v4106_v26, %v5329_v16  ;;  %v4042_v41 = vsel %vm4034_vm0, %v4009_v14, %v5330_v0  ;;  %v5651_v16 = vpack.i.bf16 %v8411_v54, %v8481_v43 }
 0x4cf   : > { %v5334_v33 = vunpack.i.l.bf16 %v5333_v24  ;;  %4401 = vmatprep.mubr.f32.mxu1 %v4138_v51  ;;  %v5340_v44 = vunpack.i.h.bf16 %v5338_v2  ;;  %v5339_v37 = vunpack.i.l.bf16 %v5338_v2  ;;  %v5335_v18 = vunpack.i.h.bf16 %v5333_v24  ;;  %v8499_v51 = vld [vmem:[#allocation3 + $0x159] sm:$0xff] }
 0x4d0   : > { %5627 = vrot.lane.b32.xlu0 %v5626_v30, %s5785_s12  ;;  %5622 = vrot.lane.b32.xlu1 %v5621_v39, %s5786_s13  ;;  %v5656_v2 = vpack.i.bf16 %v8438_v15, %v8485_v62  ;;  %v8501_v30 = vld [vmem:[#allocation3 + $0x152] sm:$0xff] }
 0x4d1   : > { %4402 = vmatmul.mubr.f32.gmra.mxu1 %v4042_v41  ;;  %v4075_v58 = vsel %vm328_vm13, %v3048_v36, %v5334_v33  ;;  %v4010_v57 = vsel %vm4001_vm15, %v3977_v23, %v5340_v44  ;;  %v4076_v13 = vsel %vm328_vm13, %v3049_v25, %v5335_v18  ;;  %v3969_v33 = vsel %vm328_vm13, %v2912_v45, %v5279_v49  ;;  %v3050_v36 = vld [vmem:[#allocation3 + $0x91] sm:$0xff]  ;;  %v8514_v23 = vld [vmem:[#allocation3 + $0x169] sm:$0xff] }
 0x4d2   : > { %v5343_v20 = vpop.permute.xlu1 %5342  ;;  %v5348_v6 = vpop.permute.xlu0 %5347  ;;  %v4107_v32 = vsel %vm4001_vm15, %v4075_v58, %v5339_v37  ;;  %v5661_v44 = vpack.i.bf16 %v8436_v19, %v8499_v51  ;;  %v5666_v15 = vpack.i.bf16 %v8419_v7, %v8501_v30  ;;  %v3040_v37 = vld [vmem:[#allocation3 + $0x19] sm:$0xff]  ;;  %v8516_v7 = vld [vmem:[#allocation3 + $0x168] sm:$0xff] }
 0x4d3   : > { %v5345_v56 = vunpack.i.h.bf16 %v5343_v20  ;;  %v5344_v42 = vunpack.i.l.bf16 %v5343_v20  ;;  %v5350_v12 = vunpack.i.h.bf16 %v5348_v6  ;;  %v5349_v59 = vunpack.i.l.bf16 %v5348_v6  ;;  %v2922_v58 = vld [vmem:[#allocation3 + $0x78] sm:$0xff] }
 0x4d4   : > { %5632 = vrot.lane.b32.xlu1 %v5631_v5, %s5784_s11  ;;  %5637 = vrot.lane.b32.xlu0 %v5636_v28, %s5786_s13  ;;  %v3979_v52 = vsel %vm328_vm13, %v2922_v58, %v5304_v61  ;;  %v5671_v25 = vpack.i.bf16 %v8456_v55, %v8516_v7  ;;  %v3051_v55 = vld [vmem:[#allocation3 + $0x99] sm:$0xff] }
 0x4d5   : > { %v4139_v29 = vsel %vm4034_vm0, %v4107_v32, %v5344_v42  ;;  %v4043_v46 = vsel %vm4034_vm0, %v4010_v57, %v5345_v56  ;;  %v4108_v48 = vsel %vm4001_vm15, %v4076_v13, %v5349_v59  ;;  %v4011_v3 = vsel %vm4001_vm15, %v3978_v40, %v5350_v12  ;;  %v8533_v13 = vld [vmem:[#allocation3 + $0x15a] sm:$0xff] }
 0x4d6   : > { %v5353_v1 = vpop.permute.xlu1 %5352  ;;  %v5358_v63 = vpop.permute.xlu0 %5357  ;;  %4406 = vmatprep.mubr.f32.mxu1 %v4139_v29  ;;  %v4197_v40 = vld [vmem:[%s8994_s4 + $0x110] sm:$0xff]  ;;  %v5681_v61 = vpack.i.bf16 %v8454_v35, %v8533_v13 }
 0x4d7   : > { %v5355_v10 = vunpack.i.h.bf16 %v5353_v1  ;;  %v5354_v34 = vunpack.i.l.bf16 %v5353_v1  ;;  %4407 = vmatmul.mubr.f32.gmra.mxu1 %v4043_v46  ;;  %v5360_v50 = vunpack.i.h.bf16 %v5358_v63  ;;  %v5359_v26 = vunpack.i.l.bf16 %v5358_v63  ;;  %v2923_v58 = vld [vmem:[#allocation3 + $0x80] sm:$0xff] }
 0x4d8   : > { %5647 = vrot.lane.b32.xlu0 %v5646_v9, %s5784_s11  ;;  %5642 = vrot.lane.b32.xlu1 %v5641_v17, %s5785_s12  ;;  %v5676_v17 = vpack.i.bf16 %v8469_v21, %v8514_v23  ;;  %v3041_v21 = vld [vmem:[#allocation3 + $0x21] sm:$0xff] }
 0x4d9   : > { %v4140_v4 = vsel %vm4034_vm0, %v4108_v48, %v5354_v34  ;;  %v4044_v0 = vsel %vm4034_vm0, %v4011_v3, %v5355_v10  ;;  %v4067_v5 = vsel %vm328_vm13, %v3040_v37, %v5359_v26  ;;  %v4077_v28 = vsel %vm328_vm13, %v3050_v36, %v5360_v50  ;;  %v8531_v34 = vld [vmem:[#allocation3 + $0x170] sm:$0xff]  ;;  %v4196_v50 = vld [vmem:[%s8994_s4 + $0x108] sm:$0xff] }
 0x4da   : > { %v5363_v14 = vpop.permute.xlu1 %5362  ;;  %v5368_v24 = vpop.permute.xlu0 %5367  ;;  %4411 = vmatprep.mubr.f32.mxu1 %v4140_v4  ;;  %v5686_v45 = vpack.i.bf16 %v8481_v43, %v8531_v34  ;;  %v5280_v26 = vunpack.i.h.bf16 %v8378_v27  ;;  %v2913_v27 = vld [vmem:[#allocation3 + $0x8] sm:$0xff] }
 0x4db   : > { %v5369_v39 = vunpack.i.l.bf16 %v5368_v24  ;;  %4412 = vmatmul.mubr.f32.gmra.mxu1 %v4044_v0  ;;  %v5365_v41 = vunpack.i.h.bf16 %v5363_v14  ;;  %v5364_v47 = vunpack.i.l.bf16 %v5363_v14  ;;  %v5370_v54 = vunpack.i.h.bf16 %v5368_v24 }
 0x4dc   : > { %5657 = vrot.lane.b32.xlu0 %v5656_v2, %s5785_s12  ;;  %5652 = vrot.lane.b32.xlu1 %v5651_v16, %s5786_s13  ;;  %v5305_v14 = vunpack.i.h.bf16 %v8407_v38 }
 0x4dd   : > { %v4002_v60 = vsel %vm4001_vm15, %v3969_v33, %v5369_v39  ;;  %v4099_v12 = vsel %vm4001_vm15, %v4067_v5, %v5364_v47  ;;  %v4109_v59 = vsel %vm4001_vm15, %v4077_v28, %v5365_v41  ;;  %v4012_v32 = vsel %vm4001_vm15, %v3979_v52, %v5370_v54  ;;  %v8554_v39 = vld [vmem:[#allocation3 + $0x16a] sm:$0xff]  ;;  %v3165_v52 = vld [vmem:[#allocation3 + $0x181] sm:$0xff] }
 0x4de   : > { %v5373_v20 = vpop.permute.xlu1 %5372  ;;  %v5378_v6 = vpop.permute.xlu0 %5377  ;;  %v5696_v36 = vpack.i.bf16 %v8467_v22, %v8554_v39  ;;  %v3970_v5 = vsel %vm328_vm13, %v2913_v27, %v5280_v26  ;;  %v3980_v28 = vsel %vm328_vm13, %v2923_v58, %v5305_v14  ;;  %v3135_v27 = vld [vmem:[#allocation3 + $0x198] sm:$0xff] }
 0x4df   : > { %v5375_v18 = vunpack.i.h.bf16 %v5373_v20  ;;  %v5374_v56 = vunpack.i.l.bf16 %v5373_v20  ;;  %v5380_v42 = vunpack.i.h.bf16 %v5378_v6  ;;  %v5379_v19 = vunpack.i.l.bf16 %v5378_v6 }
 0x4e0   : > { %5662 = vrot.lane.b32.xlu1 %v5661_v44, %s5784_s11  ;;  %5667 = vrot.lane.b32.xlu0 %v5666_v15, %s5786_s13 }
 0x4e1   : > { %v4131_v57 = vsel %vm4034_vm0, %v4099_v12, %v5374_v56  ;;  %v4141_v29 = vsel %vm4034_vm0, %v4109_v59, %v5375_v18  ;;  %v4035_v46 = vsel %vm4034_vm0, %v4002_v60, %v5379_v19  ;;  %v4045_v1 = vsel %vm4034_vm0, %v4012_v32, %v5380_v42  ;;  %v4195_v60 = vld [vmem:[%s8994_s4 + $0x100] sm:$0xff]  ;;  %v8571_v18 = vld [vmem:[#allocation3 + $0x180] sm:$0xff] }
 0x4e2   : > { %v5383_v63 = vpop.permute.xlu1 %5382  ;;  %v5388_v9 = vpop.permute.xlu0 %5387  ;;  %4366 = vmatprep.mubr.f32.mxu0 %v4131_v57  ;;  %4416 = vmatprep.mubr.f32.mxu1 %v4141_v29  ;;  %v5706_v32 = vpack.i.bf16 %v8516_v7, %v3165_v52  ;;  %v5701_v57 = vpack.i.bf16 %v8501_v30, %v8571_v18 }
 0x4e3   : > { %v5385_v31 = vunpack.i.h.bf16 %v5383_v63  ;;  %v5384_v10 = vunpack.i.l.bf16 %v5383_v63  ;;  %4367 = vmatmul.mubr.f32.vlgmr.msra.gmra.mxu0 %v4035_v46  ;;  %4417 = vmatmul.mubr.f32.gmra.mxu1 %v4045_v1  ;;  %v5390_v48 = vunpack.i.h.bf16 %v5388_v9  ;;  %v5389_v3 = vunpack.i.l.bf16 %v5388_v9  ;;  %v8584_v46 = vld [vmem:[#allocation3 + $0x188] sm:$0xff]  ;;  %v8586_v1 = vld [vmem:[#allocation3 + $0x172] sm:$0xff] }
 0x4e4   : > { %5677 = vrot.lane.b32.xlu0 %v5676_v17, %s5784_s11  ;;  %5672 = vrot.lane.b32.xlu1 %v5671_v25, %s5785_s12  ;;  %v3042_v17 = vld [vmem:[#allocation3 + $0x31] sm:$0xff]  ;;  %v5284_v25 = vunpack.i.l.bf16 %v8388_v8 }
 0x4e5   : > { %v4068_v49 = vsel %vm328_vm13, %v3041_v21, %v5384_v10  ;;  %v4078_v4 = vsel %vm328_vm13, %v3051_v55, %v5385_v31  ;;  %5136 = vmatpush3.msra.mxu0 %v8355_v53  ;;  %v8552_v53 = vld [vmem:[#allocation3 + $0x171] sm:$0xff]  ;;  %v5716_v10 = vpack.i.bf16 %v8533_v13, %v8584_v46 }
 0x4e6   : > { %v5393_v0 = vpop.permute.xlu1 %5392  ;;  %v5398_v16 = vpop.permute.xlu0 %5397  ;;  %5137 = vmatprep.subr.mxu0 %v4197_v40  ;;  %v4100_v35 = vsel %vm4001_vm15, %v4068_v49, %v5389_v3  ;;  %v4110_v54 = vsel %vm4001_vm15, %v4078_v4, %v5390_v48  ;;  %v5691_v37 = vpack.i.bf16 %v8485_v62, %v8552_v53  ;;  %v3052_v3 = vld [vmem:[#allocation3 + $0xa9] sm:$0xff] }
 0x4e7   : > { %v5400_v24 = vunpack.i.h.bf16 %v5398_v16  ;;  %v5399_v2 = vunpack.i.l.bf16 %v5398_v16  ;;  %5138 = vmatpush3.msra.mxu0 %v4197_v40  ;;  %v5395_v41 = vunpack.i.h.bf16 %v5393_v0  ;;  %v5394_v47 = vunpack.i.l.bf16 %v5393_v0  ;;  %v8598_v0 = vld [vmem:[#allocation3 + $0x189] sm:$0xff] }
 0x4e8   : > { %5687 = vrot.lane.b32.xlu0 %v5686_v45, %s5785_s12  ;;  %5682 = vrot.lane.b32.xlu1 %v5681_v61, %s5786_s13  ;;  %v5711_v40 = vpack.i.bf16 %v8499_v51, %v8586_v1  ;;  %v8600_v16 = vld [vmem:[#allocation3 + $0x182] sm:$0xff] }
 0x4e9   : > { %v4132_v38 = vsel %vm4034_vm0, %v4100_v35, %v5399_v2  ;;  %v4142_v33 = vsel %vm4034_vm0, %v4110_v54, %v5400_v24  ;;  %5139 = vmatprep.subr.mxu0 %v4196_v50  ;;  %v4003_v22 = vsel %vm4001_vm15, %v3970_v5, %v5394_v47  ;;  %v4013_v62 = vsel %vm4001_vm15, %v3980_v28, %v5395_v41  ;;  %v2914_v35 = vld [vmem:[#allocation3 + $0x18] sm:$0xff]  ;;  %v2924_v54 = vld [vmem:[#allocation3 + $0x90] sm:$0xff] }
 0x4ea   : > { %v5403_v44 = vpop.permute.xlu1 %5402  ;;  %v5408_v15 = vpop.permute.xlu0 %5407  ;;  %4371 = vmatprep.mubr.f32.mxu0 %v4132_v38  ;;  %4421 = vmatprep.mubr.f32.mxu1 %v4142_v33  ;;  %v5721_v41 = vpack.i.bf16 %v8531_v34, %v8598_v0  ;;  %v5726_v47 = vpack.i.bf16 %v8514_v23, %v8600_v16 }
 0x4eb   : > { %v5405_v20 = vunpack.i.h.bf16 %v5403_v44  ;;  %v5404_v6 = vunpack.i.l.bf16 %v5403_v44  ;;  %5140 = vmatpush3.msra.mxu0 %v4196_v50  ;;  %v5409_v19 = vunpack.i.l.bf16 %v5408_v15  ;;  %v5410_v29 = vunpack.i.h.bf16 %v5408_v15 }
 0x4ec   : > { %5692 = vrot.lane.b32.xlu1 %v5691_v37, %s5784_s11  ;;  %5697 = vrot.lane.b32.xlu0 %v5696_v36, %s5786_s13  ;;  %v3971_v44 = vsel %vm328_vm13, %v2914_v35, %v5284_v25  ;;  %v3167_v37 = vld [vmem:[#allocation3 + $0x199] sm:$0xff] }
 0x4ed   : > { %v4036_v56 = vsel %vm4034_vm0, %v4003_v22, %v5404_v6  ;;  %v4046_v42 = vsel %vm4034_vm0, %v4013_v62, %v5405_v20  ;;  %5141 = vmatprep.subr.mxu0 %v4195_v60  ;;  %v4069_v48 = vsel %vm328_vm13, %v3042_v17, %v5409_v19  ;;  %v4079_v4 = vsel %vm328_vm13, %v3052_v3, %v5410_v29  ;;  %v2925_v17 = vld [vmem:[#allocation3 + $0x98] sm:$0xff] }
 0x4ee   : > { %v8579_v12 = vpop.permute.xlu1 %5412  ;;  %v5418_v59 = vpop.permute.xlu0 %5417  ;;  %4372 = vmatmul.mubr.f32.gmra.mxu0 %v4036_v56  ;;  %4422 = vmatmul.mubr.f32.gmra.mxu1 %v4046_v42  ;;  %v5731_v20 = vpack.i.bf16 %v8554_v39, %v3135_v27  ;;  %v5285_v6 = vunpack.i.h.bf16 %v8388_v8  ;;  %v5736_v62 = vpack.i.bf16 %v8571_v18, %v3167_v37  ;;  %v8624_v56 = vld [vmem:[#allocation3 + $0x18a] sm:$0xff]  ;;  %v3136_v42 = vld [vmem:[#allocation3 + $0x1a0] sm:$0xff] }
 0x4ef   : > { %5142 = vmatpush3.msra.mxu0 %v4195_v60  ;;  %v5420_v63 = vunpack.i.h.bf16 %v5418_v59  ;;  %v5419_v9 = vunpack.i.l.bf16 %v5418_v59  ;;  %v5414_v21 = vunpack.i.l.bf16 %v8579_v12  ;;  %v5415_v23 = vunpack.i.h.bf16 %v8579_v12  ;;  %v3043_v8 = vld [vmem:[#allocation3 + $0x39] sm:$0xff]  ;;  %v3053_v18 = vld [vmem:[#allocation3 + $0xb1] sm:$0xff] }
 0x4f0   : > { %5707 = vrot.lane.b32.xlu0 %v5706_v32, %s5784_s11  ;;  %5702 = vrot.lane.b32.xlu1 %v5701_v57, %s5785_s12  ;;  %v5741_v57 = vpack.i.bf16 %v8552_v53, %v8624_v56  ;;  %v5746_v29 = vpack.i.bf16 %v8586_v1, %v3136_v42 }
 0x4f1   : > { %v4101_v51 = vsel %vm4001_vm15, %v4069_v48, %v5419_v9  ;;  %v4111_v50 = vsel %vm4001_vm15, %v4079_v4, %v5420_v63  ;;  %v3981_v15 = vsel %vm328_vm13, %v2924_v54, %v5414_v21  ;;  %v4070_v63 = vsel %vm328_vm13, %v3043_v8, %v5415_v23  ;;  %v2915_v9 = vld [vmem:[#allocation3 + $0x20] sm:$0xff]  ;;  %v3044_v23 = vld [vmem:[#allocation3 + $0x49] sm:$0xff] }
 0x4f2   : > { %v5423_v31 = vpop.permute.xlu1 %5422  ;;  %v5428_v7 = vpop.permute.xlu0 %5427 }
 0x4f3   : > { %v5430_v55 = vunpack.i.h.bf16 %v5428_v7  ;;  %v5429_v49 = vunpack.i.l.bf16 %v5428_v7  ;;  %v5425_v45 = vunpack.i.h.bf16 %v5423_v31  ;;  %v5424_v61 = vunpack.i.l.bf16 %v5423_v31 }
 0x4f4   : > { %5717 = vrot.lane.b32.xlu0 %v5716_v10, %s5785_s12  ;;  %5712 = vrot.lane.b32.xlu1 %v5711_v40, %s5786_s13  ;;  %v3972_v40 = vsel %vm328_vm13, %v2915_v9, %v5285_v6 }
 0x4f5   : > { %v4133_v26 = vsel %vm4034_vm0, %v4101_v51, %v5429_v49  ;;  %v4143_v14 = vsel %vm4034_vm0, %v4111_v50, %v5430_v55  ;;  %v4004_v36 = vsel %vm4001_vm15, %v3971_v44, %v5424_v61  ;;  %v4014_v34 = vsel %vm4001_vm15, %v3981_v15, %v5425_v45  ;;  %v3168_v49 = vld [vmem:[#allocation3 + $0x1a1] sm:$0xff] }
 0x4f6   : > { %v5433_v24 = vpop.permute.xlu1 %5432  ;;  %v5438_v2 = vpop.permute.xlu0 %5437  ;;  %4376 = vmatprep.mubr.f32.mxu0 %v4133_v26  ;;  %4426 = vmatprep.mubr.f32.mxu1 %v4143_v14 }
 0x4f7   : > { %v5435_v38 = vunpack.i.h.bf16 %v5433_v24  ;;  %v5434_v33 = vunpack.i.l.bf16 %v5433_v24  ;;  %v5440_v5 = vunpack.i.h.bf16 %v5438_v2  ;;  %v5439_v28 = vunpack.i.l.bf16 %v5438_v2 }
 0x4f8   : > { %5722 = vrot.lane.b32.xlu1 %v5721_v41, %s5784_s11  ;;  %5727 = vrot.lane.b32.xlu0 %v5726_v47, %s5786_s13  ;;  %v5751_v41 = vpack.i.bf16 %v8584_v46, %v3168_v49  ;;  %v5289_v47 = vunpack.i.l.bf16 %v8390_v11 }
 0x4f9   : > { %v4037_v58 = vsel %vm4034_vm0, %v4004_v36, %v5434_v33  ;;  %v4047_v60 = vsel %vm4034_vm0, %v4014_v34, %v5435_v38  ;;  %v4080_v10 = vsel %vm328_vm13, %v3053_v18, %v5439_v28  ;;  %v3982_v48 = vsel %vm328_vm13, %v2925_v17, %v5440_v5  ;;  %v2916_v34 = vld [vmem:[#allocation3 + $0x30] sm:$0xff] }
 0x4fa   : > { %v5443_v52 = vpop.permute.xlu1 %5442  ;;  %v5448_v22 = vpop.permute.xlu0 %5447  ;;  %4377 = vmatmul.mubr.f32.gmra.mxu0 %v4037_v58  ;;  %4427 = vmatmul.mubr.f32.gmra.mxu1 %v4047_v60  ;;  %v3054_v58 = vld [vmem:[#allocation3 + $0xc1] sm:$0xff]  ;;  %v3973_v28 = vsel %vm328_vm13, %v2916_v34, %v5289_v47  ;;  %v2917_v47 = vld [vmem:[#allocation3 + $0x38] sm:$0xff] }
 0x4fb   : > { %v5444_v19 = vunpack.i.l.bf16 %v5443_v52  ;;  %v5445_v12 = vunpack.i.h.bf16 %v5443_v52  ;;  %v5450_v59 = vunpack.i.h.bf16 %v5448_v22  ;;  %v5449_v32 = vunpack.i.l.bf16 %v5448_v22  ;;  %v2926_v60 = vld [vmem:[#allocation3 + $0xa8] sm:$0xff] }
 0x4fc   : > { %5732 = vrot.lane.b32.xlu1 %v5731_v20, %s5785_s12  ;;  %5737 = vrot.lane.b32.xlu0 %v5736_v62, %s5784_s11 }
 0x4fd   : > { %v4102_v7 = vsel %vm4001_vm15, %v4070_v63, %v5444_v19  ;;  %v4112_v4 = vsel %vm4001_vm15, %v4080_v10, %v5445_v12  ;;  %v4005_v45 = vsel %vm4001_vm15, %v3972_v40, %v5449_v32  ;;  %v4015_v61 = vsel %vm4001_vm15, %v3982_v48, %v5450_v59  ;;  %v3055_v40 = vld [vmem:[#allocation3 + $0xc9] sm:$0xff] }
 0x4fe   : > { %v5453_v25 = vpop.permute.xlu1 %5452  ;;  %v5458_v31 = vpop.permute.xlu0 %5457 }
 0x4ff   : > { %v5455_v3 = vunpack.i.h.bf16 %v5453_v25  ;;  %v5454_v21 = vunpack.i.l.bf16 %v5453_v25  ;;  %v5460_v53 = vunpack.i.h.bf16 %v5458_v31  ;;  %v5459_v55 = vunpack.i.l.bf16 %v5458_v31 }
 0x500   : > { %5742 = vrot.lane.b32.xlu1 %v5741_v57, %s5786_s13  ;;  %5747 = vrot.lane.b32.xlu0 %v5746_v29, %s5785_s12 }
 0x501   : > { %v4134_v51 = vsel %vm4034_vm0, %v4102_v7, %v5454_v21  ;;  %v4144_v50 = vsel %vm4034_vm0, %v4112_v4, %v5455_v3  ;;  %v4038_v26 = vsel %vm4034_vm0, %v4005_v45, %v5459_v55  ;;  %v4048_v14 = vsel %vm4034_vm0, %v4015_v61, %v5460_v53  ;;  %v3045_v55 = vld [vmem:[#allocation3 + $0x51] sm:$0xff] }
 0x502   : > { %v5463_v24 = vpop.permute.xlu1 %5462  ;;  %v5468_v2 = vpop.permute.xlu0 %5467  ;;  %4381 = vmatprep.mubr.f32.mxu0 %v4134_v51  ;;  %4431 = vmatprep.mubr.f32.mxu1 %v4144_v50  ;;  %v5290_v3 = vunpack.i.h.bf16 %v8390_v11 }
 0x503   : > { %4382 = vmatmul.mubr.f32.gmra.mxu0 %v4038_v26  ;;  %4432 = vmatmul.mubr.f32.gmra.mxu1 %v4048_v14  ;;  %v5465_v35 = vunpack.i.h.bf16 %v5463_v24  ;;  %v5464_v54 = vunpack.i.l.bf16 %v5463_v24  ;;  %v5469_v27 = vunpack.i.l.bf16 %v5468_v2  ;;  %v5470_v25 = vunpack.i.h.bf16 %v5468_v2 }
 0x504   : > { %5752 = vrot.lane.b32.xlu1 %v5751_v41, %s5784_s11 }
 0x505   : > { %v4071_v6 = vsel %vm328_vm13, %v3044_v23, %v5464_v54  ;;  %v4081_v5 = vsel %vm328_vm13, %v3054_v58, %v5465_v35  ;;  %v3983_v52 = vsel %vm328_vm13, %v2926_v60, %v5469_v27  ;;  %v4072_v61 = vsel %vm328_vm13, %v3045_v55, %v5470_v25  ;;  %v2927_v35 = vld [vmem:[#allocation3 + $0xb0] sm:$0xff] }
 0x506   : > { %v5473_v38 = vpop.permute.xlu1 %5472  ;;  %v5478_v33 = vpop.permute.xlu0 %5477 }
 0x507   : > { %v5475_v44 = vunpack.i.h.bf16 %v5473_v38  ;;  %v5474_v15 = vunpack.i.l.bf16 %v5473_v38  ;;  %v5480_v37 = vunpack.i.h.bf16 %v5478_v33  ;;  %v5479_v36 = vunpack.i.l.bf16 %v5478_v33 }
 0x508   : > { %v3974_v38 = vsel %vm328_vm13, %v2917_v47, %v5290_v3 }
 0x509   : > { %v4103_v12 = vsel %vm4001_vm15, %v4071_v6, %v5474_v15  ;;  %v4113_v59 = vsel %vm4001_vm15, %v4081_v5, %v5475_v44  ;;  %v4006_v32 = vsel %vm4001_vm15, %v3973_v28, %v5479_v36  ;;  %v4016_v8 = vsel %vm4001_vm15, %v3983_v52, %v5480_v37  ;;  %v3056_v52 = vld [vmem:[#allocation3 + $0xd9] sm:$0xff] }
 0x50a   : > { %v5483_v46 = vpop.permute.xlu1 %5482  ;;  %v5488_v20 = vpop.permute.xlu0 %5487 }
 0x50b   : > { %v5485_v22 = vunpack.i.h.bf16 %v5483_v46  ;;  %v5484_v62 = vunpack.i.l.bf16 %v5483_v46  ;;  %v5490_v42 = vunpack.i.h.bf16 %v5488_v20  ;;  %v5489_v19 = vunpack.i.l.bf16 %v5488_v20  ;;  %v3169_v46 = vld [vmem:[#allocation3 + $0x32] sm:$0xff] }
 0x50d   : > { %v4135_v57 = vsel %vm4034_vm0, %v4103_v12, %v5484_v62  ;;  %v4145_v29 = vsel %vm4034_vm0, %v4113_v59, %v5485_v22  ;;  %v4039_v63 = vsel %vm4034_vm0, %v4006_v32, %v5489_v19  ;;  %v4049_v18 = vsel %vm4034_vm0, %v4016_v8, %v5490_v42  ;;  %v2928_v22 = vld [vmem:[#allocation3 + $0xc0] sm:$0xff] }
 0x50e   : > { %v5493_v9 = vpop.permute.xlu1 %5492  ;;  %v5498_v17 = vpop.permute.xlu0 %5497  ;;  %4386 = vmatprep.mubr.f32.mxu0 %v4135_v57  ;;  %4436 = vmatprep.mubr.f32.mxu1 %v4145_v29  ;;  %v3170_v19 = vld [vmem:[#allocation3 + $0x3a] sm:$0xff]  ;;  %v3171_v29 = vld [vmem:[#allocation3 + $0x4a] sm:$0xff] }
 0x50f   : > { %v5494_v31 = vunpack.i.l.bf16 %v5493_v9  ;;  %4387 = vmatmul.mubr.f32.gmra.mxu0 %v4039_v63  ;;  %4437 = vmatmul.mubr.f32.gmra.mxu1 %v4049_v18  ;;  %v5500_v7 = vunpack.i.h.bf16 %v5498_v17  ;;  %v5499_v10 = vunpack.i.l.bf16 %v5498_v17  ;;  %v5495_v49 = vunpack.i.h.bf16 %v5493_v9 }
 0x511   : > { %v4082_v48 = vsel %vm328_vm13, %v3055_v40, %v5494_v31  ;;  %v4104_v26 = vsel %vm4001_vm15, %v4072_v61, %v5499_v10  ;;  %v3984_v33 = vsel %vm328_vm13, %v2927_v35, %v5495_v49  ;;  %v3057_v31 = vld [vmem:[#allocation3 + $0xe1] sm:$0xff]  ;;  %v3172_v10 = vld [vmem:[#allocation3 + $0x52] sm:$0xff] }
 0x512   : > { %v5503_v21 = vpop.permute.xlu1 %5502  ;;  %v5508_v53 = vpop.permute.xlu0 %5507  ;;  %v4114_v14 = vsel %vm4001_vm15, %v4082_v48, %v5500_v7  ;;  %v2929_v7 = vld [vmem:[#allocation3 + $0xc8] sm:$0xff] }
 0x513   : > { %v5510_v4 = vunpack.i.h.bf16 %v5508_v53  ;;  %v5509_v45 = vunpack.i.l.bf16 %v5508_v53  ;;  %v5505_v51 = vunpack.i.h.bf16 %v5503_v21  ;;  %v5504_v50 = vunpack.i.l.bf16 %v5503_v21  ;;  %v3173_v53 = vld [vmem:[#allocation3 + $0x62] sm:$0xff] }
 0x515   : > { %v4136_v24 = vsel %vm4034_vm0, %v4104_v26, %v5509_v45  ;;  %v4146_v2 = vsel %vm4034_vm0, %v4114_v14, %v5510_v4  ;;  %v4007_v37 = vsel %vm4001_vm15, %v3974_v38, %v5504_v50  ;;  %v4017_v36 = vsel %vm4001_vm15, %v3984_v33, %v5505_v51  ;;  %v3174_v26 = vld [vmem:[#allocation3 + $0x6a] sm:$0xff]  ;;  %v2930_v38 = vld [vmem:[#allocation3 + $0xd8] sm:$0xff] }
 0x516   : > { %v5513_v41 = vpop.permute.xlu1 %5512  ;;  %v5518_v11 = vpop.permute.xlu0 %5517  ;;  %4391 = vmatprep.mubr.f32.mxu0 %v4136_v24  ;;  %4441 = vmatprep.mubr.f32.mxu1 %v4146_v2 }
 0x517   : > { %v5515_v54 = vunpack.i.h.bf16 %v5513_v41  ;;  %v5514_v27 = vunpack.i.l.bf16 %v5513_v41  ;;  %v5520_v44 = vunpack.i.h.bf16 %v5518_v11  ;;  %v5519_v15 = vunpack.i.l.bf16 %v5518_v11  ;;  %v3175_v41 = vld [vmem:[#allocation3 + $0x7a] sm:$0xff] }
 0x519   : > { %v4040_v34 = vsel %vm4034_vm0, %v4007_v37, %v5514_v27  ;;  %v4050_v23 = vsel %vm4034_vm0, %v4017_v36, %v5515_v54  ;;  %v4083_v62 = vsel %vm328_vm13, %v3056_v52, %v5519_v15  ;;  %v3985_v42 = vsel %vm328_vm13, %v2928_v22, %v5520_v44  ;;  %v3058_v27 = vld [vmem:[#allocation3 + $0xf1] sm:$0xff]  ;;  %v3176_v15 = vld [vmem:[#allocation3 + $0x82] sm:$0xff]  ;;  %v3059_v52 = vld [vmem:[#allocation3 + $0xf9] sm:$0xff] }
 0x51a   : > { %v5523_v58 = vpop.permute.xlu1 %5522  ;;  %v5528_v60 = vpop.permute.xlu0 %5527  ;;  %4392 = vmatmul.mubr.f32.gmra.mxu0 %v4040_v34  ;;  %4442 = vmatmul.mubr.f32.gmra.mxu1 %v4050_v23  ;;  %v2931_v22 = vld [vmem:[#allocation3 + $0xe0] sm:$0xff] }
 0x51b   : > { %v5525_v20 = vunpack.i.h.bf16 %v5523_v58  ;;  %v5524_v6 = vunpack.i.l.bf16 %v5523_v58  ;;  %v5530_v5 = vunpack.i.h.bf16 %v5528_v60  ;;  %v5529_v28 = vunpack.i.l.bf16 %v5528_v60  ;;  %5143 = vmatprep.mubr.msk.f32.mxu0 %vm328_vm13, %v3169_v46  ;;  %v3177_v60 = vld [vmem:[#allocation3 + $0x92] sm:$0xff] }
 0x51d   : > { %v4115_v12 = vsel %vm4001_vm15, %v4083_v62, %v5524_v6  ;;  %v4018_v59 = vsel %vm4001_vm15, %v3985_v42, %v5525_v20  ;;  %v3178_v62 = vld [vmem:[#allocation3 + $0x9a] sm:$0xff] }
 0x51e   : > { %v5533_v32 = vpop.permute.xlu1 %5532  ;;  %v5538_v8 = vpop.permute.xlu0 %5537  ;;  %5144 = vmatmul.mubr.msk.f32.vlgmr.msra.gmra.mxu0 %vm328_vm13, %v3170_v19  ;;  %v4147_v57 = vsel %vm4034_vm0, %v4115_v12, %v5529_v28  ;;  %v4051_v63 = vsel %vm4034_vm0, %v4018_v59, %v5530_v5 }
 0x51f   : > { %v5535_v18 = vunpack.i.h.bf16 %v5533_v32  ;;  %v5534_v9 = vunpack.i.l.bf16 %v5533_v32  ;;  %4446 = vmatprep.mubr.f32.mxu1 %v4147_v57  ;;  %5146 = vmatprep.mubr.msk.f32.mxu0 %vm328_vm13, %v3171_v29  ;;  %v5540_v17 = vunpack.i.h.bf16 %v5538_v8  ;;  %v5539_v25 = vunpack.i.l.bf16 %v5538_v8  ;;  %v3179_v32 = vld [vmem:[#allocation3 + $0xaa] sm:$0xff] }
 0x520   : > { %4447 = vmatmul.mubr.f32.gmra.mxu1 %v4051_v63 }
 0x521   : > { %v4084_v40 = vsel %vm328_vm13, %v3057_v31, %v5534_v9  ;;  %v3986_v48 = vsel %vm328_vm13, %v2929_v7, %v5535_v18 }
 0x522   : > { %v5543_v3 = vpop.permute.xlu1 %5542  ;;  %v5548_v21 = vpop.permute.xlu0 %5547  ;;  %5147 = vmatmul.mubr.msk.f32.gmra.mxu0 %vm328_vm13, %v3172_v10  ;;  %v4116_v61 = vsel %vm4001_vm15, %v4084_v40, %v5539_v25  ;;  %v4019_v51 = vsel %vm4001_vm15, %v3986_v48, %v5540_v17  ;;  %v3180_v25 = vld [vmem:[#allocation3 + $0xb2] sm:$0xff]  ;;  %v3181_v40 = vld [vmem:[#allocation3 + $0xc2] sm:$0xff] }
 0x523   : > { %v5545_v55 = vunpack.i.h.bf16 %v5543_v3  ;;  %v5544_v49 = vunpack.i.l.bf16 %v5543_v3  ;;  %5149 = vmatprep.mubr.msk.f32.mxu0 %vm328_vm13, %v3173_v53  ;;  %v5550_v4 = vunpack.i.h.bf16 %v5548_v21  ;;  %v5549_v45 = vunpack.i.l.bf16 %v5548_v21 }
 0x525   : > { %v4148_v50 = vsel %vm4034_vm0, %v4116_v61, %v5544_v49  ;;  %v4052_v14 = vsel %vm4034_vm0, %v4019_v51, %v5545_v55  ;;  %v4085_v33 = vsel %vm328_vm13, %v3058_v27, %v5549_v45  ;;  %v3987_v44 = vsel %vm328_vm13, %v2930_v38, %v5550_v4  ;;  %v3060_v55 = vld [vmem:[#allocation3 + $0x109] sm:$0xff]  ;;  %v3061_v27 = vld [vmem:[#allocation3 + $0x111] sm:$0xff] }
 0x526   : > { %v5553_v24 = vpop.permute.xlu1 %5552  ;;  %v5558_v2 = vpop.permute.xlu0 %5557  ;;  %4451 = vmatprep.mubr.f32.mxu1 %v4148_v50  ;;  %5150 = vmatmul.mubr.msk.f32.gmra.mxu0 %vm328_vm13, %v3174_v26  ;;  %v2932_v49 = vld [vmem:[#allocation3 + $0xf0] sm:$0xff]  ;;  %v2933_v38 = vld [vmem:[#allocation3 + $0xf8] sm:$0xff] }
 0x527   : > { %v5555_v11 = vunpack.i.h.bf16 %v5553_v24  ;;  %v5554_v47 = vunpack.i.l.bf16 %v5553_v24  ;;  %v5560_v35 = vunpack.i.h.bf16 %v5558_v2  ;;  %v5559_v54 = vunpack.i.l.bf16 %v5558_v2  ;;  %4452 = vmatmul.mubr.f32.gmra.mxu1 %v4052_v14  ;;  %5152 = vmatprep.mubr.msk.f32.mxu0 %vm328_vm13, %v3175_v41  ;;  %v3182_v61 = vld [vmem:[#allocation3 + $0xca] sm:$0xff]  ;;  %v3183_v2 = vld [vmem:[#allocation3 + $0xda] sm:$0xff] }
 0x529   : > { %v4117_v37 = vsel %vm4001_vm15, %v4085_v33, %v5554_v47  ;;  %v4020_v36 = vsel %vm4001_vm15, %v3987_v44, %v5555_v11  ;;  %v3184_v33 = vld [vmem:[#allocation3 + $0xe2] sm:$0xff] }
 0x52a   : > { %v5563_v34 = vpop.permute.xlu1 %5562  ;;  %v5568_v23 = vpop.permute.xlu0 %5567  ;;  %5153 = vmatmul.mubr.msk.f32.gmra.mxu0 %vm328_vm13, %v3176_v15  ;;  %v4149_v58 = vsel %vm4034_vm0, %v4117_v37, %v5559_v54  ;;  %v4053_v46 = vsel %vm4034_vm0, %v4020_v36, %v5560_v35 }
 0x52b   : > { %v5565_v20 = vunpack.i.h.bf16 %v5563_v34  ;;  %v5564_v6 = vunpack.i.l.bf16 %v5563_v34  ;;  %4456 = vmatprep.mubr.f32.mxu1 %v4149_v58  ;;  %5155 = vmatprep.mubr.msk.f32.mxu0 %vm328_vm13, %v3177_v60  ;;  %v5570_v5 = vunpack.i.h.bf16 %v5568_v23  ;;  %v5569_v28 = vunpack.i.l.bf16 %v5568_v23  ;;  %v3185_v34 = vld [vmem:[#allocation3 + $0xf2] sm:$0xff] }
 0x52c   : > { %4457 = vmatmul.mubr.f32.gmra.mxu1 %v4053_v46 }
 0x52d   : > { %v4086_v42 = vsel %vm328_vm13, %v3059_v52, %v5564_v6  ;;  %v3988_v19 = vsel %vm328_vm13, %v2931_v22, %v5565_v20 }
 0x52e   : > { %v5573_v12 = vpop.permute.xlu1 %5572  ;;  %v5578_v59 = vpop.permute.xlu0 %5577  ;;  %5156 = vmatmul.mubr.msk.f32.gmra.mxu0 %vm328_vm13, %v3178_v62  ;;  %v4118_v18 = vsel %vm4001_vm15, %v4086_v42, %v5569_v28  ;;  %v4021_v9 = vsel %vm4001_vm15, %v3988_v19, %v5570_v5  ;;  %v3186_v28 = vld [vmem:[#allocation3 + $0xfa] sm:$0xff]  ;;  %v3187_v42 = vld [vmem:[#allocation3 + $0x10a] sm:$0xff] }
 0x52f   : > { %v5575_v8 = vunpack.i.h.bf16 %v5573_v12  ;;  %v5574_v57 = vunpack.i.l.bf16 %v5573_v12  ;;  %5158 = vmatprep.mubr.msk.f32.mxu0 %vm328_vm13, %v3179_v32  ;;  %v5580_v29 = vunpack.i.h.bf16 %v5578_v59  ;;  %v5579_v63 = vunpack.i.l.bf16 %v5578_v59 }
 0x531   : > { %v4150_v17 = vsel %vm4034_vm0, %v4118_v18, %v5574_v57  ;;  %v4054_v31 = vsel %vm4034_vm0, %v4021_v9, %v5575_v8  ;;  %v4087_v4 = vsel %vm328_vm13, %v3060_v55, %v5579_v63  ;;  %v3989_v45 = vsel %vm328_vm13, %v2932_v49, %v5580_v29  ;;  %v3062_v8 = vld [vmem:[#allocation3 + $0x121] sm:$0xff]  ;;  %v3188_v18 = vld [vmem:[#allocation3 + $0x112] sm:$0xff]  ;;  %v3063_v55 = vld [vmem:[#allocation3 + $0x129] sm:$0xff] }
 0x532   : > { %v5583_v7 = vpop.permute.xlu1 %5582  ;;  %v5588_v10 = vpop.permute.xlu0 %5587  ;;  %4461 = vmatprep.mubr.f32.mxu1 %v4150_v17  ;;  %5159 = vmatmul.mubr.msk.f32.gmra.mxu0 %vm328_vm13, %v3180_v25  ;;  %v2934_v57 = vld [vmem:[#allocation3 + $0x108] sm:$0xff]  ;;  %v2935_v49 = vld [vmem:[#allocation3 + $0x110] sm:$0xff] }
 0x533   : > { %v5585_v48 = vunpack.i.h.bf16 %v5583_v7  ;;  %v5584_v3 = vunpack.i.l.bf16 %v5583_v7  ;;  %v5590_v21 = vunpack.i.h.bf16 %v5588_v10  ;;  %v5589_v53 = vunpack.i.l.bf16 %v5588_v10  ;;  %4462 = vmatmul.mubr.f32.gmra.mxu1 %v4054_v31  ;;  %5161 = vmatprep.mubr.msk.f32.mxu0 %vm328_vm13, %v3181_v40  ;;  %v3189_v10 = vld [vmem:[#allocation3 + $0x122] sm:$0xff] }
 0x535   : > { %v4119_v51 = vsel %vm4001_vm15, %v4087_v4, %v5584_v3  ;;  %v4022_v50 = vsel %vm4001_vm15, %v3989_v45, %v5585_v48  ;;  %v3190_v4 = vld [vmem:[#allocation3 + $0x12a] sm:$0xff] }
 0x536   : > { %v5593_v26 = vpop.permute.xlu1 %5592  ;;  %v5598_v14 = vpop.permute.xlu0 %5597  ;;  %5162 = vmatmul.mubr.msk.f32.gmra.mxu0 %vm328_vm13, %v3182_v61  ;;  %v4151_v24 = vsel %vm4034_vm0, %v4119_v51, %v5589_v53  ;;  %v4055_v41 = vsel %vm4034_vm0, %v4022_v50, %v5590_v21 }
 0x537   : > { %v5595_v11 = vunpack.i.h.bf16 %v5593_v26  ;;  %v5594_v47 = vunpack.i.l.bf16 %v5593_v26  ;;  %4466 = vmatprep.mubr.f32.mxu1 %v4151_v24  ;;  %5164 = vmatprep.mubr.msk.f32.mxu0 %vm328_vm13, %v3183_v2  ;;  %v5600_v35 = vunpack.i.h.bf16 %v5598_v14  ;;  %v5599_v54 = vunpack.i.l.bf16 %v5598_v14  ;;  %v3191_v26 = vld [vmem:[#allocation3 + $0x13a] sm:$0xff] }
 0x538   : > { %4467 = vmatmul.mubr.f32.gmra.mxu1 %v4055_v41 }
 0x539   : > { %v4088_v44 = vsel %vm328_vm13, %v3061_v27, %v5594_v47  ;;  %v3990_v15 = vsel %vm328_vm13, %v2933_v38, %v5595_v11 }
 0x53a   : > { %v5603_v37 = vpop.permute.xlu1 %5602  ;;  %v5608_v36 = vpop.permute.xlu0 %5607  ;;  %5165 = vmatmul.mubr.msk.f32.gmra.mxu0 %vm328_vm13, %v3184_v33  ;;  %v4120_v20 = vsel %vm4001_vm15, %v4088_v44, %v5599_v54  ;;  %v4023_v6 = vsel %vm4001_vm15, %v3990_v15, %v5600_v35 }
 0x53b   : > { %v5605_v23 = vunpack.i.h.bf16 %v5603_v37  ;;  %v5604_v58 = vunpack.i.l.bf16 %v5603_v37  ;;  %5167 = vmatprep.mubr.msk.f32.mxu0 %vm328_vm13, %v3185_v34  ;;  %v5610_v60 = vunpack.i.h.bf16 %v5608_v36  ;;  %v5609_v46 = vunpack.i.l.bf16 %v5608_v36  ;;  %v3064_v36 = vld [vmem:[#allocation3 + $0x139] sm:$0xff] }
 0x53c   : > { %v2936_v34 = vld [vmem:[#allocation3 + $0x120] sm:$0xff] }
 0x53d   : > { %v4152_v5 = vsel %vm4034_vm0, %v4120_v20, %v5604_v58  ;;  %v4056_v52 = vsel %vm4034_vm0, %v4023_v6, %v5605_v23  ;;  %v4089_v29 = vsel %vm328_vm13, %v3062_v8, %v5609_v46  ;;  %v3991_v63 = vsel %vm328_vm13, %v2934_v57, %v5610_v60 }
 0x53e   : > { %v5613_v22 = vpop.permute.xlu1 %5612  ;;  %v5618_v62 = vpop.permute.xlu0 %5617  ;;  %4471 = vmatprep.mubr.f32.mxu1 %v4152_v5  ;;  %5168 = vmatmul.mubr.msk.f32.gmra.mxu0 %vm328_vm13, %v3186_v28 }
 0x53f   : > { %v5615_v19 = vunpack.i.h.bf16 %v5613_v22  ;;  %v5614_v12 = vunpack.i.l.bf16 %v5613_v22  ;;  %v5620_v59 = vunpack.i.h.bf16 %v5618_v62  ;;  %v5619_v32 = vunpack.i.l.bf16 %v5618_v62  ;;  %4472 = vmatmul.mubr.f32.gmra.mxu1 %v4056_v52  ;;  %5170 = vmatprep.mubr.msk.f32.mxu0 %vm328_vm13, %v3187_v42  ;;  %v3065_v62 = vld [vmem:[#allocation3 + $0x141] sm:$0xff] }
 0x540   : > { %v2937_v42 = vld [vmem:[#allocation3 + $0x128] sm:$0xff] }
 0x541   : > { %v4121_v9 = vsel %vm4001_vm15, %v4089_v29, %v5614_v12  ;;  %v4024_v17 = vsel %vm4001_vm15, %v3991_v63, %v5615_v19 }
 0x542   : > { %v5623_v25 = vpop.permute.xlu1 %5622  ;;  %v5628_v31 = vpop.permute.xlu0 %5627  ;;  %5171 = vmatmul.mubr.msk.f32.gmra.mxu0 %vm328_vm13, %v3188_v18  ;;  %v4153_v7 = vsel %vm4034_vm0, %v4121_v9, %v5619_v32  ;;  %v4057_v40 = vsel %vm4034_vm0, %v4024_v17, %v5620_v59  ;;  %v3199_v18 = vld [vmem:[#allocation3 + $0x19a] sm:$0xff] }
 0x543   : > { %v5625_v48 = vunpack.i.h.bf16 %v5623_v25  ;;  %v5624_v3 = vunpack.i.l.bf16 %v5623_v25  ;;  %4476 = vmatprep.mubr.f32.mxu1 %v4153_v7  ;;  %5173 = vmatprep.mubr.msk.f32.mxu0 %vm328_vm13, %v3189_v10  ;;  %v5630_v21 = vunpack.i.h.bf16 %v5628_v31  ;;  %v5629_v53 = vunpack.i.l.bf16 %v5628_v31 }
 0x544   : > { %4477 = vmatmul.mubr.f32.gmra.mxu1 %v4057_v40  ;;  %v3066_v40 = vld [vmem:[#allocation3 + $0x151] sm:$0xff] }
 0x545   : > { %v4090_v45 = vsel %vm328_vm13, %v3063_v55, %v5624_v3  ;;  %v3992_v61 = vsel %vm328_vm13, %v2935_v49, %v5625_v48  ;;  %v2938_v48 = vld [vmem:[#allocation3 + $0x138] sm:$0xff]  ;;  %v3200_v3 = vld [vmem:[#allocation3 + $0x1a2] sm:$0xff] }
 0x546   : > { %v5633_v51 = vpop.permute.xlu1 %5632  ;;  %v5638_v50 = vpop.permute.xlu0 %5637  ;;  %5174 = vmatmul.mubr.msk.f32.gmra.mxu0 %vm328_vm13, %v3190_v4  ;;  %v4122_v11 = vsel %vm4001_vm15, %v4090_v45, %v5629_v53  ;;  %v4025_v47 = vsel %vm4001_vm15, %v3992_v61, %v5630_v21 }
 0x547   : > { %v5635_v14 = vunpack.i.h.bf16 %v5633_v51  ;;  %v5634_v24 = vunpack.i.l.bf16 %v5633_v51  ;;  %5176 = vmatprep.mubr.msk.f32.mxu0 %vm328_vm13, %v3191_v26  ;;  %v5640_v2 = vunpack.i.h.bf16 %v5638_v50  ;;  %v5639_v41 = vunpack.i.l.bf16 %v5638_v50 }
 0x549   : > { %v4154_v35 = vsel %vm4034_vm0, %v4122_v11, %v5634_v24  ;;  %v4058_v54 = vsel %vm4034_vm0, %v4025_v47, %v5635_v14  ;;  %v4091_v23 = vsel %vm328_vm13, %v3064_v36, %v5639_v41  ;;  %v3993_v58 = vsel %vm328_vm13, %v2936_v34, %v5640_v2  ;;  %v3067_v24 = vld [vmem:[#allocation3 + $0x159] sm:$0xff] }
 0x54a   : > { %v5643_v27 = vpop.permute.xlu1 %5642  ;;  %v5648_v38 = vpop.permute.xlu0 %5647  ;;  %4481 = vmatprep.mubr.f32.mxu1 %v4154_v35  ;;  %5177 = vmatmul.mubr.msk.f32.gmra.mxu0 %vm328_vm13, %v8481_v43  ;;  %v2939_v2 = vld [vmem:[#allocation3 + $0x140] sm:$0xff] }
 0x54b   : > { %v5645_v33 = vunpack.i.h.bf16 %v5643_v27  ;;  %v5644_v44 = vunpack.i.l.bf16 %v5643_v27  ;;  %v5650_v15 = vunpack.i.h.bf16 %v5648_v38  ;;  %v5649_v37 = vunpack.i.l.bf16 %v5648_v38  ;;  %4482 = vmatmul.mubr.f32.gmra.mxu1 %v4058_v54  ;;  %5179 = vmatprep.mubr.msk.f32.mxu0 %vm328_vm13, %v8501_v30 }
 0x54d   : > { %v4123_v60 = vsel %vm4001_vm15, %v4091_v23, %v5644_v44  ;;  %v4026_v46 = vsel %vm4001_vm15, %v3993_v58, %v5645_v33 }
 0x54e   : > { %v5653_v20 = vpop.permute.xlu1 %5652  ;;  %v5658_v43 = vpop.permute.xlu0 %5657  ;;  %5180 = vmatmul.mubr.msk.f32.gmra.mxu0 %vm328_vm13, %v8533_v13  ;;  %v4155_v6 = vsel %vm4034_vm0, %v4123_v60, %v5649_v37  ;;  %v4059_v5 = vsel %vm4034_vm0, %v4026_v46, %v5650_v15 }
 0x54f   : > { %v5655_v30 = vunpack.i.h.bf16 %v5653_v20  ;;  %v5654_v28 = vunpack.i.l.bf16 %v5653_v20  ;;  %4486 = vmatprep.mubr.f32.mxu1 %v4155_v6  ;;  %5182 = vmatprep.mubr.msk.f32.mxu0 %vm328_vm13, %v8554_v39  ;;  %v5660_v52 = vunpack.i.h.bf16 %v5658_v43  ;;  %v5659_v22 = vunpack.i.l.bf16 %v5658_v43  ;;  %v3068_v43 = vld [vmem:[#allocation3 + $0x169] sm:$0xff] }
 0x550   : > { %4487 = vmatmul.mubr.f32.gmra.mxu1 %v4059_v5  ;;  %v2940_v6 = vld [vmem:[#allocation3 + $0x150] sm:$0xff] }
 0x551   : > { %v4092_v19 = vsel %vm328_vm13, %v3065_v62, %v5654_v28  ;;  %v3994_v12 = vsel %vm328_vm13, %v2937_v42, %v5655_v30 }
 0x552   : > { %v5663_v13 = vpop.permute.xlu1 %5662  ;;  %v5668_v59 = vpop.permute.xlu0 %5667  ;;  %5183 = vmatmul.mubr.msk.f32.gmra.mxu0 %vm328_vm13, %v8586_v1  ;;  %v4124_v29 = vsel %vm4001_vm15, %v4092_v19, %v5659_v22  ;;  %v4027_v63 = vsel %vm4001_vm15, %v3994_v12, %v5660_v52 }
 0x553   : > { %v5665_v32 = vunpack.i.h.bf16 %v5663_v13  ;;  %v5664_v8 = vunpack.i.l.bf16 %v5663_v13  ;;  %5185 = vmatprep.mubr.msk.f32.mxu0 %vm328_vm13, %v8600_v16  ;;  %v5670_v39 = vunpack.i.h.bf16 %v5668_v59  ;;  %v5669_v57 = vunpack.i.l.bf16 %v5668_v59 }
 0x555   : > { %v4156_v9 = vsel %vm4034_vm0, %v4124_v29, %v5664_v8  ;;  %v4060_v17 = vsel %vm4034_vm0, %v4027_v63, %v5665_v32  ;;  %v4093_v21 = vsel %vm328_vm13, %v3066_v40, %v5669_v57  ;;  %v3995_v53 = vsel %vm328_vm13, %v2938_v48, %v5670_v39  ;;  %v3069_v8 = vld [vmem:[#allocation3 + $0x171] sm:$0xff] }
 0x556   : > { %v5673_v25 = vpop.permute.xlu1 %5672  ;;  %v5678_v31 = vpop.permute.xlu0 %5677  ;;  %4491 = vmatprep.mubr.f32.mxu1 %v4156_v9  ;;  %5186 = vmatmul.mubr.msk.f32.gmra.mxu0 %vm328_vm13, %v8624_v56  ;;  %v2941_v39 = vld [vmem:[#allocation3 + $0x158] sm:$0xff] }
 0x557   : > { %v5675_v1 = vunpack.i.h.bf16 %v5673_v25  ;;  %v5674_v7 = vunpack.i.l.bf16 %v5673_v25  ;;  %v5680_v16 = vunpack.i.h.bf16 %v5678_v31  ;;  %v5679_v10 = vunpack.i.l.bf16 %v5678_v31  ;;  %4492 = vmatmul.mubr.f32.gmra.mxu1 %v4060_v17  ;;  %5188 = vmatprep.mubr.msk.f32.mxu0 %vm328_vm13, %v3199_v18 }
 0x559   : > { %v4125_v55 = vsel %vm4001_vm15, %v4093_v21, %v5674_v7  ;;  %v4028_v49 = vsel %vm4001_vm15, %v3995_v53, %v5675_v1 }
 0x55a   : > { %v5683_v4 = vpop.permute.xlu1 %5682  ;;  %v5688_v56 = vpop.permute.xlu0 %5687  ;;  %v4157_v45 = vsel %vm4034_vm0, %v4125_v55, %v5679_v10  ;;  %v4061_v61 = vsel %vm4034_vm0, %v4028_v49, %v5680_v16  ;;  %5189 = vmatmul.mubr.msk.f32.gmra.mxu0 %vm328_vm13, %v3200_v3  ;;  %v3070_v49 = vld [vmem:[#allocation3 + $0x181] sm:$0xff] }
 0x55b   : > { %v5685_v51 = vunpack.i.h.bf16 %v5683_v4  ;;  %v5684_v50 = vunpack.i.l.bf16 %v5683_v4  ;;  %4496 = vmatprep.mubr.f32.mxu1 %v4157_v45  ;;  %v5690_v26 = vunpack.i.h.bf16 %v5688_v56  ;;  %v5689_v14 = vunpack.i.l.bf16 %v5688_v56  ;;  %v2942_v4 = vld [vmem:[#allocation3 + $0x168] sm:$0xff] }
 0x55c   : > { %4497 = vmatmul.mubr.f32.gmra.mxu1 %v4061_v61 }
 0x55d   : > { %v4094_v41 = vsel %vm328_vm13, %v3067_v24, %v5684_v50  ;;  %v3996_v11 = vsel %vm328_vm13, %v2939_v2, %v5685_v51 }
 0x55e   : > { %v5693_v47 = vpop.permute.xlu1 %5692  ;;  %v5698_v35 = vpop.permute.xlu0 %5697  ;;  %v4126_v44 = vsel %vm4001_vm15, %v4094_v41, %v5689_v14  ;;  %v4029_v15 = vsel %vm4001_vm15, %v3996_v11, %v5690_v26 }
 0x55f   : > { %v5695_v54 = vunpack.i.h.bf16 %v5693_v47  ;;  %v5694_v27 = vunpack.i.l.bf16 %v5693_v47  ;;  %v5700_v38 = vunpack.i.h.bf16 %v5698_v35  ;;  %v5699_v33 = vunpack.i.l.bf16 %v5698_v35  ;;  %v2943_v35 = vld [vmem:[#allocation3 + $0x170] sm:$0xff] }
 0x561   : > { %v4158_v37 = vsel %vm4034_vm0, %v4126_v44, %v5694_v27  ;;  %v4062_v36 = vsel %vm4034_vm0, %v4029_v15, %v5695_v54  ;;  %v4095_v5 = vsel %vm328_vm13, %v3068_v43, %v5699_v33  ;;  %v3997_v30 = vsel %vm328_vm13, %v2940_v6, %v5700_v38 }
 0x562   : > { %v5703_v34 = vpop.permute.xlu1 %5702  ;;  %v5708_v23 = vpop.permute.xlu0 %5707  ;;  %4501 = vmatprep.mubr.f32.mxu1 %v4158_v37 }
 0x563   : > { %v5705_v58 = vunpack.i.h.bf16 %v5703_v34  ;;  %v5704_v60 = vunpack.i.l.bf16 %v5703_v34  ;;  %v5710_v46 = vunpack.i.h.bf16 %v5708_v23  ;;  %v5709_v20 = vunpack.i.l.bf16 %v5708_v23  ;;  %4502 = vmatmul.mubr.f32.gmra.mxu1 %v4062_v36 }
 0x565   : > { %v4127_v28 = vsel %vm4001_vm15, %v4095_v5, %v5704_v60  ;;  %v4030_v52 = vsel %vm4001_vm15, %v3997_v30, %v5705_v58 }
 0x566   : > { %v5713_v22 = vpop.permute.xlu1 %5712  ;;  %v5718_v62 = vpop.permute.xlu0 %5717  ;;  %v4159_v42 = vsel %vm4034_vm0, %v4127_v28, %v5709_v20  ;;  %v4063_v19 = vsel %vm4034_vm0, %v4030_v52, %v5710_v46 }
 0x567   : > { %v5715_v12 = vunpack.i.h.bf16 %v5713_v22  ;;  %v5714_v13 = vunpack.i.l.bf16 %v5713_v22  ;;  %4506 = vmatprep.mubr.f32.mxu1 %v4159_v42  ;;  %v5720_v59 = vunpack.i.h.bf16 %v5718_v62  ;;  %v5719_v32 = vunpack.i.l.bf16 %v5718_v62 }
 0x568   : > { %4507 = vmatmul.mubr.f32.gmra.mxu1 %v4063_v19 }
 0x569   : > { %v4096_v57 = vsel %vm328_vm13, %v3069_v8, %v5714_v13  ;;  %v3998_v29 = vsel %vm328_vm13, %v2941_v39, %v5715_v12 }
 0x56a   : > { %v5723_v63 = vpop.permute.xlu1 %5722  ;;  %v5728_v18 = vpop.permute.xlu0 %5727  ;;  %v4128_v1 = vsel %vm4001_vm15, %v4096_v57, %v5719_v32  ;;  %v4031_v7 = vsel %vm4001_vm15, %v3998_v29, %v5720_v59 }
 0x56b   : > { %v5725_v9 = vunpack.i.h.bf16 %v5723_v63  ;;  %v5724_v17 = vunpack.i.l.bf16 %v5723_v63  ;;  %v5730_v25 = vunpack.i.h.bf16 %v5728_v18  ;;  %v5729_v31 = vunpack.i.l.bf16 %v5728_v18 }
 0x56d   : > { %v4160_v16 = vsel %vm4034_vm0, %v4128_v1, %v5724_v17  ;;  %v4064_v10 = vsel %vm4034_vm0, %v4031_v7, %v5725_v9  ;;  %v4097_v56 = vsel %vm328_vm13, %v3070_v49, %v5729_v31  ;;  %v3999_v45 = vsel %vm328_vm13, %v2942_v4, %v5730_v25  ;;  %v8832_v1 = vld [vmem:[%s8995_s5] ss:$0 sm:$0xff] }
 0x56e   : > { %v5733_v40 = vpop.permute.xlu1 %5732  ;;  %v5738_v48 = vpop.permute.xlu0 %5737  ;;  %4511 = vmatprep.mubr.f32.mxu1 %v4160_v16  ;;  %v4752_v49 = vld [vmem:[%s5971_s7] sm:$0xff] }
 0x56f   : > { %v5735_v3 = vunpack.i.h.bf16 %v5733_v40  ;;  %v5734_v21 = vunpack.i.l.bf16 %v5733_v40  ;;  %v5740_v53 = vunpack.i.h.bf16 %v5738_v48  ;;  %v5739_v55 = vunpack.i.l.bf16 %v5738_v48  ;;  %4512 = vmatmul.mubr.f32.gmra.mxu1 %v4064_v10  ;;  %v4753_v48 = vld [vmem:[%s5971_s7 + $0x8] sm:$0xff] }
 0x571   : > { %v4129_v61 = vsel %vm4001_vm15, %v4097_v56, %v5734_v21  ;;  %v4032_v51 = vsel %vm4001_vm15, %v3999_v45, %v5735_v3 }
 0x572   : > { %v5743_v50 = vpop.permute.xlu1 %5742  ;;  %v5748_v26 = vpop.permute.xlu0 %5747  ;;  %v4161_v14 = vsel %vm4034_vm0, %v4129_v61, %v5739_v55  ;;  %v4065_v24 = vsel %vm4034_vm0, %v4032_v51, %v5740_v53 }
 0x573   : > { %v5745_v2 = vunpack.i.h.bf16 %v5743_v50  ;;  %v5744_v41 = vunpack.i.l.bf16 %v5743_v50  ;;  %4516 = vmatprep.mubr.f32.mxu1 %v4161_v14  ;;  %v5750_v11 = vunpack.i.h.bf16 %v5748_v26  ;;  %v5749_v47 = vunpack.i.l.bf16 %v5748_v26  ;;  %v4755_v50 = vld [vmem:[%s5971_s7 + $0x18] sm:$0xff] }
 0x574   : > { %4517 = vmatmul.mubr.f32.gmra.mxu1 %v4065_v24 }
 0x575   : > { %v4098_v54 = vsel %vm328_vm13, %v8598_v0, %v5744_v41  ;;  %v4000_v27 = vsel %vm328_vm13, %v2943_v35, %v5745_v2  ;;  %v4754_v41 = vld [vmem:[%s5971_s7 + $0x10] sm:$0xff] }
 0x576   : > { %v5753_v38 = vpop.permute.xlu1 %5752  ;;  %v4130_v15 = vsel %vm4001_vm15, %v4098_v54, %v5749_v47  ;;  %v4033_v37 = vsel %vm4001_vm15, %v4000_v27, %v5750_v11  ;;  %v4757_v27 = vld [vmem:[%s5971_s7 + $0x28] sm:$0xff] }
 0x577   : > { %v5755_v33 = vunpack.i.h.bf16 %v5753_v38  ;;  %v5754_v44 = vunpack.i.l.bf16 %v5753_v38 }
 0x579   : > { %v4162_v36 = vsel %vm4034_vm0, %v4130_v15, %v5754_v44  ;;  %v4066_v34 = vsel %vm4034_vm0, %v4033_v37, %v5755_v33 }
 0x57a   : > { %4521 = vmatprep.mubr.f32.mxu1 %v4162_v36  ;;  %v4756_v36 = vld [vmem:[%s5971_s7 + $0x20] sm:$0xff] }
 0x57b   : > { %4522 = vmatmul.mubr.f32.gmra.mxu1 %v4066_v34 }
 0x58d   : > { %v8809_v23 = vpop.f32.mrf.mxu1 }
 0x58f   : > { %v4400_v58 = vpop.f32.mrf.mxu1 }
 0x591   : > { %v8811_v60 = vpop.f32.mrf.mxu1 }
 0x592   : > { %v4404_v34 = vadd.f32 %v8832_v1, %v8811_v60 }
 0x593   : > { %v4405_v0 = vpop.f32.mrf.mxu1 }
 0x597   : > { %v8813_v46 = vpop.f32.mrf.mxu1 }
 0x599   : > { %v4410_v20 = vpop.f32.mrf.mxu1 }
 0x59b   : > { %v8815_v43 = vpop.f32.mrf.mxu1 }
 0x59d   : > { %v4415_v6 = vpop.f32.mrf.mxu1 }
 0x5a3   : > { %v4368_v5 = vpop.f32.mrf.mxu0  ;;  %v8817_v30 = vpop.f32.mrf.mxu1 }
 0x5a4   : > { %v4369_v3 = vadd.f32 %v8832_v1, %v4368_v5  ;;  %v4759_v5 = vld [vmem:[%s5971_s7 + $0x38] sm:$0xff] }
 0x5a5   : > { %v4370_v28 = vpop.f32.mrf.mxu0  ;;  %v4420_v52 = vpop.f32.mrf.mxu1 }
 0x5a6   : > { %v4399_v28 = vadd.f32 %v8832_v1, %v8809_v23 }
 0x5ae   : > { %v4373_v22 = vpop.f32.mrf.mxu0  ;;  %v8819_v62 = vpop.f32.mrf.mxu1 }
 0x5af   : > { %v4374_v10 = vadd.f32 %v8832_v1, %v4373_v22 }
 0x5b0   : > { %v4375_v42 = vpop.f32.mrf.mxu0  ;;  %v4425_v19 = vpop.f32.mrf.mxu1 }
 0x5b1   : > { %v4758_v19 = vld [vmem:[%s5971_s7 + $0x30] sm:$0xff] }
 0x5ba   : > { %v4378_v12 = vpop.f32.mrf.mxu0  ;;  %v8821_v13 = vpop.f32.mrf.mxu1 }
 0x5bb   : > { %v4379_v26 = vadd.f32 %v8832_v1, %v4378_v12  ;;  %v4414_v12 = vadd.f32 %v8832_v1, %v8815_v43  ;;  %v4760_v43 = vld [vmem:[%s5971_s7 + $0x40] sm:$0xff] }
 0x5bc   : > { %v4380_v59 = vpop.f32.mrf.mxu0  ;;  %v4430_v32 = vpop.f32.mrf.mxu1 }
 0x5c3   : > { %v4383_v8 = vpop.f32.mrf.mxu0  ;;  %v8823_v39 = vpop.f32.mrf.mxu1 }
 0x5c4   : > { %v4384_v4 = vadd.f32 %v8832_v1, %v4383_v8 }
 0x5c5   : > { %v4385_v57 = vpop.f32.mrf.mxu0  ;;  %v4435_v29 = vpop.f32.mrf.mxu1 }
 0x5c6   : > { %v4761_v57 = vld [vmem:[%s5971_s7 + $0x48] sm:$0xff]  ;;  %v4409_v29 = vadd.f32 %v8832_v1, %v8813_v46  ;;  %v4419_v46 = vadd.f32 %v8832_v1, %v8817_v30 }
 0x5c7   : > { %v4765_v30 = vld [vmem:[%s5971_s7 + $0x68] sm:$0xff] }
 0x5cf   : > { %v4388_v63 = vpop.f32.mrf.mxu0  ;;  %v8825_v18 = vpop.f32.mrf.mxu1 }
 0x5d0   : > { %v4389_v38 = vadd.f32 %v8832_v1, %v4388_v63 }
 0x5d1   : > { %v4390_v9 = vpop.f32.mrf.mxu0  ;;  %v4440_v17 = vpop.f32.mrf.mxu1 }
 0x5da   : > { %v4393_v25 = vpop.f32.mrf.mxu0  ;;  %v8827_v31 = vpop.f32.mrf.mxu1 }
 0x5db   : > { %v4394_v11 = vadd.f32 %v8832_v1, %v4393_v25  ;;  %v4424_v25 = vadd.f32 %v8832_v1, %v8819_v62  ;;  %v4434_v62 = vadd.f32 %v8832_v1, %v8823_v39  ;;  %v4764_v39 = vld [vmem:[%s5971_s7 + $0x60] sm:$0xff] }
 0x5dc   : > { %v4395_v7 = vpop.f32.mrf.mxu0  ;;  %v4445_v16 = vpop.f32.mrf.mxu1 }
 0x5de   : > { %v5145_v40 = vpop.f32.mrf.mxu0 }
 0x5df   : > { %v4599_v21 = vadd.f32 %v5145_v40, %v4374_v10  ;;  %v4763_v40 = vld [vmem:[%s5971_s7 + $0x58] sm:$0xff] }
 0x5e0   : > { %v8843_v53 = vpop.f32.mrf.mxu1  ;;  %v4593_v55 = vpop.f32.mrf.mxu0 }
 0x5e1   : > { %v4785_v56 = vadd.f32 %v4753_v48, %v4599_v21  ;;  %v4594_v45 = vadd.f32 %v4593_v55, %v4369_v3 }
 0x5e2   : > { %v4450_v61 = vpop.f32.mrf.mxu1  ;;  %v5148_v51 = vpop.f32.mrf.mxu0 }
 0x5e3   : > { %4817 = vst.msk [vmem:[%s8841_s15 + $0x8] sm:$0xff] %vm417_vm2, %v4785_v56  ;;  %v4784_v14 = vadd.f32 %v4752_v49, %v4594_v45  ;;  %v4609_v24 = vadd.f32 %v5148_v51, %v4384_v4  ;;  %v4762_v49 = vld [vmem:[%s5971_s7 + $0x50] sm:$0xff]  ;;  %v4429_v51 = vadd.f32 %v8832_v1, %v8821_v13 }
 0x5e4   : > { %v4603_v2 = vpop.f32.mrf.mxu0 }
 0x5e5   : > { %4816 = vst.msk [vmem:[%s8841_s15] sm:$0xff] %vm417_vm2, %v4784_v14  ;;  %v4787_v47 = vadd.f32 %v4755_v50, %v4609_v24  ;;  %v4604_v35 = vadd.f32 %v4603_v2, %v4379_v26  ;;  %v4444_v2 = vadd.f32 %v8832_v1, %v8827_v31  ;;  %v4766_v31 = vld [vmem:[%s5971_s7 + $0x70] sm:$0xff] }
 0x5e6   : > { %v5151_v54 = vpop.f32.mrf.mxu0 }
 0x5e7   : > { %4819 = vst.msk [vmem:[%s8841_s15 + $0x18] sm:$0xff] %vm417_vm2, %v4787_v47  ;;  %v4786_v33 = vadd.f32 %v4754_v41, %v4604_v35  ;;  %v4619_v44 = vadd.f32 %v5151_v54, %v4394_v11  ;;  %v8859_v15 = vpop.f32.mrf.mxu1  ;;  %v4767_v35 = vld [vmem:[%s5971_s7 + $0x78] sm:$0xff]  ;;  %v4439_v54 = vadd.f32 %v8832_v1, %v8825_v18  ;;  %v4449_v18 = vadd.f32 %v8832_v1, %v8843_v53 }
 0x5e8   : > { %v4613_v37 = vpop.f32.mrf.mxu0 }
 0x5e9   : > { %4818 = vst.msk [vmem:[%s8841_s15 + $0x10] sm:$0xff] %vm417_vm2, %v4786_v33  ;;  %v4789_v58 = vadd.f32 %v4757_v27, %v4619_v44  ;;  %v4614_v0 = vadd.f32 %v4613_v37, %v4389_v38  ;;  %v4455_v20 = vpop.f32.mrf.mxu1  ;;  %v4454_v44 = vadd.f32 %v8832_v1, %v8859_v15 }
 0x5ea   : > { %v5154_v6 = vpop.f32.mrf.mxu0 }
 0x5eb   : > { %4821 = vst.msk [vmem:[%s8841_s15 + $0x28] sm:$0xff] %vm417_vm2, %v4789_v58  ;;  %v4788_v52 = vadd.f32 %v4756_v36, %v4614_v0  ;;  %v4629_v22 = vadd.f32 %v5154_v6, %v4404_v34  ;;  %v4769_v58 = vld [vmem:[%s5971_s7 + $0x88] sm:$0xff] }
 0x5ec   : > { %v8871_v42 = vpop.f32.mrf.mxu1  ;;  %v4623_v60 = vpop.f32.mrf.mxu0 }
 0x5ed   : > { %4820 = vst.msk [vmem:[%s8841_s15 + $0x20] sm:$0xff] %vm417_vm2, %v4788_v52  ;;  %v4791_v59 = vadd.f32 %v4759_v5, %v4629_v22  ;;  %v4624_v32 = vadd.f32 %v4623_v60, %v4399_v28  ;;  %v4768_v28 = vld [vmem:[%s5971_s7 + $0x80] sm:$0xff]  ;;  %v4459_v53 = vadd.f32 %v8832_v1, %v8871_v42 }
 0x5ee   : > { %v4460_v8 = vpop.f32.mrf.mxu1  ;;  %v5157_v23 = vpop.f32.mrf.mxu0 }
 0x5ef   : > { %4823 = vst.msk [vmem:[%s8841_s15 + $0x38] sm:$0xff] %vm417_vm2, %v4791_v59  ;;  %v4790_v63 = vadd.f32 %v4758_v19, %v4624_v32  ;;  %v4639_v9 = vadd.f32 %v5157_v23, %v4414_v12  ;;  %v4771_v12 = vld [vmem:[%s5971_s7 + $0x98] sm:$0xff] }
 0x5f0   : > { %v4633_v17 = vpop.f32.mrf.mxu0 }
 0x5f1   : > { %4822 = vst.msk [vmem:[%s8841_s15 + $0x30] sm:$0xff] %vm417_vm2, %v4790_v63  ;;  %v4793_v7 = vadd.f32 %v4761_v57, %v4639_v9  ;;  %v4634_v16 = vadd.f32 %v4633_v17, %v4409_v29  ;;  %v4770_v57 = vld [vmem:[%s5971_s7 + $0x90] sm:$0xff] }
 0x5f2   : > { %v5160_v10 = vpop.f32.mrf.mxu0 }
 0x5f3   : > { %4825 = vst.msk [vmem:[%s8841_s15 + $0x48] sm:$0xff] %vm417_vm2, %v4793_v7  ;;  %v4792_v48 = vadd.f32 %v4760_v43, %v4634_v16  ;;  %v4649_v3 = vadd.f32 %v5160_v10, %v4424_v25  ;;  %v4463_v21 = vpop.f32.mrf.mxu1  ;;  %v4773_v25 = vld [vmem:[%s5971_s7 + $0xa8] sm:$0xff] }
 0x5f4   : > { %v4643_v55 = vpop.f32.mrf.mxu0  ;;  %v4464_v15 = vadd.f32 %v8832_v1, %v4463_v21 }
 0x5f5   : > { %4824 = vst.msk [vmem:[%s8841_s15 + $0x40] sm:$0xff] %vm417_vm2, %v4792_v48  ;;  %v4795_v4 = vadd.f32 %v4763_v40, %v4649_v3  ;;  %v4644_v56 = vadd.f32 %v4643_v55, %v4419_v46  ;;  %v4465_v45 = vpop.f32.mrf.mxu1  ;;  %v4772_v40 = vld [vmem:[%s5971_s7 + $0xa0] sm:$0xff] }
 0x5f6   : > { %v5163_v61 = vpop.f32.mrf.mxu0  ;;  %v4775_v45 = vld [vmem:[%s5971_s7 + $0xb8] sm:$0xff] }
 0x5f7   : > { %4827 = vst.msk [vmem:[%s8841_s15 + $0x58] sm:$0xff] %vm417_vm2, %v4795_v4  ;;  %v4794_v50 = vadd.f32 %v4762_v49, %v4644_v56  ;;  %v4659_v26 = vadd.f32 %v5163_v61, %v4434_v62  ;;  %v4774_v56 = vld [vmem:[%s5971_s7 + $0xb0] sm:$0xff] }
 0x5f8   : > { %v4468_v14 = vpop.f32.mrf.mxu1  ;;  %v4653_v24 = vpop.f32.mrf.mxu0 }
 0x5f9   : > { %4826 = vst.msk [vmem:[%s8841_s15 + $0x50] sm:$0xff] %vm417_vm2, %v4794_v50  ;;  %v4797_v41 = vadd.f32 %v4765_v30, %v4659_v26  ;;  %v4654_v11 = vadd.f32 %v4653_v24, %v4429_v51  ;;  %v4469_v42 = vadd.f32 %v8832_v1, %v4468_v14 }
 0x5fa   : > { %v4470_v47 = vpop.f32.mrf.mxu1  ;;  %v5166_v13 = vpop.f32.mrf.mxu0 }
 0x5fb   : > { %4829 = vst.msk [vmem:[%s8841_s15 + $0x68] sm:$0xff] %vm417_vm2, %v4797_v41  ;;  %v4796_v27 = vadd.f32 %v4764_v39, %v4654_v11  ;;  %v4669_v38 = vadd.f32 %v5166_v13, %v4444_v2  ;;  %v4776_v41 = vld [vmem:[%s5971_s7 + $0xc0] sm:$0xff] }
 0x5fc   : > { %v4663_v33 = vpop.f32.mrf.mxu0 }
 0x5fd   : > { %4828 = vst.msk [vmem:[%s8841_s15 + $0x60] sm:$0xff] %vm417_vm2, %v4796_v27  ;;  %v4799_v37 = vadd.f32 %v4767_v35, %v4669_v38  ;;  %v4664_v36 = vadd.f32 %v4663_v33, %v4439_v54  ;;  %v4777_v27 = vld [vmem:[%s5971_s7 + $0xc8] sm:$0xff] }
 0x5fe   : > { %v5169_v34 = vpop.f32.mrf.mxu0 }
 0x5ff   : > { %4831 = vst.msk [vmem:[%s8841_s15 + $0x78] sm:$0xff] %vm417_vm2, %v4799_v37  ;;  %v4798_v0 = vadd.f32 %v4766_v31, %v4664_v36  ;;  %v4679_v20 = vadd.f32 %v5169_v34, %v4454_v44  ;;  %v4473_v6 = vpop.f32.mrf.mxu1 }
 0x600   : > { %v4673_v5 = vpop.f32.mrf.mxu0  ;;  %v4474_v29 = vadd.f32 %v8832_v1, %v4473_v6 }
 0x601   : > { %4830 = vst.msk [vmem:[%s8841_s15 + $0x70] sm:$0xff] %vm417_vm2, %v4798_v0  ;;  %v4801_v52 = vadd.f32 %v4769_v58, %v4679_v20  ;;  %v4674_v22 = vadd.f32 %v4673_v5, %v4449_v18  ;;  %v4475_v60 = vpop.f32.mrf.mxu1  ;;  %v4778_v58 = vld [vmem:[%s5971_s7 + $0xd0] sm:$0xff] }
 0x602   : > { %v5172_v19 = vpop.f32.mrf.mxu0 }
 0x603   : > { %4833 = vst.msk [vmem:[%s8841_s15 + $0x88] sm:$0xff] %vm417_vm2, %v4801_v52  ;;  %v4800_v59 = vadd.f32 %v4768_v28, %v4674_v22  ;;  %v4689_v32 = vadd.f32 %v5172_v19, %v4464_v15  ;;  %v4779_v28 = vld [vmem:[%s5971_s7 + $0xd8] sm:$0xff] }
 0x604   : > { %v4478_v8 = vpop.f32.mrf.mxu1  ;;  %v4683_v23 = vpop.f32.mrf.mxu0 }
 0x605   : > { %4832 = vst.msk [vmem:[%s8841_s15 + $0x80] sm:$0xff] %vm417_vm2, %v4800_v59  ;;  %v4803_v63 = vadd.f32 %v4771_v12, %v4689_v32  ;;  %v4684_v9 = vadd.f32 %v4683_v23, %v4459_v53  ;;  %v4479_v21 = vadd.f32 %v8832_v1, %v4478_v8  ;;  %v4780_v59 = vld [vmem:[%s5971_s7 + $0xe0] sm:$0xff] }
 0x606   : > { %v4480_v17 = vpop.f32.mrf.mxu1  ;;  %v5175_v43 = vpop.f32.mrf.mxu0 }
 0x607   : > { %4835 = vst.msk [vmem:[%s8841_s15 + $0x98] sm:$0xff] %vm417_vm2, %v4803_v63  ;;  %v4802_v7 = vadd.f32 %v4770_v57, %v4684_v9  ;;  %v4699_v16 = vadd.f32 %v5175_v43, %v4474_v29  ;;  %v4781_v9 = vld [vmem:[%s5971_s7 + $0xe8] sm:$0xff] }
 0x608   : > { %v4693_v10 = vpop.f32.mrf.mxu0 }
 0x609   : > { %4834 = vst.msk [vmem:[%s8841_s15 + $0x90] sm:$0xff] %vm417_vm2, %v4802_v7  ;;  %v4805_v46 = vadd.f32 %v4773_v25, %v4699_v16  ;;  %v4694_v48 = vadd.f32 %v4693_v10, %v4469_v42 }
 0x60a   : > { %v5178_v3 = vpop.f32.mrf.mxu0 }
 0x60b   : > { %4837 = vst.msk [vmem:[%s8841_s15 + $0xa8] sm:$0xff] %vm417_vm2, %v4805_v46  ;;  %v4804_v55 = vadd.f32 %v4772_v40, %v4694_v48  ;;  %v4483_v49 = vpop.f32.mrf.mxu1  ;;  %v4782_v40 = vld [vmem:[%s5971_s7 + $0xf0] sm:$0xff] }
 0x60c   : > { %v4484_v62 = vadd.f32 %v8832_v1, %v4483_v49  ;;  %v4703_v4 = vpop.f32.mrf.mxu0 }
 0x60d   : > { %4836 = vst.msk [vmem:[%s8841_s15 + $0xa0] sm:$0xff] %vm417_vm2, %v4804_v55  ;;  %v4704_v61 = vadd.f32 %v4703_v4, %v4479_v21  ;;  %v4485_v30 = vpop.f32.mrf.mxu1  ;;  %v4783_v55 = vld [vmem:[%s5971_s7 + $0xf8] sm:$0xff] }
 0x60e   : > { %v4709_v51 = vadd.f32 %v5178_v3, %v4484_v62  ;;  %v5181_v50 = vpop.f32.mrf.mxu0 }
 0x60f   : > { %v4806_v26 = vadd.f32 %v4774_v56, %v4704_v61 }
 0x610   : > { %v4807_v14 = vadd.f32 %v4775_v45, %v4709_v51  ;;  %v4488_v24 = vpop.f32.mrf.mxu1  ;;  %v4713_v2 = vpop.f32.mrf.mxu0 }
 0x611   : > { %4838 = vst.msk [vmem:[%s8841_s15 + $0xb0] sm:$0xff] %vm417_vm2, %v4806_v26  ;;  %v4489_v39 = vadd.f32 %v8832_v1, %v4488_v24 }
 0x612   : > { %4839 = vst.msk [vmem:[%s8841_s15 + $0xb8] sm:$0xff] %vm417_vm2, %v4807_v14  ;;  %v4490_v11 = vpop.f32.mrf.mxu1  ;;  %v5184_v33 = vpop.f32.mrf.mxu0 }
 0x613   : > { %v4714_v47 = vadd.f32 %v4713_v2, %v4489_v39 }
 0x614   : > { %v4723_v34 = vpop.f32.mrf.mxu0 }
 0x615   : > { %v4808_v13 = vadd.f32 %v4776_v41, %v4714_v47 }
 0x616   : > { %v5187_v52 = vpop.f32.mrf.mxu0 }
 0x617   : > { %4840 = vst.msk [vmem:[%s8841_s15 + $0xc0] sm:$0xff] %vm417_vm2, %v4808_v13  ;;  %v4493_v35 = vpop.f32.mrf.mxu1 }
 0x618   : > { %v4494_v54 = vadd.f32 %v8832_v1, %v4493_v35  ;;  %v4733_v53 = vpop.f32.mrf.mxu0 }
 0x619   : > { %v4495_v38 = vpop.f32.mrf.mxu1 }
 0x61a   : > { %v4719_v31 = vadd.f32 %v5181_v50, %v4494_v54  ;;  %v5190_v63 = vpop.f32.mrf.mxu0 }
 0x61c   : > { %v4809_v44 = vadd.f32 %v4777_v27, %v4719_v31  ;;  %v4498_v37 = vpop.f32.mrf.mxu1  ;;  %v4743_v7 = vpop.f32.mrf.mxu0 }
 0x61d   : > { %v4499_v36 = vadd.f32 %v8832_v1, %v4498_v37 }
 0x61e   : > { %4841 = vst.msk [vmem:[%s8841_s15 + $0xc8] sm:$0xff] %vm417_vm2, %v4809_v44  ;;  %v4500_v18 = vpop.f32.mrf.mxu1 }
 0x61f   : > { %v4724_v0 = vadd.f32 %v4723_v34, %v4499_v36 }
 0x621   : > { %v4810_v20 = vadd.f32 %v4778_v58, %v4724_v0 }
 0x623   : > { %4842 = vst.msk [vmem:[%s8841_s15 + $0xd0] sm:$0xff] %vm417_vm2, %v4810_v20  ;;  %v4503_v6 = vpop.f32.mrf.mxu1 }
 0x624   : > { %v4504_v5 = vadd.f32 %v8832_v1, %v4503_v6 }
 0x625   : > { %v4505_v15 = vpop.f32.mrf.mxu1 }
 0x626   : > { %v4729_v22 = vadd.f32 %v5184_v33, %v4504_v5 }
 0x628   : > { %v4811_v60 = vadd.f32 %v4779_v28, %v4729_v22  ;;  %v4508_v19 = vpop.f32.mrf.mxu1 }
 0x629   : > { %v4509_v12 = vadd.f32 %v8832_v1, %v4508_v19 }
 0x62a   : > { %4843 = vst.msk [vmem:[%s8841_s15 + $0xd8] sm:$0xff] %vm417_vm2, %v4811_v60  ;;  %v4510_v32 = vpop.f32.mrf.mxu1 }
 0x62b   : > { %v4734_v8 = vadd.f32 %v4733_v53, %v4509_v12 }
 0x62d   : > { %v4812_v23 = vadd.f32 %v4780_v59, %v4734_v8 }
 0x62f   : > { %4844 = vst.msk [vmem:[%s8841_s15 + $0xe0] sm:$0xff] %vm417_vm2, %v4812_v23  ;;  %v4513_v57 = vpop.f32.mrf.mxu1 }
 0x630   : > { %v4514_v29 = vadd.f32 %v8832_v1, %v4513_v57 }
 0x631   : > { %v4515_v17 = vpop.f32.mrf.mxu1 }
 0x632   : > { %v4739_v43 = vadd.f32 %v5187_v52, %v4514_v29 }
 0x634   : > { %v4813_v25 = vadd.f32 %v4781_v9, %v4739_v43  ;;  %v4518_v42 = vpop.f32.mrf.mxu1 }
 0x635   : > { %v4519_v16 = vadd.f32 %v8832_v1, %v4518_v42 }
 0x636   : > { %4845 = vst.msk [vmem:[%s8841_s15 + $0xe8] sm:$0xff] %vm417_vm2, %v4813_v25  ;;  %v4520_v10 = vpop.f32.mrf.mxu1 }
 0x637   : > { %v4744_v46 = vadd.f32 %v4743_v7, %v4519_v16 }
 0x639   : > { %v4814_v48 = vadd.f32 %v4782_v40, %v4744_v46 }
 0x63b   : > { %4846 = vst.msk [vmem:[%s8841_s15 + $0xf0] sm:$0xff] %vm417_vm2, %v4814_v48  ;;  %v4523_v3 = vpop.f32.mrf.mxu1 }
 0x63c   : > { %v4524_v21 = vadd.f32 %v8832_v1, %v4523_v3 }
 0x63d   : > { %v4525_v49 = vpop.f32.mrf.mxu1 }
 0x63e   : > { %v4749_v62 = vadd.f32 %v5190_v63, %v4524_v21 }
 0x640   : > { %v4815_v4 = vadd.f32 %v4783_v55, %v4749_v62 }
 0x642   : > { %4847 = vst.msk [vmem:[%s8841_s15 + $0xf8] sm:$0xff] %vm417_vm2, %v4815_v4 }
 0x643 PF: > { %s16_s21 = sadd.s32 1, %s5772_s21  }
 0x644   : > { %p13_p4 = scmp.ge.s32.totalorder %s16_s21, 4  }
 0x646   :  { %15 = sbr.rel (!%p13_p4) target bundleno = 1 (0x1), region = 81 }

</bundles_post_ra>
